<compile_context>
chip_gen: v6e
topology: v6e:2x2x1
jax: 0.10.0
libtpu: 0.0.40
codegen_flags: <defaults>
</compile_context>

<pallas_src>
import functools
import math

import jax
import jax.numpy as jnp
from jax.experimental import pallas as pl
from jax.experimental.pallas import tpu as pltpu

LN_EPS = 1e-5


def _layernorm(x, gamma, beta):
    # x: [T, D], gamma/beta: [1, D]
    mu = jnp.mean(x, axis=-1, keepdims=True)
    var = jnp.mean((x - mu) ** 2, axis=-1, keepdims=True)
    return (x - mu) * jax.lax.rsqrt(var + LN_EPS) * gamma + beta


def encoder_layer_kernel(
    x_q_ref,    # [1, TQ, D]  query rows of this tile
    x_kv_ref,   # [1, L, D]   full sequence (keys / values)
    mask_ref,   # [1, TQ, L]  nonzero == masked position
    wq_ref,     # [D, H*d_k]  fused
    wk_ref,     # [D, H*d_k]  fused
    wv_ref,     # [D, H*d_v]  fused
    wo_ref,     # [H*d_v, D]  fused
    w1_ref,     # [D, d_ff]
    b1_ref,     # [1, d_ff]
    w2_ref,     # [d_ff, D]
    b2_ref,     # [1, D]
    ln1g_ref, ln1b_ref, ln2g_ref, ln2b_ref,   # [1, D] each
    out_ref,    # [1, TQ, D]
    attn_ref,   # [1, H, TQ, L]
    *,
    n_heads,
):
    cdt = wq_ref.dtype                     # matmul-operand dtype (f32 or bf16)
    f32 = jnp.float32

    x_q = x_q_ref[0].astype(f32)           # [TQ, D]  residual path stays f32
    xq_c = x_q.astype(cdt)
    xkv_c = x_kv_ref[0].astype(cdt)        # [L, D]

    d_k = wq_ref.shape[1] // n_heads
    d_v = wv_ref.shape[1] // n_heads
    inv_sqrt_dk = 1.0 / math.sqrt(float(d_k))

    # --- fused, lane-dense projections: 3 big MXU matmuls instead of 3*H tiny ones
    q = jnp.dot(xq_c, wq_ref[...], preferred_element_type=f32)    # [TQ, H*dk]
    k = jnp.dot(xkv_c, wk_ref[...], preferred_element_type=f32)   # [L,  H*dk]
    v = jnp.dot(xkv_c, wv_ref[...], preferred_element_type=f32)   # [L,  H*dv]

    masked = mask_ref[0] > 0                                      # [TQ, L]

    # --- per-head scores / softmax / context.  H is a small static constant;
    # slices are static lane slices of the fused projections, and each head's
    # intermediates die as soon as its attention rows are stored and its
    # context is appended, so the unroll keeps live ranges small.
    ctx_parts = []
    for h in range(n_heads):
        qh = q[:, h * d_k:(h + 1) * d_k]
        kh = k[:, h * d_k:(h + 1) * d_k]
        vh = v[:, h * d_v:(h + 1) * d_v]

        s = jnp.dot(qh.astype(cdt), kh.astype(cdt).T,
                    preferred_element_type=f32) * inv_sqrt_dk     # [TQ, L] f32
        s = jnp.where(masked, f32(-1e9), s)                       # masked_fill

        m = jnp.max(s, axis=-1, keepdims=True)
        e = jnp.exp(s - m)
        p = e * pl.reciprocal(jnp.sum(e, axis=-1, keepdims=True), approx=True)

        attn_ref[0, h] = p.astype(attn_ref.dtype)
        ctx_parts.append(jnp.dot(p.astype(cdt), vh.astype(cdt),
                                 preferred_element_type=f32))     # [TQ, d_v]

    # --- fused output projection: one [TQ, H*dv] @ [H*dv, D] matmul
    ctx = jnp.concatenate(ctx_parts, axis=-1)                     # [TQ, H*dv]
    attn_out = jnp.dot(ctx.astype(cdt), wo_ref[...], preferred_element_type=f32)

    # --- residual + LayerNorm 1 (f32)
    y = _layernorm(attn_out + x_q, ln1g_ref[...], ln1b_ref[...])

    # --- position-wise feed forward (Conv1d k=1 == per-token Linear)
    h1 = jnp.maximum(
        jnp.dot(y.astype(cdt), w1_ref[...], preferred_element_type=f32)
        + b1_ref[...], 0.0)
    ffn = (jnp.dot(h1.astype(cdt), w2_ref[...], preferred_element_type=f32)
           + b2_ref[...])

    # --- residual + LayerNorm 2 (f32)
    out_ref[0] = _layernorm(ffn + y, ln2g_ref[...], ln2b_ref[...]).astype(out_ref.dtype)


def _vmem_limit_bytes():
    # Raise scoped VMEM above the conservative defaults (16 MiB v5e / 32 MiB
    # v6e,v7x) while staying well below physical capacity on any generation.
    try:
        return int(pltpu.get_tpu_info().vmem_capacity_bytes * 3 // 4)
    except Exception:
        return 48 * 1024 * 1024


def encoder_layer(x, mask, params, *, n_heads, d_k, d_v, d_ff,
                  q_tile=None, compute_dtype=jnp.float32,
                  attn_dtype=jnp.float32, single_buffer_weights=True):
    """EncoderLayer forward.  x: [B, L, D], mask: [B, L, L] (nonzero == masked)."""
    B, L, D = x.shape
    H = n_heads

    if q_tile is None:                      # query-tile axis: second parallel grid axis
        q_tile = 128 if L % 128 == 0 else L
    assert L % q_tile == 0 and (q_tile == L or q_tile % 8 == 0)
    n_qt = L // q_tile

    x = x.astype(jnp.float32)
    mask = mask.astype(jnp.float32)

    # Fuse per-head weights into lane-dense matmul operands.
    wq_f = params["wq"].transpose(1, 0, 2).reshape(D, H * d_k).astype(compute_dtype)
    wk_f = params["wk"].transpose(1, 0, 2).reshape(D, H * d_k).astype(compute_dtype)
    wv_f = params["wv"].transpose(1, 0, 2).reshape(D, H * d_v).astype(compute_dtype)
    wo_f = params["wo"].reshape(H * d_v, D).astype(compute_dtype)
    w1 = params["w1"].astype(compute_dtype)
    w2 = params["w2"].astype(compute_dtype)

    def _const_spec(shape):
        # Grid-invariant operand: constant index_map -> single VMEM buffer
        # (halves weight VMEM vs. default double-buffering; matters on v7x).
        if single_buffer_weights:
            return pl.BlockSpec(shape, lambda b, t: (0,) * len(shape),
                                pipeline_mode=pl.Buffered(1))
        return pl.BlockSpec(shape, lambda b, t: (0,) * len(shape))

    grid_spec = pltpu.PrefetchScalarGridSpec(
        num_scalar_prefetch=0,
        grid=(B, n_qt),
        in_specs=[
            pl.BlockSpec((1, q_tile, D), lambda b, t: (b, t, 0)),   # x (query rows)
            pl.BlockSpec((1, L, D), lambda b, t: (b, 0, 0)),        # x (keys/values)
            pl.BlockSpec((1, q_tile, L), lambda b, t: (b, t, 0)),   # mask rows
            _const_spec((D, H * d_k)),                              # Wq fused
            _const_spec((D, H * d_k)),                              # Wk fused
            _const_spec((D, H * d_v)),                              # Wv fused
            _const_spec((H * d_v, D)),                              # Wo fused
            _const_spec((D, d_ff)),                                 # W1
            _const_spec((1, d_ff)),                                 # b1
            _const_spec((d_ff, D)),                                 # W2
            _const_spec((1, D)),                                    # b2
            _const_spec((1, D)),                                    # ln1 gamma
            _const_spec((1, D)),                                    # ln1 beta
            _const_spec((1, D)),                                    # ln2 gamma
            _const_spec((1, D)),                                    # ln2 beta
        ],
        out_specs=[
            pl.BlockSpec((1, q_tile, D), lambda b, t: (b, t, 0)),        # enc_outputs
            pl.BlockSpec((1, H, q_tile, L), lambda b, t: (b, 0, t, 0)),  # attention
        ],
    )

    kernel = functools.partial(encoder_layer_kernel, n_heads=n_heads)

    return pl.pallas_call(
        kernel,
        out_shape=(
            jax.ShapeDtypeStruct((B, L, D), jnp.float32),
            jax.ShapeDtypeStruct((B, H, L, L), attn_dtype),
        ),
        grid_spec=grid_spec,
        compiler_params=pltpu.CompilerParams(
            dimension_semantics=("parallel", "parallel"),
            vmem_limit_bytes=_vmem_limit_bytes()),
    )(
        x, x, mask,
        wq_f, wk_f, wv_f, wo_f,
        w1, params["b1"], w2, params["b2"],
        params["ln1_g"], params["ln1_b"], params["ln2_g"], params["ln2_b"],
    )


def _reference(x, mask, params, *, n_heads, d_k, d_v, d_ff):
    """Pure-JAX reference mirroring the PyTorch forward."""
    q = jnp.einsum("bld,hdk->bhlk", x, params["wq"])
    k = jnp.einsum("bld,hdk->bhlk", x, params["wk"])
    v = jnp.einsum("bld,hdk->bhlk", x, params["wv"])
    scores = jnp.einsum("bhqk,bhmk->bhqm", q, k) / math.sqrt(d_k)
    scores = jnp.where(mask[:, None] > 0, -1e9, scores)
    attn = jax.nn.softmax(scores, axis=-1)
    ctx = jnp.einsum("bhqm,bhmv->bhqv", attn, v)
    out = jnp.einsum("bhqv,hvd->bqd", ctx, params["wo"])

    def ln(t, g, b):
        mu = t.mean(-1, keepdims=True)
        var = ((t - mu) ** 2).mean(-1, keepdims=True)
        return (t - mu) / jnp.sqrt(var + LN_EPS) * g + b

    y = ln(out + x, params["ln1_g"][0], params["ln1_b"][0])
    h1 = jax.nn.relu(jnp.einsum("bld,df->blf", y, params["w1"]) + params["b1"][0])
    ffn = jnp.einsum("blf,fd->bld", h1, params["w2"]) + params["b2"][0]
    z = ln(ffn + y, params["ln2_g"][0], params["ln2_b"][0])
    return z, attn


if __name__ == "__main__":
    # small shapes consistent with the module
    B, L, d_model = 2, 8, 32
    n_heads, d_k, d_v, d_ff = 4, 8, 8, 64

    key = jax.random.PRNGKey(0)
    keys = jax.random.split(key, 10)

    params = {
        "wq": 0.1 * jax.random.normal(keys[0], (n_heads, d_model, d_k), jnp.float32),
        "wk": 0.1 * jax.random.normal(keys[1], (n_heads, d_model, d_k), jnp.float32),
        "wv": 0.1 * jax.random.normal(keys[2], (n_heads, d_model, d_v), jnp.float32),
        "wo": 0.1 * jax.random.normal(keys[3], (n_heads, d_v, d_model), jnp.float32),
        "w1": 0.1 * jax.random.normal(keys[4], (d_model, d_ff), jnp.float32),
        "b1": 0.01 * jax.random.normal(keys[5], (1, d_ff), jnp.float32),
        "w2": 0.1 * jax.random.normal(keys[6], (d_ff, d_model), jnp.float32),
        "b2": 0.01 * jax.random.normal(keys[7], (1, d_model), jnp.float32),
        "ln1_g": jnp.ones((1, d_model), jnp.float32),
        "ln1_b": jnp.zeros((1, d_model), jnp.float32),
        "ln2_g": jnp.ones((1, d_model), jnp.float32),
        "ln2_b": jnp.zeros((1, d_model), jnp.float32),
    }

    x = jax.random.normal(keys[8], (B, L, d_model), jnp.float32)

    # pad-style mask: batch 0 attends to everything, batch 1 masks last 2 keys
    key_valid = jnp.array([[1] * L, [1] * (L - 2) + [0, 0]], jnp.float32)   # [B, L]
    mask = 1.0 - jnp.broadcast_to(key_valid[:, None, :], (B, L, L))         # 1 == masked

    fn = functools.partial(encoder_layer, n_heads=n_heads, d_k=d_k, d_v=d_v, d_ff=d_ff)
    try:
        enc_out, attn = fn(x, mask, params)
        jax.block_until_ready((enc_out, attn))
    except Exception:
        # Single-buffered weight blocks (pl.Buffered(1)) not supported on this
        # jax build: fall back to default double-buffering (perf knob only).
        enc_out, attn = fn(x, mask, params, single_buffer_weights=False)
        jax.block_until_ready((enc_out, attn))

    ref_out, ref_attn = _reference(x, mask, params,
                                   n_heads=n_heads, d_k=d_k, d_v=d_v, d_ff=d_ff)
    assert enc_out.shape == (B, L, d_model)
    assert attn.shape == (B, n_heads, L, L)
    # EUP approximate reciprocal in the softmax denominator -> slightly looser tol
    assert jnp.allclose(enc_out, ref_out, atol=2e-3, rtol=2e-3)
    assert jnp.allclose(attn, ref_attn, atol=2e-3, rtol=2e-3)

    print("KERNEL_OK")
</pallas_src>

<mosaic_0001>
module attributes {stable_mosaic.version = 11 : i64} {
  func.func @encoder_layer_kernel(%arg0: i32, %arg1: i32, %arg2: memref<1x8x32xf32, #tpu.memory_space<vmem>>, %arg3: memref<1x8x32xf32, #tpu.memory_space<vmem>>, %arg4: memref<1x8x8xf32, #tpu.memory_space<vmem>>, %arg5: memref<32x32xf32, #tpu.memory_space<vmem>>, %arg6: memref<32x32xf32, #tpu.memory_space<vmem>>, %arg7: memref<32x32xf32, #tpu.memory_space<vmem>>, %arg8: memref<32x32xf32, #tpu.memory_space<vmem>>, %arg9: memref<32x64xf32, #tpu.memory_space<vmem>>, %arg10: memref<1x64xf32, #tpu.memory_space<vmem>>, %arg11: memref<64x32xf32, #tpu.memory_space<vmem>>, %arg12: memref<1x32xf32, #tpu.memory_space<vmem>>, %arg13: memref<1x32xf32, #tpu.memory_space<vmem>>, %arg14: memref<1x32xf32, #tpu.memory_space<vmem>>, %arg15: memref<1x32xf32, #tpu.memory_space<vmem>>, %arg16: memref<1x32xf32, #tpu.memory_space<vmem>>, %arg17: memref<1x8x32xf32, #tpu.memory_space<vmem>>, %arg18: memref<1x4x8x8xf32, #tpu.memory_space<vmem>>) attributes {dimension_semantics = [#tpu.dimension_semantics<parallel>, #tpu.dimension_semantics<parallel>], iteration_bounds = array<i64: 2, 1>, scalar_prefetch = 0 : i64, scratch_operands = 0 : i64, tpu.core_type = #tpu.core_type<tc>, window_params = [{transform_indices = @transform_0, window_bounds = array<i64: 1, 8, 32>}, {transform_indices = @transform_1, window_bounds = array<i64: 1, 8, 32>}, {transform_indices = @transform_2, window_bounds = array<i64: 1, 8, 8>}, {pipeline_mode = #tpu.pipeline_mode<synchronous>, transform_indices = @transform_3, window_bounds = array<i64: 32, 32>}, {pipeline_mode = #tpu.pipeline_mode<synchronous>, transform_indices = @transform_4, window_bounds = array<i64: 32, 32>}, {pipeline_mode = #tpu.pipeline_mode<synchronous>, transform_indices = @transform_5, window_bounds = array<i64: 32, 32>}, {pipeline_mode = #tpu.pipeline_mode<synchronous>, transform_indices = @transform_6, window_bounds = array<i64: 32, 32>}, {pipeline_mode = #tpu.pipeline_mode<synchronous>, transform_indices = @transform_7, window_bounds = array<i64: 32, 64>}, {pipeline_mode = #tpu.pipeline_mode<synchronous>, transform_indices = @transform_8, window_bounds = array<i64: 1, 64>}, {pipeline_mode = #tpu.pipeline_mode<synchronous>, transform_indices = @transform_9, window_bounds = array<i64: 64, 32>}, {pipeline_mode = #tpu.pipeline_mode<synchronous>, transform_indices = @transform_10, window_bounds = array<i64: 1, 32>}, {pipeline_mode = #tpu.pipeline_mode<synchronous>, transform_indices = @transform_11, window_bounds = array<i64: 1, 32>}, {pipeline_mode = #tpu.pipeline_mode<synchronous>, transform_indices = @transform_12, window_bounds = array<i64: 1, 32>}, {pipeline_mode = #tpu.pipeline_mode<synchronous>, transform_indices = @transform_13, window_bounds = array<i64: 1, 32>}, {pipeline_mode = #tpu.pipeline_mode<synchronous>, transform_indices = @transform_14, window_bounds = array<i64: 1, 32>}, {transform_indices = @transform_15, window_bounds = array<i64: 1, 8, 32>}, {transform_indices = @transform_16, window_bounds = array<i64: 1, 4, 8, 8>}]} {
    %c0 = arith.constant 0 : index
    %c0_0 = arith.constant 0 : index
    %c0_1 = arith.constant 0 : index
    %0 = vector.load %arg2[%c0, %c0_0, %c0_1] : memref<1x8x32xf32, #tpu.memory_space<vmem>>, vector<1x8x32xf32>
    %1 = vector.shape_cast %0 : vector<1x8x32xf32> to vector<8x32xf32>
    %c0_2 = arith.constant 0 : index
    %c0_3 = arith.constant 0 : index
    %c0_4 = arith.constant 0 : index
    %2 = vector.load %arg3[%c0_2, %c0_3, %c0_4] : memref<1x8x32xf32, #tpu.memory_space<vmem>>, vector<1x8x32xf32>
    %3 = vector.shape_cast %2 : vector<1x8x32xf32> to vector<8x32xf32>
    %c0_5 = arith.constant 0 : index
    %c0_6 = arith.constant 0 : index
    %4 = vector.load %arg5[%c0_5, %c0_6] : memref<32x32xf32, #tpu.memory_space<vmem>>, vector<32x32xf32>
    %cst = arith.constant dense<0.000000e+00> : vector<8x32xf32>
    %5 = tpu.matmul %1, %4, %cst {dimension_numbers = #tpu.dot_dimension_numbers<[1], [0], [0], [1], [0, 0, 1, 1], [], []>} : vector<8x32xf32>, vector<32x32xf32>, vector<8x32xf32> -> vector<8x32xf32>
    %c0_7 = arith.constant 0 : index
    %c0_8 = arith.constant 0 : index
    %6 = vector.load %arg6[%c0_7, %c0_8] : memref<32x32xf32, #tpu.memory_space<vmem>>, vector<32x32xf32>
    %cst_9 = arith.constant dense<0.000000e+00> : vector<8x32xf32>
    %7 = tpu.matmul %3, %6, %cst_9 {dimension_numbers = #tpu.dot_dimension_numbers<[1], [0], [0], [1], [0, 0, 1, 1], [], []>} : vector<8x32xf32>, vector<32x32xf32>, vector<8x32xf32> -> vector<8x32xf32>
    %c0_10 = arith.constant 0 : index
    %c0_11 = arith.constant 0 : index
    %8 = vector.load %arg7[%c0_10, %c0_11] : memref<32x32xf32, #tpu.memory_space<vmem>>, vector<32x32xf32>
    %cst_12 = arith.constant dense<0.000000e+00> : vector<8x32xf32>
    %9 = tpu.matmul %3, %8, %cst_12 {dimension_numbers = #tpu.dot_dimension_numbers<[1], [0], [0], [1], [0, 0, 1, 1], [], []>} : vector<8x32xf32>, vector<32x32xf32>, vector<8x32xf32> -> vector<8x32xf32>
    %c0_13 = arith.constant 0 : index
    %c0_14 = arith.constant 0 : index
    %c0_15 = arith.constant 0 : index
    %10 = vector.load %arg4[%c0_13, %c0_14, %c0_15] : memref<1x8x8xf32, #tpu.memory_space<vmem>>, vector<1x8x8xf32>
    %11 = vector.shape_cast %10 : vector<1x8x8xf32> to vector<8x8xf32>
    %cst_16 = arith.constant 0.000000e+00 : f32
    %12 = vector.broadcast %cst_16 : f32 to vector<8x8xf32>
    %13 = arith.cmpf ogt, %11, %12 : vector<8x8xf32>
    %14 = vector.extract_strided_slice %5 {offsets = [0, 0], sizes = [8, 8], strides = [1, 1]} : vector<8x32xf32> to vector<8x8xf32>
    %15 = vector.extract_strided_slice %7 {offsets = [0, 0], sizes = [8, 8], strides = [1, 1]} : vector<8x32xf32> to vector<8x8xf32>
    %16 = vector.extract_strided_slice %9 {offsets = [0, 0], sizes = [8, 8], strides = [1, 1]} : vector<8x32xf32> to vector<8x8xf32>
    %17 = tpu.transpose %15, [1, 0] : vector<8x8xf32> -> vector<8x8xf32>
    %cst_17 = arith.constant dense<0.000000e+00> : vector<8x8xf32>
    %18 = tpu.matmul %14, %17, %cst_17 {dimension_numbers = #tpu.dot_dimension_numbers<[1], [0], [0], [1], [0, 0, 1, 1], [], []>} : vector<8x8xf32>, vector<8x8xf32>, vector<8x8xf32> -> vector<8x8xf32>
    %cst_18 = arith.constant 0.353553385 : f32
    %19 = vector.broadcast %cst_18 : f32 to vector<8x8xf32>
    %20 = arith.mulf %18, %19 : vector<8x8xf32>
    %cst_19 = arith.constant -1.000000e+09 : f32
    %21 = vector.broadcast %cst_19 : f32 to vector<8x8xf32>
    %22 = arith.select %13, %21, %20 : vector<8x8xi1>, vector<8x8xf32>
    %cst_20 = arith.constant dense<0xFF800000> : vector<8xf32>
    %23 = vector.multi_reduction <maximumf>, %22, %cst_20 [1] : vector<8x8xf32> to vector<8xf32>
    %24 = vector.shape_cast %23 : vector<8xf32> to vector<8x1xf32>
    %25 = vector.broadcast %24 : vector<8x1xf32> to vector<8x8xf32>
    %26 = arith.subf %22, %25 : vector<8x8xf32>
    %27 = math.exp %26 : vector<8x8xf32>
    %cst_21 = arith.constant dense<0.000000e+00> : vector<8xf32>
    %28 = vector.multi_reduction <add>, %27, %cst_21 [1] : vector<8x8xf32> to vector<8xf32>
    %29 = vector.shape_cast %28 : vector<8xf32> to vector<8x1xf32>
    %30 = tpu.reciprocal %29 {approx = true} : vector<8x1xf32> -> vector<8x1xf32>
    %31 = vector.broadcast %30 : vector<8x1xf32> to vector<8x8xf32>
    %32 = arith.mulf %27, %31 : vector<8x8xf32>
    %c0_22 = arith.constant 0 : index
    %c0_23 = arith.constant 0 : index
    %c0_24 = arith.constant 0 : index
    %c0_25 = arith.constant 0 : index
    %33 = vector.load %arg18[%c0_22, %c0_23, %c0_24, %c0_25] : memref<1x4x8x8xf32, #tpu.memory_space<vmem>>, vector<1x1x8x8xf32>
    %34 = vector.shape_cast %33 : vector<1x1x8x8xf32> to vector<8x8xf32>
    %35 = vector.shape_cast %32 : vector<8x8xf32> to vector<1x1x8x8xf32>
    tpu.vector_store %arg18[%c0_22, %c0_23, %c0_24, %c0_25], %35 {strides = array<i32>} : memref<1x4x8x8xf32, #tpu.memory_space<vmem>>, vector<1x1x8x8xf32>,
    %cst_26 = arith.constant dense<0.000000e+00> : vector<8x8xf32>
    %36 = tpu.matmul %32, %16, %cst_26 {dimension_numbers = #tpu.dot_dimension_numbers<[1], [0], [0], [1], [0, 0, 1, 1], [], []>} : vector<8x8xf32>, vector<8x8xf32>, vector<8x8xf32> -> vector<8x8xf32>
    %37 = vector.extract_strided_slice %5 {offsets = [0, 8], sizes = [8, 8], strides = [1, 1]} : vector<8x32xf32> to vector<8x8xf32>
    %38 = vector.extract_strided_slice %7 {offsets = [0, 8], sizes = [8, 8], strides = [1, 1]} : vector<8x32xf32> to vector<8x8xf32>
    %39 = vector.extract_strided_slice %9 {offsets = [0, 8], sizes = [8, 8], strides = [1, 1]} : vector<8x32xf32> to vector<8x8xf32>
    %40 = tpu.transpose %38, [1, 0] : vector<8x8xf32> -> vector<8x8xf32>
    %cst_27 = arith.constant dense<0.000000e+00> : vector<8x8xf32>
    %41 = tpu.matmul %37, %40, %cst_27 {dimension_numbers = #tpu.dot_dimension_numbers<[1], [0], [0], [1], [0, 0, 1, 1], [], []>} : vector<8x8xf32>, vector<8x8xf32>, vector<8x8xf32> -> vector<8x8xf32>
    %cst_28 = arith.constant 0.353553385 : f32
    %42 = vector.broadcast %cst_28 : f32 to vector<8x8xf32>
    %43 = arith.mulf %41, %42 : vector<8x8xf32>
    %cst_29 = arith.constant -1.000000e+09 : f32
    %44 = vector.broadcast %cst_29 : f32 to vector<8x8xf32>
    %45 = arith.select %13, %44, %43 : vector<8x8xi1>, vector<8x8xf32>
    %cst_30 = arith.constant dense<0xFF800000> : vector<8xf32>
    %46 = vector.multi_reduction <maximumf>, %45, %cst_30 [1] : vector<8x8xf32> to vector<8xf32>
    %47 = vector.shape_cast %46 : vector<8xf32> to vector<8x1xf32>
    %48 = vector.broadcast %47 : vector<8x1xf32> to vector<8x8xf32>
    %49 = arith.subf %45, %48 : vector<8x8xf32>
    %50 = math.exp %49 : vector<8x8xf32>
    %cst_31 = arith.constant dense<0.000000e+00> : vector<8xf32>
    %51 = vector.multi_reduction <add>, %50, %cst_31 [1] : vector<8x8xf32> to vector<8xf32>
    %52 = vector.shape_cast %51 : vector<8xf32> to vector<8x1xf32>
    %53 = tpu.reciprocal %52 {approx = true} : vector<8x1xf32> -> vector<8x1xf32>
    %54 = vector.broadcast %53 : vector<8x1xf32> to vector<8x8xf32>
    %55 = arith.mulf %50, %54 : vector<8x8xf32>
    %c0_32 = arith.constant 0 : index
    %c1 = arith.constant 1 : index
    %c0_33 = arith.constant 0 : index
    %c0_34 = arith.constant 0 : index
    %56 = vector.load %arg18[%c0_32, %c1, %c0_33, %c0_34] : memref<1x4x8x8xf32, #tpu.memory_space<vmem>>, vector<1x1x8x8xf32>
    %57 = vector.shape_cast %56 : vector<1x1x8x8xf32> to vector<8x8xf32>
    %58 = vector.shape_cast %55 : vector<8x8xf32> to vector<1x1x8x8xf32>
    tpu.vector_store %arg18[%c0_32, %c1, %c0_33, %c0_34], %58 {strides = array<i32>} : memref<1x4x8x8xf32, #tpu.memory_space<vmem>>, vector<1x1x8x8xf32>,
    %cst_35 = arith.constant dense<0.000000e+00> : vector<8x8xf32>
    %59 = tpu.matmul %55, %39, %cst_35 {dimension_numbers = #tpu.dot_dimension_numbers<[1], [0], [0], [1], [0, 0, 1, 1], [], []>} : vector<8x8xf32>, vector<8x8xf32>, vector<8x8xf32> -> vector<8x8xf32>
    %60 = vector.extract_strided_slice %5 {offsets = [0, 16], sizes = [8, 8], strides = [1, 1]} : vector<8x32xf32> to vector<8x8xf32>
    %61 = vector.extract_strided_slice %7 {offsets = [0, 16], sizes = [8, 8], strides = [1, 1]} : vector<8x32xf32> to vector<8x8xf32>
    %62 = vector.extract_strided_slice %9 {offsets = [0, 16], sizes = [8, 8], strides = [1, 1]} : vector<8x32xf32> to vector<8x8xf32>
    %63 = tpu.transpose %61, [1, 0] : vector<8x8xf32> -> vector<8x8xf32>
    %cst_36 = arith.constant dense<0.000000e+00> : vector<8x8xf32>
    %64 = tpu.matmul %60, %63, %cst_36 {dimension_numbers = #tpu.dot_dimension_numbers<[1], [0], [0], [1], [0, 0, 1, 1], [], []>} : vector<8x8xf32>, vector<8x8xf32>, vector<8x8xf32> -> vector<8x8xf32>
    %cst_37 = arith.constant 0.353553385 : f32
    %65 = vector.broadcast %cst_37 : f32 to vector<8x8xf32>
    %66 = arith.mulf %64, %65 : vector<8x8xf32>
    %cst_38 = arith.constant -1.000000e+09 : f32
    %67 = vector.broadcast %cst_38 : f32 to vector<8x8xf32>
    %68 = arith.select %13, %67, %66 : vector<8x8xi1>, vector<8x8xf32>
    %cst_39 = arith.constant dense<0xFF800000> : vector<8xf32>
    %69 = vector.multi_reduction <maximumf>, %68, %cst_39 [1] : vector<8x8xf32> to vector<8xf32>
    %70 = vector.shape_cast %69 : vector<8xf32> to vector<8x1xf32>
    %71 = vector.broadcast %70 : vector<8x1xf32> to vector<8x8xf32>
    %72 = arith.subf %68, %71 : vector<8x8xf32>
    %73 = math.exp %72 : vector<8x8xf32>
    %cst_40 = arith.constant dense<0.000000e+00> : vector<8xf32>
    %74 = vector.multi_reduction <add>, %73, %cst_40 [1] : vector<8x8xf32> to vector<8xf32>
    %75 = vector.shape_cast %74 : vector<8xf32> to vector<8x1xf32>
    %76 = tpu.reciprocal %75 {approx = true} : vector<8x1xf32> -> vector<8x1xf32>
    %77 = vector.broadcast %76 : vector<8x1xf32> to vector<8x8xf32>
    %78 = arith.mulf %73, %77 : vector<8x8xf32>
    %c0_41 = arith.constant 0 : index
    %c2 = arith.constant 2 : index
    %c0_42 = arith.constant 0 : index
    %c0_43 = arith.constant 0 : index
    %79 = vector.load %arg18[%c0_41, %c2, %c0_42, %c0_43] : memref<1x4x8x8xf32, #tpu.memory_space<vmem>>, vector<1x1x8x8xf32>
    %80 = vector.shape_cast %79 : vector<1x1x8x8xf32> to vector<8x8xf32>
    %81 = vector.shape_cast %78 : vector<8x8xf32> to vector<1x1x8x8xf32>
    tpu.vector_store %arg18[%c0_41, %c2, %c0_42, %c0_43], %81 {strides = array<i32>} : memref<1x4x8x8xf32, #tpu.memory_space<vmem>>, vector<1x1x8x8xf32>,
    %cst_44 = arith.constant dense<0.000000e+00> : vector<8x8xf32>
    %82 = tpu.matmul %78, %62, %cst_44 {dimension_numbers = #tpu.dot_dimension_numbers<[1], [0], [0], [1], [0, 0, 1, 1], [], []>} : vector<8x8xf32>, vector<8x8xf32>, vector<8x8xf32> -> vector<8x8xf32>
    %83 = vector.extract_strided_slice %5 {offsets = [0, 24], sizes = [8, 8], strides = [1, 1]} : vector<8x32xf32> to vector<8x8xf32>
    %84 = vector.extract_strided_slice %7 {offsets = [0, 24], sizes = [8, 8], strides = [1, 1]} : vector<8x32xf32> to vector<8x8xf32>
    %85 = vector.extract_strided_slice %9 {offsets = [0, 24], sizes = [8, 8], strides = [1, 1]} : vector<8x32xf32> to vector<8x8xf32>
    %86 = tpu.transpose %84, [1, 0] : vector<8x8xf32> -> vector<8x8xf32>
    %cst_45 = arith.constant dense<0.000000e+00> : vector<8x8xf32>
    %87 = tpu.matmul %83, %86, %cst_45 {dimension_numbers = #tpu.dot_dimension_numbers<[1], [0], [0], [1], [0, 0, 1, 1], [], []>} : vector<8x8xf32>, vector<8x8xf32>, vector<8x8xf32> -> vector<8x8xf32>
    %cst_46 = arith.constant 0.353553385 : f32
    %88 = vector.broadcast %cst_46 : f32 to vector<8x8xf32>
    %89 = arith.mulf %87, %88 : vector<8x8xf32>
    %cst_47 = arith.constant -1.000000e+09 : f32
    %90 = vector.broadcast %cst_47 : f32 to vector<8x8xf32>
    %91 = arith.select %13, %90, %89 : vector<8x8xi1>, vector<8x8xf32>
    %cst_48 = arith.constant dense<0xFF800000> : vector<8xf32>
    %92 = vector.multi_reduction <maximumf>, %91, %cst_48 [1] : vector<8x8xf32> to vector<8xf32>
    %93 = vector.shape_cast %92 : vector<8xf32> to vector<8x1xf32>
    %94 = vector.broadcast %93 : vector<8x1xf32> to vector<8x8xf32>
    %95 = arith.subf %91, %94 : vector<8x8xf32>
    %96 = math.exp %95 : vector<8x8xf32>
    %cst_49 = arith.constant dense<0.000000e+00> : vector<8xf32>
    %97 = vector.multi_reduction <add>, %96, %cst_49 [1] : vector<8x8xf32> to vector<8xf32>
    %98 = vector.shape_cast %97 : vector<8xf32> to vector<8x1xf32>
    %99 = tpu.reciprocal %98 {approx = true} : vector<8x1xf32> -> vector<8x1xf32>
    %100 = vector.broadcast %99 : vector<8x1xf32> to vector<8x8xf32>
    %101 = arith.mulf %96, %100 : vector<8x8xf32>
    %c0_50 = arith.constant 0 : index
    %c3 = arith.constant 3 : index
    %c0_51 = arith.constant 0 : index
    %c0_52 = arith.constant 0 : index
    %102 = vector.load %arg18[%c0_50, %c3, %c0_51, %c0_52] : memref<1x4x8x8xf32, #tpu.memory_space<vmem>>, vector<1x1x8x8xf32>
    %103 = vector.shape_cast %102 : vector<1x1x8x8xf32> to vector<8x8xf32>
    %104 = vector.shape_cast %101 : vector<8x8xf32> to vector<1x1x8x8xf32>
    tpu.vector_store %arg18[%c0_50, %c3, %c0_51, %c0_52], %104 {strides = array<i32>} : memref<1x4x8x8xf32, #tpu.memory_space<vmem>>, vector<1x1x8x8xf32>,
    %cst_53 = arith.constant dense<0.000000e+00> : vector<8x8xf32>
    %105 = tpu.matmul %101, %85, %cst_53 {dimension_numbers = #tpu.dot_dimension_numbers<[1], [0], [0], [1], [0, 0, 1, 1], [], []>} : vector<8x8xf32>, vector<8x8xf32>, vector<8x8xf32> -> vector<8x8xf32>
    %106 = tpu.concatenate %36, %59, %82, %105 in 1 : vector<8x8xf32>, vector<8x8xf32>, vector<8x8xf32>, vector<8x8xf32> -> vector<8x32xf32>
    %c0_54 = arith.constant 0 : index
    %c0_55 = arith.constant 0 : index
    %107 = vector.load %arg8[%c0_54, %c0_55] : memref<32x32xf32, #tpu.memory_space<vmem>>, vector<32x32xf32>
    %cst_56 = arith.constant dense<0.000000e+00> : vector<8x32xf32>
    %108 = tpu.matmul %106, %107, %cst_56 {dimension_numbers = #tpu.dot_dimension_numbers<[1], [0], [0], [1], [0, 0, 1, 1], [], []>} : vector<8x32xf32>, vector<32x32xf32>, vector<8x32xf32> -> vector<8x32xf32>
    %109 = arith.addf %108, %1 : vector<8x32xf32>
    %c0_57 = arith.constant 0 : index
    %c0_58 = arith.constant 0 : index
    %110 = vector.load %arg13[%c0_57, %c0_58] : memref<1x32xf32, #tpu.memory_space<vmem>>, vector<1x32xf32>
    %c0_59 = arith.constant 0 : index
    %c0_60 = arith.constant 0 : index
    %111 = vector.load %arg14[%c0_59, %c0_60] : memref<1x32xf32, #tpu.memory_space<vmem>>, vector<1x32xf32>
    %cst_61 = arith.constant dense<0.000000e+00> : vector<8xf32>
    %112 = vector.multi_reduction <add>, %109, %cst_61 [1] : vector<8x32xf32> to vector<8xf32>
    %113 = vector.shape_cast %112 : vector<8xf32> to vector<8x1xf32>
    %cst_62 = arith.constant 3.200000e+01 : f32
    %114 = vector.broadcast %cst_62 : f32 to vector<8x1xf32>
    %115 = arith.divf %113, %114 : vector<8x1xf32>
    %116 = vector.broadcast %115 : vector<8x1xf32> to vector<8x32xf32>
    %117 = arith.subf %109, %116 : vector<8x32xf32>
    %118 = arith.mulf %117, %117 : vector<8x32xf32>
    %cst_63 = arith.constant dense<0.000000e+00> : vector<8xf32>
    %119 = vector.multi_reduction <add>, %118, %cst_63 [1] : vector<8x32xf32> to vector<8xf32>
    %120 = vector.shape_cast %119 : vector<8xf32> to vector<8x1xf32>
    %cst_64 = arith.constant 3.200000e+01 : f32
    %121 = vector.broadcast %cst_64 : f32 to vector<8x1xf32>
    %122 = arith.divf %120, %121 : vector<8x1xf32>
    %123 = vector.broadcast %115 : vector<8x1xf32> to vector<8x32xf32>
    %124 = arith.subf %109, %123 : vector<8x32xf32>
    %cst_65 = arith.constant 9.99999974E-6 : f32
    %125 = vector.broadcast %cst_65 : f32 to vector<8x1xf32>
    %126 = arith.addf %122, %125 : vector<8x1xf32>
    %127 = math.rsqrt %126 : vector<8x1xf32>
    %128 = vector.broadcast %127 : vector<8x1xf32> to vector<8x32xf32>
    %129 = arith.mulf %124, %128 : vector<8x32xf32>
    %130 = vector.broadcast %110 : vector<1x32xf32> to vector<8x32xf32>
    %131 = arith.mulf %129, %130 : vector<8x32xf32>
    %132 = vector.broadcast %111 : vector<1x32xf32> to vector<8x32xf32>
    %133 = arith.addf %131, %132 : vector<8x32xf32>
    %c0_66 = arith.constant 0 : index
    %c0_67 = arith.constant 0 : index
    %134 = vector.load %arg9[%c0_66, %c0_67] : memref<32x64xf32, #tpu.memory_space<vmem>>, vector<32x64xf32>
    %cst_68 = arith.constant dense<0.000000e+00> : vector<8x64xf32>
    %135 = tpu.matmul %133, %134, %cst_68 {dimension_numbers = #tpu.dot_dimension_numbers<[1], [0], [0], [1], [0, 0, 1, 1], [], []>} : vector<8x32xf32>, vector<32x64xf32>, vector<8x64xf32> -> vector<8x64xf32>
    %c0_69 = arith.constant 0 : index
    %c0_70 = arith.constant 0 : index
    %136 = vector.load %arg10[%c0_69, %c0_70] : memref<1x64xf32, #tpu.memory_space<vmem>>, vector<1x64xf32>
    %137 = vector.broadcast %136 : vector<1x64xf32> to vector<8x64xf32>
    %138 = arith.addf %135, %137 : vector<8x64xf32>
    %cst_71 = arith.constant 0.000000e+00 : f32
    %139 = vector.broadcast %cst_71 : f32 to vector<8x64xf32>
    %140 = arith.maximumf %138, %139 : vector<8x64xf32>
    %c0_72 = arith.constant 0 : index
    %c0_73 = arith.constant 0 : index
    %141 = vector.load %arg11[%c0_72, %c0_73] : memref<64x32xf32, #tpu.memory_space<vmem>>, vector<64x32xf32>
    %cst_74 = arith.constant dense<0.000000e+00> : vector<8x32xf32>
    %142 = tpu.matmul %140, %141, %cst_74 {dimension_numbers = #tpu.dot_dimension_numbers<[1], [0], [0], [1], [0, 0, 1, 1], [], []>} : vector<8x64xf32>, vector<64x32xf32>, vector<8x32xf32> -> vector<8x32xf32>
    %c0_75 = arith.constant 0 : index
    %c0_76 = arith.constant 0 : index
    %143 = vector.load %arg12[%c0_75, %c0_76] : memref<1x32xf32, #tpu.memory_space<vmem>>, vector<1x32xf32>
    %144 = vector.broadcast %143 : vector<1x32xf32> to vector<8x32xf32>
    %145 = arith.addf %142, %144 : vector<8x32xf32>
    %146 = arith.addf %145, %133 : vector<8x32xf32>
    %c0_77 = arith.constant 0 : index
    %c0_78 = arith.constant 0 : index
    %147 = vector.load %arg15[%c0_77, %c0_78] : memref<1x32xf32, #tpu.memory_space<vmem>>, vector<1x32xf32>
    %c0_79 = arith.constant 0 : index
    %c0_80 = arith.constant 0 : index
    %148 = vector.load %arg16[%c0_79, %c0_80] : memref<1x32xf32, #tpu.memory_space<vmem>>, vector<1x32xf32>
    %cst_81 = arith.constant dense<0.000000e+00> : vector<8xf32>
    %149 = vector.multi_reduction <add>, %146, %cst_81 [1] : vector<8x32xf32> to vector<8xf32>
    %150 = vector.shape_cast %149 : vector<8xf32> to vector<8x1xf32>
    %cst_82 = arith.constant 3.200000e+01 : f32
    %151 = vector.broadcast %cst_82 : f32 to vector<8x1xf32>
    %152 = arith.divf %150, %151 : vector<8x1xf32>
    %153 = vector.broadcast %152 : vector<8x1xf32> to vector<8x32xf32>
    %154 = arith.subf %146, %153 : vector<8x32xf32>
    %155 = arith.mulf %154, %154 : vector<8x32xf32>
    %cst_83 = arith.constant dense<0.000000e+00> : vector<8xf32>
    %156 = vector.multi_reduction <add>, %155, %cst_83 [1] : vector<8x32xf32> to vector<8xf32>
    %157 = vector.shape_cast %156 : vector<8xf32> to vector<8x1xf32>
    %cst_84 = arith.constant 3.200000e+01 : f32
    %158 = vector.broadcast %cst_84 : f32 to vector<8x1xf32>
    %159 = arith.divf %157, %158 : vector<8x1xf32>
    %160 = vector.broadcast %152 : vector<8x1xf32> to vector<8x32xf32>
    %161 = arith.subf %146, %160 : vector<8x32xf32>
    %cst_85 = arith.constant 9.99999974E-6 : f32
    %162 = vector.broadcast %cst_85 : f32 to vector<8x1xf32>
    %163 = arith.addf %159, %162 : vector<8x1xf32>
    %164 = math.rsqrt %163 : vector<8x1xf32>
    %165 = vector.broadcast %164 : vector<8x1xf32> to vector<8x32xf32>
    %166 = arith.mulf %161, %165 : vector<8x32xf32>
    %167 = vector.broadcast %147 : vector<1x32xf32> to vector<8x32xf32>
    %168 = arith.mulf %166, %167 : vector<8x32xf32>
    %169 = vector.broadcast %148 : vector<1x32xf32> to vector<8x32xf32>
    %170 = arith.addf %168, %169 : vector<8x32xf32>
    %c0_86 = arith.constant 0 : index
    %c0_87 = arith.constant 0 : index
    %c0_88 = arith.constant 0 : index
    %171 = vector.load %arg17[%c0_86, %c0_87, %c0_88] : memref<1x8x32xf32, #tpu.memory_space<vmem>>, vector<1x8x32xf32>
    %172 = vector.shape_cast %171 : vector<1x8x32xf32> to vector<8x32xf32>
    %173 = vector.shape_cast %170 : vector<8x32xf32> to vector<1x8x32xf32>
    tpu.vector_store %arg17[%c0_86, %c0_87, %c0_88], %173 {strides = array<i32>} : memref<1x8x32xf32, #tpu.memory_space<vmem>>, vector<1x8x32xf32>,
    return
  }
  func.func @transform_0(%arg0: i32, %arg1: i32) -> (i32, i32, i32) {
    %c0_i32 = arith.constant 0 : i32
    %c0_i32_0 = arith.constant 0 : i32
    return %arg0, %arg1, %c0_i32 : i32, i32, i32
  }
  func.func @transform_1(%arg0: i32, %arg1: i32) -> (i32, i32, i32) {
    %c0_i32 = arith.constant 0 : i32
    %c0_i32_0 = arith.constant 0 : i32
    %c0_i32_1 = arith.constant 0 : i32
    return %arg0, %c0_i32, %c0_i32_0 : i32, i32, i32
  }
  func.func @transform_2(%arg0: i32, %arg1: i32) -> (i32, i32, i32) {
    %c0_i32 = arith.constant 0 : i32
    %c0_i32_0 = arith.constant 0 : i32
    return %arg0, %arg1, %c0_i32 : i32, i32, i32
  }
  func.func @transform_3(%arg0: i32, %arg1: i32) -> (i32, i32) {
    %c0_i32 = arith.constant 0 : i32
    %c0_i32_0 = arith.constant 0 : i32
    %c0_i32_1 = arith.constant 0 : i32
    return %c0_i32, %c0_i32_0 : i32, i32
  }
  func.func @transform_4(%arg0: i32, %arg1: i32) -> (i32, i32) {
    %c0_i32 = arith.constant 0 : i32
    %c0_i32_0 = arith.constant 0 : i32
    %c0_i32_1 = arith.constant 0 : i32
    return %c0_i32, %c0_i32_0 : i32, i32
  }
  func.func @transform_5(%arg0: i32, %arg1: i32) -> (i32, i32) {
    %c0_i32 = arith.constant 0 : i32
    %c0_i32_0 = arith.constant 0 : i32
    %c0_i32_1 = arith.constant 0 : i32
    return %c0_i32, %c0_i32_0 : i32, i32
  }
  func.func @transform_6(%arg0: i32, %arg1: i32) -> (i32, i32) {
    %c0_i32 = arith.constant 0 : i32
    %c0_i32_0 = arith.constant 0 : i32
    %c0_i32_1 = arith.constant 0 : i32
    return %c0_i32, %c0_i32_0 : i32, i32
  }
  func.func @transform_7(%arg0: i32, %arg1: i32) -> (i32, i32) {
    %c0_i32 = arith.constant 0 : i32
    %c0_i32_0 = arith.constant 0 : i32
    %c0_i32_1 = arith.constant 0 : i32
    return %c0_i32, %c0_i32_0 : i32, i32
  }
  func.func @transform_8(%arg0: i32, %arg1: i32) -> (i32, i32) {
    %c0_i32 = arith.constant 0 : i32
    %c0_i32_0 = arith.constant 0 : i32
    %c0_i32_1 = arith.constant 0 : i32
    return %c0_i32, %c0_i32_0 : i32, i32
  }
  func.func @transform_9(%arg0: i32, %arg1: i32) -> (i32, i32) {
    %c0_i32 = arith.constant 0 : i32
    %c0_i32_0 = arith.constant 0 : i32
    %c0_i32_1 = arith.constant 0 : i32
    return %c0_i32, %c0_i32_0 : i32, i32
  }
  func.func @transform_10(%arg0: i32, %arg1: i32) -> (i32, i32) {
    %c0_i32 = arith.constant 0 : i32
    %c0_i32_0 = arith.constant 0 : i32
    %c0_i32_1 = arith.constant 0 : i32
    return %c0_i32, %c0_i32_0 : i32, i32
  }
  func.func @transform_11(%arg0: i32, %arg1: i32) -> (i32, i32) {
    %c0_i32 = arith.constant 0 : i32
    %c0_i32_0 = arith.constant 0 : i32
    %c0_i32_1 = arith.constant 0 : i32
    return %c0_i32, %c0_i32_0 : i32, i32
  }
  func.func @transform_12(%arg0: i32, %arg1: i32) -> (i32, i32) {
    %c0_i32 = arith.constant 0 : i32
    %c0_i32_0 = arith.constant 0 : i32
    %c0_i32_1 = arith.constant 0 : i32
    return %c0_i32, %c0_i32_0 : i32, i32
  }
  func.func @transform_13(%arg0: i32, %arg1: i32) -> (i32, i32) {
    %c0_i32 = arith.constant 0 : i32
    %c0_i32_0 = arith.constant 0 : i32
    %c0_i32_1 = arith.constant 0 : i32
    return %c0_i32, %c0_i32_0 : i32, i32
  }
  func.func @transform_14(%arg0: i32, %arg1: i32) -> (i32, i32) {
    %c0_i32 = arith.constant 0 : i32
    %c0_i32_0 = arith.constant 0 : i32
    %c0_i32_1 = arith.constant 0 : i32
    return %c0_i32, %c0_i32_0 : i32, i32
  }
  func.func @transform_15(%arg0: i32, %arg1: i32) -> (i32, i32, i32) {
    %c0_i32 = arith.constant 0 : i32
    %c0_i32_0 = arith.constant 0 : i32
    return %arg0, %arg1, %c0_i32 : i32, i32, i32
  }
  func.func @transform_16(%arg0: i32, %arg1: i32) -> (i32, i32, i32, i32) {
    %c0_i32 = arith.constant 0 : i32
    %c0_i32_0 = arith.constant 0 : i32
    %c0_i32_1 = arith.constant 0 : i32
    return %arg0, %c0_i32, %arg1, %c0_i32_0 : i32, i32, i32, i32
  }
}

module attributes {stable_mosaic.version = 11 : i64} {
  func.func @encoder_layer_kernel(%arg0: i32, %arg1: i32, %arg2: memref<1x8x32xf32, #tpu.memory_space<vmem>>, %arg3: memref<1x8x32xf32, #tpu.memory_space<vmem>>, %arg4: memref<1x8x8xf32, #tpu.memory_space<vmem>>, %arg5: memref<32x32xf32, #tpu.memory_space<vmem>>, %arg6: memref<32x32xf32, #tpu.memory_space<vmem>>, %arg7: memref<32x32xf32, #tpu.memory_space<vmem>>, %arg8: memref<32x32xf32, #tpu.memory_space<vmem>>, %arg9: memref<32x64xf32, #tpu.memory_space<vmem>>, %arg10: memref<1x64xf32, #tpu.memory_space<vmem>>, %arg11: memref<64x32xf32, #tpu.memory_space<vmem>>, %arg12: memref<1x32xf32, #tpu.memory_space<vmem>>, %arg13: memref<1x32xf32, #tpu.memory_space<vmem>>, %arg14: memref<1x32xf32, #tpu.memory_space<vmem>>, %arg15: memref<1x32xf32, #tpu.memory_space<vmem>>, %arg16: memref<1x32xf32, #tpu.memory_space<vmem>>, %arg17: memref<1x8x32xf32, #tpu.memory_space<vmem>>, %arg18: memref<1x4x8x8xf32, #tpu.memory_space<vmem>>) attributes {dimension_semantics = [#tpu.dimension_semantics<parallel>, #tpu.dimension_semantics<parallel>], iteration_bounds = array<i64: 2, 1>, scalar_prefetch = 0 : i64, scratch_operands = 0 : i64, tpu.core_type = #tpu.core_type<tc>, window_params = [{transform_indices = @transform_0, window_bounds = array<i64: 1, 8, 32>}, {transform_indices = @transform_1, window_bounds = array<i64: 1, 8, 32>}, {transform_indices = @transform_2, window_bounds = array<i64: 1, 8, 8>}, {pipeline_mode = #tpu.pipeline_mode<synchronous>, transform_indices = @transform_3, window_bounds = array<i64: 32, 32>}, {pipeline_mode = #tpu.pipeline_mode<synchronous>, transform_indices = @transform_4, window_bounds = array<i64: 32, 32>}, {pipeline_mode = #tpu.pipeline_mode<synchronous>, transform_indices = @transform_5, window_bounds = array<i64: 32, 32>}, {pipeline_mode = #tpu.pipeline_mode<synchronous>, transform_indices = @transform_6, window_bounds = array<i64: 32, 32>}, {pipeline_mode = #tpu.pipeline_mode<synchronous>, transform_indices = @transform_7, window_bounds = array<i64: 32, 64>}, {pipeline_mode = #tpu.pipeline_mode<synchronous>, transform_indices = @transform_8, window_bounds = array<i64: 1, 64>}, {pipeline_mode = #tpu.pipeline_mode<synchronous>, transform_indices = @transform_9, window_bounds = array<i64: 64, 32>}, {pipeline_mode = #tpu.pipeline_mode<synchronous>, transform_indices = @transform_10, window_bounds = array<i64: 1, 32>}, {pipeline_mode = #tpu.pipeline_mode<synchronous>, transform_indices = @transform_11, window_bounds = array<i64: 1, 32>}, {pipeline_mode = #tpu.pipeline_mode<synchronous>, transform_indices = @transform_12, window_bounds = array<i64: 1, 32>}, {pipeline_mode = #tpu.pipeline_mode<synchronous>, transform_indices = @transform_13, window_bounds = array<i64: 1, 32>}, {pipeline_mode = #tpu.pipeline_mode<synchronous>, transform_indices = @transform_14, window_bounds = array<i64: 1, 32>}, {transform_indices = @transform_15, window_bounds = array<i64: 1, 8, 32>}, {transform_indices = @transform_16, window_bounds = array<i64: 1, 4, 8, 8>}]} {
    %c0 = arith.constant 0 : index
    %c0_0 = arith.constant 0 : index
    %c0_1 = arith.constant 0 : index
    %0 = vector.load %arg2[%c0, %c0_0, %c0_1] : memref<1x8x32xf32, #tpu.memory_space<vmem>>, vector<1x8x32xf32>
    %1 = vector.shape_cast %0 : vector<1x8x32xf32> to vector<8x32xf32>
    %c0_2 = arith.constant 0 : index
    %c0_3 = arith.constant 0 : index
    %c0_4 = arith.constant 0 : index
    %2 = vector.load %arg3[%c0_2, %c0_3, %c0_4] : memref<1x8x32xf32, #tpu.memory_space<vmem>>, vector<1x8x32xf32>
    %3 = vector.shape_cast %2 : vector<1x8x32xf32> to vector<8x32xf32>
    %c0_5 = arith.constant 0 : index
    %c0_6 = arith.constant 0 : index
    %4 = vector.load %arg5[%c0_5, %c0_6] : memref<32x32xf32, #tpu.memory_space<vmem>>, vector<32x32xf32>
    %cst = arith.constant dense<0.000000e+00> : vector<8x32xf32>
    %5 = tpu.matmul %1, %4, %cst {dimension_numbers = #tpu.dot_dimension_numbers<[1], [0], [0], [1], [0, 0, 1, 1], [], []>} : vector<8x32xf32>, vector<32x32xf32>, vector<8x32xf32> -> vector<8x32xf32>
    %c0_7 = arith.constant 0 : index
    %c0_8 = arith.constant 0 : index
    %6 = vector.load %arg6[%c0_7, %c0_8] : memref<32x32xf32, #tpu.memory_space<vmem>>, vector<32x32xf32>
    %cst_9 = arith.constant dense<0.000000e+00> : vector<8x32xf32>
    %7 = tpu.matmul %3, %6, %cst_9 {dimension_numbers = #tpu.dot_dimension_numbers<[1], [0], [0], [1], [0, 0, 1, 1], [], []>} : vector<8x32xf32>, vector<32x32xf32>, vector<8x32xf32> -> vector<8x32xf32>
    %c0_10 = arith.constant 0 : index
    %c0_11 = arith.constant 0 : index
    %8 = vector.load %arg7[%c0_10, %c0_11] : memref<32x32xf32, #tpu.memory_space<vmem>>, vector<32x32xf32>
    %cst_12 = arith.constant dense<0.000000e+00> : vector<8x32xf32>
    %9 = tpu.matmul %3, %8, %cst_12 {dimension_numbers = #tpu.dot_dimension_numbers<[1], [0], [0], [1], [0, 0, 1, 1], [], []>} : vector<8x32xf32>, vector<32x32xf32>, vector<8x32xf32> -> vector<8x32xf32>
    %c0_13 = arith.constant 0 : index
    %c0_14 = arith.constant 0 : index
    %c0_15 = arith.constant 0 : index
    %10 = vector.load %arg4[%c0_13, %c0_14, %c0_15] : memref<1x8x8xf32, #tpu.memory_space<vmem>>, vector<1x8x8xf32>
    %11 = vector.shape_cast %10 : vector<1x8x8xf32> to vector<8x8xf32>
    %cst_16 = arith.constant 0.000000e+00 : f32
    %12 = vector.broadcast %cst_16 : f32 to vector<8x8xf32>
    %13 = arith.cmpf ogt, %11, %12 : vector<8x8xf32>
    %14 = vector.extract_strided_slice %5 {offsets = [0, 0], sizes = [8, 8], strides = [1, 1]} : vector<8x32xf32> to vector<8x8xf32>
    %15 = vector.extract_strided_slice %7 {offsets = [0, 0], sizes = [8, 8], strides = [1, 1]} : vector<8x32xf32> to vector<8x8xf32>
    %16 = vector.extract_strided_slice %9 {offsets = [0, 0], sizes = [8, 8], strides = [1, 1]} : vector<8x32xf32> to vector<8x8xf32>
    %17 = tpu.transpose %15, [1, 0] : vector<8x8xf32> -> vector<8x8xf32>
    %cst_17 = arith.constant dense<0.000000e+00> : vector<8x8xf32>
    %18 = tpu.matmul %14, %17, %cst_17 {dimension_numbers = #tpu.dot_dimension_numbers<[1], [0], [0], [1], [0, 0, 1, 1], [], []>} : vector<8x8xf32>, vector<8x8xf32>, vector<8x8xf32> -> vector<8x8xf32>
    %cst_18 = arith.constant 0.353553385 : f32
    %19 = vector.broadcast %cst_18 : f32 to vector<8x8xf32>
    %20 = arith.mulf %18, %19 : vector<8x8xf32>
    %cst_19 = arith.constant -1.000000e+09 : f32
    %21 = vector.broadcast %cst_19 : f32 to vector<8x8xf32>
    %22 = arith.select %13, %21, %20 : vector<8x8xi1>, vector<8x8xf32>
    %cst_20 = arith.constant dense<0xFF800000> : vector<8xf32>
    %23 = vector.multi_reduction <maximumf>, %22, %cst_20 [1] : vector<8x8xf32> to vector<8xf32>
    %24 = vector.shape_cast %23 : vector<8xf32> to vector<8x1xf32>
    %25 = vector.broadcast %24 : vector<8x1xf32> to vector<8x8xf32>
    %26 = arith.subf %22, %25 : vector<8x8xf32>
    %27 = math.exp %26 : vector<8x8xf32>
    %cst_21 = arith.constant dense<0.000000e+00> : vector<8xf32>
    %28 = vector.multi_reduction <add>, %27, %cst_21 [1] : vector<8x8xf32> to vector<8xf32>
    %29 = vector.shape_cast %28 : vector<8xf32> to vector<8x1xf32>
    %30 = tpu.reciprocal %29 {approx = true} : vector<8x1xf32> -> vector<8x1xf32>
    %31 = vector.broadcast %30 : vector<8x1xf32> to vector<8x8xf32>
    %32 = arith.mulf %27, %31 : vector<8x8xf32>
    %c0_22 = arith.constant 0 : index
    %c0_23 = arith.constant 0 : index
    %c0_24 = arith.constant 0 : index
    %c0_25 = arith.constant 0 : index
    %33 = vector.load %arg18[%c0_22, %c0_23, %c0_24, %c0_25] : memref<1x4x8x8xf32, #tpu.memory_space<vmem>>, vector<1x1x8x8xf32>
    %34 = vector.shape_cast %33 : vector<1x1x8x8xf32> to vector<8x8xf32>
    %35 = vector.shape_cast %32 : vector<8x8xf32> to vector<1x1x8x8xf32>
    tpu.vector_store %arg18[%c0_22, %c0_23, %c0_24, %c0_25], %35 {strides = array<i32>} : memref<1x4x8x8xf32, #tpu.memory_space<vmem>>, vector<1x1x8x8xf32>,
    %cst_26 = arith.constant dense<0.000000e+00> : vector<8x8xf32>
    %36 = tpu.matmul %32, %16, %cst_26 {dimension_numbers = #tpu.dot_dimension_numbers<[1], [0], [0], [1], [0, 0, 1, 1], [], []>} : vector<8x8xf32>, vector<8x8xf32>, vector<8x8xf32> -> vector<8x8xf32>
    %37 = vector.extract_strided_slice %5 {offsets = [0, 8], sizes = [8, 8], strides = [1, 1]} : vector<8x32xf32> to vector<8x8xf32>
    %38 = vector.extract_strided_slice %7 {offsets = [0, 8], sizes = [8, 8], strides = [1, 1]} : vector<8x32xf32> to vector<8x8xf32>
    %39 = vector.extract_strided_slice %9 {offsets = [0, 8], sizes = [8, 8], strides = [1, 1]} : vector<8x32xf32> to vector<8x8xf32>
    %40 = tpu.transpose %38, [1, 0] : vector<8x8xf32> -> vector<8x8xf32>
    %cst_27 = arith.constant dense<0.000000e+00> : vector<8x8xf32>
    %41 = tpu.matmul %37, %40, %cst_27 {dimension_numbers = #tpu.dot_dimension_numbers<[1], [0], [0], [1], [0, 0, 1, 1], [], []>} : vector<8x8xf32>, vector<8x8xf32>, vector<8x8xf32> -> vector<8x8xf32>
    %cst_28 = arith.constant 0.353553385 : f32
    %42 = vector.broadcast %cst_28 : f32 to vector<8x8xf32>
    %43 = arith.mulf %41, %42 : vector<8x8xf32>
    %cst_29 = arith.constant -1.000000e+09 : f32
    %44 = vector.broadcast %cst_29 : f32 to vector<8x8xf32>
    %45 = arith.select %13, %44, %43 : vector<8x8xi1>, vector<8x8xf32>
    %cst_30 = arith.constant dense<0xFF800000> : vector<8xf32>
    %46 = vector.multi_reduction <maximumf>, %45, %cst_30 [1] : vector<8x8xf32> to vector<8xf32>
    %47 = vector.shape_cast %46 : vector<8xf32> to vector<8x1xf32>
    %48 = vector.broadcast %47 : vector<8x1xf32> to vector<8x8xf32>
    %49 = arith.subf %45, %48 : vector<8x8xf32>
    %50 = math.exp %49 : vector<8x8xf32>
    %cst_31 = arith.constant dense<0.000000e+00> : vector<8xf32>
    %51 = vector.multi_reduction <add>, %50, %cst_31 [1] : vector<8x8xf32> to vector<8xf32>
    %52 = vector.shape_cast %51 : vector<8xf32> to vector<8x1xf32>
    %53 = tpu.reciprocal %52 {approx = true} : vector<8x1xf32> -> vector<8x1xf32>
    %54 = vector.broadcast %53 : vector<8x1xf32> to vector<8x8xf32>
    %55 = arith.mulf %50, %54 : vector<8x8xf32>
    %c0_32 = arith.constant 0 : index
    %c1 = arith.constant 1 : index
    %c0_33 = arith.constant 0 : index
    %c0_34 = arith.constant 0 : index
    %56 = vector.load %arg18[%c0_32, %c1, %c0_33, %c0_34] : memref<1x4x8x8xf32, #tpu.memory_space<vmem>>, vector<1x1x8x8xf32>
    %57 = vector.shape_cast %56 : vector<1x1x8x8xf32> to vector<8x8xf32>
    %58 = vector.shape_cast %55 : vector<8x8xf32> to vector<1x1x8x8xf32>
    tpu.vector_store %arg18[%c0_32, %c1, %c0_33, %c0_34], %58 {strides = array<i32>} : memref<1x4x8x8xf32, #tpu.memory_space<vmem>>, vector<1x1x8x8xf32>,
    %cst_35 = arith.constant dense<0.000000e+00> : vector<8x8xf32>
    %59 = tpu.matmul %55, %39, %cst_35 {dimension_numbers = #tpu.dot_dimension_numbers<[1], [0], [0], [1], [0, 0, 1, 1], [], []>} : vector<8x8xf32>, vector<8x8xf32>, vector<8x8xf32> -> vector<8x8xf32>
    %60 = vector.extract_strided_slice %5 {offsets = [0, 16], sizes = [8, 8], strides = [1, 1]} : vector<8x32xf32> to vector<8x8xf32>
    %61 = vector.extract_strided_slice %7 {offsets = [0, 16], sizes = [8, 8], strides = [1, 1]} : vector<8x32xf32> to vector<8x8xf32>
    %62 = vector.extract_strided_slice %9 {offsets = [0, 16], sizes = [8, 8], strides = [1, 1]} : vector<8x32xf32> to vector<8x8xf32>
    %63 = tpu.transpose %61, [1, 0] : vector<8x8xf32> -> vector<8x8xf32>
    %cst_36 = arith.constant dense<0.000000e+00> : vector<8x8xf32>
    %64 = tpu.matmul %60, %63, %cst_36 {dimension_numbers = #tpu.dot_dimension_numbers<[1], [0], [0], [1], [0, 0, 1, 1], [], []>} : vector<8x8xf32>, vector<8x8xf32>, vector<8x8xf32> -> vector<8x8xf32>
    %cst_37 = arith.constant 0.353553385 : f32
    %65 = vector.broadcast %cst_37 : f32 to vector<8x8xf32>
    %66 = arith.mulf %64, %65 : vector<8x8xf32>
    %cst_38 = arith.constant -1.000000e+09 : f32
    %67 = vector.broadcast %cst_38 : f32 to vector<8x8xf32>
    %68 = arith.select %13, %67, %66 : vector<8x8xi1>, vector<8x8xf32>
    %cst_39 = arith.constant dense<0xFF800000> : vector<8xf32>
    %69 = vector.multi_reduction <maximumf>, %68, %cst_39 [1] : vector<8x8xf32> to vector<8xf32>
    %70 = vector.shape_cast %69 : vector<8xf32> to vector<8x1xf32>
    %71 = vector.broadcast %70 : vector<8x1xf32> to vector<8x8xf32>
    %72 = arith.subf %68, %71 : vector<8x8xf32>
    %73 = math.exp %72 : vector<8x8xf32>
    %cst_40 = arith.constant dense<0.000000e+00> : vector<8xf32>
    %74 = vector.multi_reduction <add>, %73, %cst_40 [1] : vector<8x8xf32> to vector<8xf32>
    %75 = vector.shape_cast %74 : vector<8xf32> to vector<8x1xf32>
    %76 = tpu.reciprocal %75 {approx = true} : vector<8x1xf32> -> vector<8x1xf32>
    %77 = vector.broadcast %76 : vector<8x1xf32> to vector<8x8xf32>
    %78 = arith.mulf %73, %77 : vector<8x8xf32>
    %c0_41 = arith.constant 0 : index
    %c2 = arith.constant 2 : index
    %c0_42 = arith.constant 0 : index
    %c0_43 = arith.constant 0 : index
    %79 = vector.load %arg18[%c0_41, %c2, %c0_42, %c0_43] : memref<1x4x8x8xf32, #tpu.memory_space<vmem>>, vector<1x1x8x8xf32>
    %80 = vector.shape_cast %79 : vector<1x1x8x8xf32> to vector<8x8xf32>
    %81 = vector.shape_cast %78 : vector<8x8xf32> to vector<1x1x8x8xf32>
    tpu.vector_store %arg18[%c0_41, %c2, %c0_42, %c0_43], %81 {strides = array<i32>} : memref<1x4x8x8xf32, #tpu.memory_space<vmem>>, vector<1x1x8x8xf32>,
    %cst_44 = arith.constant dense<0.000000e+00> : vector<8x8xf32>
    %82 = tpu.matmul %78, %62, %cst_44 {dimension_numbers = #tpu.dot_dimension_numbers<[1], [0], [0], [1], [0, 0, 1, 1], [], []>} : vector<8x8xf32>, vector<8x8xf32>, vector<8x8xf32> -> vector<8x8xf32>
    %83 = vector.extract_strided_slice %5 {offsets = [0, 24], sizes = [8, 8], strides = [1, 1]} : vector<8x32xf32> to vector<8x8xf32>
    %84 = vector.extract_strided_slice %7 {offsets = [0, 24], sizes = [8, 8], strides = [1, 1]} : vector<8x32xf32> to vector<8x8xf32>
    %85 = vector.extract_strided_slice %9 {offsets = [0, 24], sizes = [8, 8], strides = [1, 1]} : vector<8x32xf32> to vector<8x8xf32>
    %86 = tpu.transpose %84, [1, 0] : vector<8x8xf32> -> vector<8x8xf32>
    %cst_45 = arith.constant dense<0.000000e+00> : vector<8x8xf32>
    %87 = tpu.matmul %83, %86, %cst_45 {dimension_numbers = #tpu.dot_dimension_numbers<[1], [0], [0], [1], [0, 0, 1, 1], [], []>} : vector<8x8xf32>, vector<8x8xf32>, vector<8x8xf32> -> vector<8x8xf32>
    %cst_46 = arith.constant 0.353553385 : f32
    %88 = vector.broadcast %cst_46 : f32 to vector<8x8xf32>
    %89 = arith.mulf %87, %88 : vector<8x8xf32>
    %cst_47 = arith.constant -1.000000e+09 : f32
    %90 = vector.broadcast %cst_47 : f32 to vector<8x8xf32>
    %91 = arith.select %13, %90, %89 : vector<8x8xi1>, vector<8x8xf32>
    %cst_48 = arith.constant dense<0xFF800000> : vector<8xf32>
    %92 = vector.multi_reduction <maximumf>, %91, %cst_48 [1] : vector<8x8xf32> to vector<8xf32>
    %93 = vector.shape_cast %92 : vector<8xf32> to vector<8x1xf32>
    %94 = vector.broadcast %93 : vector<8x1xf32> to vector<8x8xf32>
    %95 = arith.subf %91, %94 : vector<8x8xf32>
    %96 = math.exp %95 : vector<8x8xf32>
    %cst_49 = arith.constant dense<0.000000e+00> : vector<8xf32>
    %97 = vector.multi_reduction <add>, %96, %cst_49 [1] : vector<8x8xf32> to vector<8xf32>
    %98 = vector.shape_cast %97 : vector<8xf32> to vector<8x1xf32>
    %99 = tpu.reciprocal %98 {approx = true} : vector<8x1xf32> -> vector<8x1xf32>
    %100 = vector.broadcast %99 : vector<8x1xf32> to vector<8x8xf32>
    %101 = arith.mulf %96, %100 : vector<8x8xf32>
    %c0_50 = arith.constant 0 : index
    %c3 = arith.constant 3 : index
    %c0_51 = arith.constant 0 : index
    %c0_52 = arith.constant 0 : index
    %102 = vector.load %arg18[%c0_50, %c3, %c0_51, %c0_52] : memref<1x4x8x8xf32, #tpu.memory_space<vmem>>, vector<1x1x8x8xf32>
    %103 = vector.shape_cast %102 : vector<1x1x8x8xf32> to vector<8x8xf32>
    %104 = vector.shape_cast %101 : vector<8x8xf32> to vector<1x1x8x8xf32>
    tpu.vector_store %arg18[%c0_50, %c3, %c0_51, %c0_52], %104 {strides = array<i32>} : memref<1x4x8x8xf32, #tpu.memory_space<vmem>>, vector<1x1x8x8xf32>,
    %cst_53 = arith.constant dense<0.000000e+00> : vector<8x8xf32>
    %105 = tpu.matmul %101, %85, %cst_53 {dimension_numbers = #tpu.dot_dimension_numbers<[1], [0], [0], [1], [0, 0, 1, 1], [], []>} : vector<8x8xf32>, vector<8x8xf32>, vector<8x8xf32> -> vector<8x8xf32>
    %106 = tpu.concatenate %36, %59, %82, %105 in 1 : vector<8x8xf32>, vector<8x8xf32>, vector<8x8xf32>, vector<8x8xf32> -> vector<8x32xf32>
    %c0_54 = arith.constant 0 : index
    %c0_55 = arith.constant 0 : index
    %107 = vector.load %arg8[%c0_54, %c0_55] : memref<32x32xf32, #tpu.memory_space<vmem>>, vector<32x32xf32>
    %cst_56 = arith.constant dense<0.000000e+00> : vector<8x32xf32>
    %108 = tpu.matmul %106, %107, %cst_56 {dimension_numbers = #tpu.dot_dimension_numbers<[1], [0], [0], [1], [0, 0, 1, 1], [], []>} : vector<8x32xf32>, vector<32x32xf32>, vector<8x32xf32> -> vector<8x32xf32>
    %109 = arith.addf %108, %1 : vector<8x32xf32>
    %c0_57 = arith.constant 0 : index
    %c0_58 = arith.constant 0 : index
    %110 = vector.load %arg13[%c0_57, %c0_58] : memref<1x32xf32, #tpu.memory_space<vmem>>, vector<1x32xf32>
    %c0_59 = arith.constant 0 : index
    %c0_60 = arith.constant 0 : index
    %111 = vector.load %arg14[%c0_59, %c0_60] : memref<1x32xf32, #tpu.memory_space<vmem>>, vector<1x32xf32>
    %cst_61 = arith.constant dense<0.000000e+00> : vector<8xf32>
    %112 = vector.multi_reduction <add>, %109, %cst_61 [1] : vector<8x32xf32> to vector<8xf32>
    %113 = vector.shape_cast %112 : vector<8xf32> to vector<8x1xf32>
    %cst_62 = arith.constant 3.200000e+01 : f32
    %114 = vector.broadcast %cst_62 : f32 to vector<8x1xf32>
    %115 = arith.divf %113, %114 : vector<8x1xf32>
    %116 = vector.broadcast %115 : vector<8x1xf32> to vector<8x32xf32>
    %117 = arith.subf %109, %116 : vector<8x32xf32>
    %118 = arith.mulf %117, %117 : vector<8x32xf32>
    %cst_63 = arith.constant dense<0.000000e+00> : vector<8xf32>
    %119 = vector.multi_reduction <add>, %118, %cst_63 [1] : vector<8x32xf32> to vector<8xf32>
    %120 = vector.shape_cast %119 : vector<8xf32> to vector<8x1xf32>
    %cst_64 = arith.constant 3.200000e+01 : f32
    %121 = vector.broadcast %cst_64 : f32 to vector<8x1xf32>
    %122 = arith.divf %120, %121 : vector<8x1xf32>
    %123 = vector.broadcast %115 : vector<8x1xf32> to vector<8x32xf32>
    %124 = arith.subf %109, %123 : vector<8x32xf32>
    %cst_65 = arith.constant 9.99999974E-6 : f32
    %125 = vector.broadcast %cst_65 : f32 to vector<8x1xf32>
    %126 = arith.addf %122, %125 : vector<8x1xf32>
    %127 = math.rsqrt %126 : vector<8x1xf32>
    %128 = vector.broadcast %127 : vector<8x1xf32> to vector<8x32xf32>
    %129 = arith.mulf %124, %128 : vector<8x32xf32>
    %130 = vector.broadcast %110 : vector<1x32xf32> to vector<8x32xf32>
    %131 = arith.mulf %129, %130 : vector<8x32xf32>
    %132 = vector.broadcast %111 : vector<1x32xf32> to vector<8x32xf32>
    %133 = arith.addf %131, %132 : vector<8x32xf32>
    %c0_66 = arith.constant 0 : index
    %c0_67 = arith.constant 0 : index
    %134 = vector.load %arg9[%c0_66, %c0_67] : memref<32x64xf32, #tpu.memory_space<vmem>>, vector<32x64xf32>
    %cst_68 = arith.constant dense<0.000000e+00> : vector<8x64xf32>
    %135 = tpu.matmul %133, %134, %cst_68 {dimension_numbers = #tpu.dot_dimension_numbers<[1], [0], [0], [1], [0, 0, 1, 1], [], []>} : vector<8x32xf32>, vector<32x64xf32>, vector<8x64xf32> -> vector<8x64xf32>
    %c0_69 = arith.constant 0 : index
    %c0_70 = arith.constant 0 : index
    %136 = vector.load %arg10[%c0_69, %c0_70] : memref<1x64xf32, #tpu.memory_space<vmem>>, vector<1x64xf32>
    %137 = vector.broadcast %136 : vector<1x64xf32> to vector<8x64xf32>
    %138 = arith.addf %135, %137 : vector<8x64xf32>
    %cst_71 = arith.constant 0.000000e+00 : f32
    %139 = vector.broadcast %cst_71 : f32 to vector<8x64xf32>
    %140 = arith.maximumf %138, %139 : vector<8x64xf32>
    %c0_72 = arith.constant 0 : index
    %c0_73 = arith.constant 0 : index
    %141 = vector.load %arg11[%c0_72, %c0_73] : memref<64x32xf32, #tpu.memory_space<vmem>>, vector<64x32xf32>
    %cst_74 = arith.constant dense<0.000000e+00> : vector<8x32xf32>
    %142 = tpu.matmul %140, %141, %cst_74 {dimension_numbers = #tpu.dot_dimension_numbers<[1], [0], [0], [1], [0, 0, 1, 1], [], []>} : vector<8x64xf32>, vector<64x32xf32>, vector<8x32xf32> -> vector<8x32xf32>
    %c0_75 = arith.constant 0 : index
    %c0_76 = arith.constant 0 : index
    %143 = vector.load %arg12[%c0_75, %c0_76] : memref<1x32xf32, #tpu.memory_space<vmem>>, vector<1x32xf32>
    %144 = vector.broadcast %143 : vector<1x32xf32> to vector<8x32xf32>
    %145 = arith.addf %142, %144 : vector<8x32xf32>
    %146 = arith.addf %145, %133 : vector<8x32xf32>
    %c0_77 = arith.constant 0 : index
    %c0_78 = arith.constant 0 : index
    %147 = vector.load %arg15[%c0_77, %c0_78] : memref<1x32xf32, #tpu.memory_space<vmem>>, vector<1x32xf32>
    %c0_79 = arith.constant 0 : index
    %c0_80 = arith.constant 0 : index
    %148 = vector.load %arg16[%c0_79, %c0_80] : memref<1x32xf32, #tpu.memory_space<vmem>>, vector<1x32xf32>
    %cst_81 = arith.constant dense<0.000000e+00> : vector<8xf32>
    %149 = vector.multi_reduction <add>, %146, %cst_81 [1] : vector<8x32xf32> to vector<8xf32>
    %150 = vector.shape_cast %149 : vector<8xf32> to vector<8x1xf32>
    %cst_82 = arith.constant 3.200000e+01 : f32
    %151 = vector.broadcast %cst_82 : f32 to vector<8x1xf32>
    %152 = arith.divf %150, %151 : vector<8x1xf32>
    %153 = vector.broadcast %152 : vector<8x1xf32> to vector<8x32xf32>
    %154 = arith.subf %146, %153 : vector<8x32xf32>
    %155 = arith.mulf %154, %154 : vector<8x32xf32>
    %cst_83 = arith.constant dense<0.000000e+00> : vector<8xf32>
    %156 = vector.multi_reduction <add>, %155, %cst_83 [1] : vector<8x32xf32> to vector<8xf32>
    %157 = vector.shape_cast %156 : vector<8xf32> to vector<8x1xf32>
    %cst_84 = arith.constant 3.200000e+01 : f32
    %158 = vector.broadcast %cst_84 : f32 to vector<8x1xf32>
    %159 = arith.divf %157, %158 : vector<8x1xf32>
    %160 = vector.broadcast %152 : vector<8x1xf32> to vector<8x32xf32>
    %161 = arith.subf %146, %160 : vector<8x32xf32>
    %cst_85 = arith.constant 9.99999974E-6 : f32
    %162 = vector.broadcast %cst_85 : f32 to vector<8x1xf32>
    %163 = arith.addf %159, %162 : vector<8x1xf32>
    %164 = math.rsqrt %163 : vector<8x1xf32>
    %165 = vector.broadcast %164 : vector<8x1xf32> to vector<8x32xf32>
    %166 = arith.mulf %161, %165 : vector<8x32xf32>
    %167 = vector.broadcast %147 : vector<1x32xf32> to vector<8x32xf32>
    %168 = arith.mulf %166, %167 : vector<8x32xf32>
    %169 = vector.broadcast %148 : vector<1x32xf32> to vector<8x32xf32>
    %170 = arith.addf %168, %169 : vector<8x32xf32>
    %c0_86 = arith.constant 0 : index
    %c0_87 = arith.constant 0 : index
    %c0_88 = arith.constant 0 : index
    %171 = vector.load %arg17[%c0_86, %c0_87, %c0_88] : memref<1x8x32xf32, #tpu.memory_space<vmem>>, vector<1x8x32xf32>
    %172 = vector.shape_cast %171 : vector<1x8x32xf32> to vector<8x32xf32>
    %173 = vector.shape_cast %170 : vector<8x32xf32> to vector<1x8x32xf32>
    tpu.vector_store %arg17[%c0_86, %c0_87, %c0_88], %173 {strides = array<i32>} : memref<1x8x32xf32, #tpu.memory_space<vmem>>, vector<1x8x32xf32>,
    return
  }
  func.func @transform_0(%arg0: i32, %arg1: i32) -> (i32, i32, i32) {
    %c0_i32 = arith.constant 0 : i32
    %c0_i32_0 = arith.constant 0 : i32
    return %arg0, %arg1, %c0_i32 : i32, i32, i32
  }
  func.func @transform_1(%arg0: i32, %arg1: i32) -> (i32, i32, i32) {
    %c0_i32 = arith.constant 0 : i32
    %c0_i32_0 = arith.constant 0 : i32
    %c0_i32_1 = arith.constant 0 : i32
    return %arg0, %c0_i32, %c0_i32_0 : i32, i32, i32
  }
  func.func @transform_2(%arg0: i32, %arg1: i32) -> (i32, i32, i32) {
    %c0_i32 = arith.constant 0 : i32
    %c0_i32_0 = arith.constant 0 : i32
    return %arg0, %arg1, %c0_i32 : i32, i32, i32
  }
  func.func @transform_3(%arg0: i32, %arg1: i32) -> (i32, i32) {
    %c0_i32 = arith.constant 0 : i32
    %c0_i32_0 = arith.constant 0 : i32
    %c0_i32_1 = arith.constant 0 : i32
    return %c0_i32, %c0_i32_0 : i32, i32
  }
  func.func @transform_4(%arg0: i32, %arg1: i32) -> (i32, i32) {
    %c0_i32 = arith.constant 0 : i32
    %c0_i32_0 = arith.constant 0 : i32
    %c0_i32_1 = arith.constant 0 : i32
    return %c0_i32, %c0_i32_0 : i32, i32
  }
  func.func @transform_5(%arg0: i32, %arg1: i32) -> (i32, i32) {
    %c0_i32 = arith.constant 0 : i32
    %c0_i32_0 = arith.constant 0 : i32
    %c0_i32_1 = arith.constant 0 : i32
    return %c0_i32, %c0_i32_0 : i32, i32
  }
  func.func @transform_6(%arg0: i32, %arg1: i32) -> (i32, i32) {
    %c0_i32 = arith.constant 0 : i32
    %c0_i32_0 = arith.constant 0 : i32
    %c0_i32_1 = arith.constant 0 : i32
    return %c0_i32, %c0_i32_0 : i32, i32
  }
  func.func @transform_7(%arg0: i32, %arg1: i32) -> (i32, i32) {
    %c0_i32 = arith.constant 0 : i32
    %c0_i32_0 = arith.constant 0 : i32
    %c0_i32_1 = arith.constant 0 : i32
    return %c0_i32, %c0_i32_0 : i32, i32
  }
  func.func @transform_8(%arg0: i32, %arg1: i32) -> (i32, i32) {
    %c0_i32 = arith.constant 0 : i32
    %c0_i32_0 = arith.constant 0 : i32
    %c0_i32_1 = arith.constant 0 : i32
    return %c0_i32, %c0_i32_0 : i32, i32
  }
  func.func @transform_9(%arg0: i32, %arg1: i32) -> (i32, i32) {
    %c0_i32 = arith.constant 0 : i32
    %c0_i32_0 = arith.constant 0 : i32
    %c0_i32_1 = arith.constant 0 : i32
    return %c0_i32, %c0_i32_0 : i32, i32
  }
  func.func @transform_10(%arg0: i32, %arg1: i32) -> (i32, i32) {
    %c0_i32 = arith.constant 0 : i32
    %c0_i32_0 = arith.constant 0 : i32
    %c0_i32_1 = arith.constant 0 : i32
    return %c0_i32, %c0_i32_0 : i32, i32
  }
  func.func @transform_11(%arg0: i32, %arg1: i32) -> (i32, i32) {
    %c0_i32 = arith.constant 0 : i32
    %c0_i32_0 = arith.constant 0 : i32
    %c0_i32_1 = arith.constant 0 : i32
    return %c0_i32, %c0_i32_0 : i32, i32
  }
  func.func @transform_12(%arg0: i32, %arg1: i32) -> (i32, i32) {
    %c0_i32 = arith.constant 0 : i32
    %c0_i32_0 = arith.constant 0 : i32
    %c0_i32_1 = arith.constant 0 : i32
    return %c0_i32, %c0_i32_0 : i32, i32
  }
  func.func @transform_13(%arg0: i32, %arg1: i32) -> (i32, i32) {
    %c0_i32 = arith.constant 0 : i32
    %c0_i32_0 = arith.constant 0 : i32
    %c0_i32_1 = arith.constant 0 : i32
    return %c0_i32, %c0_i32_0 : i32, i32
  }
  func.func @transform_14(%arg0: i32, %arg1: i32) -> (i32, i32) {
    %c0_i32 = arith.constant 0 : i32
    %c0_i32_0 = arith.constant 0 : i32
    %c0_i32_1 = arith.constant 0 : i32
    return %c0_i32, %c0_i32_0 : i32, i32
  }
  func.func @transform_15(%arg0: i32, %arg1: i32) -> (i32, i32, i32) {
    %c0_i32 = arith.constant 0 : i32
    %c0_i32_0 = arith.constant 0 : i32
    return %arg0, %arg1, %c0_i32 : i32, i32, i32
  }
  func.func @transform_16(%arg0: i32, %arg1: i32) -> (i32, i32, i32, i32) {
    %c0_i32 = arith.constant 0 : i32
    %c0_i32_0 = arith.constant 0 : i32
    %c0_i32_1 = arith.constant 0 : i32
    return %arg0, %c0_i32, %arg1, %c0_i32_0 : i32, i32, i32, i32
  }
}

</mosaic_0001>

<bundles_post_ra>
// kernel: tpu_custom_call.1
= control target key start
LH: loop header
LB: loop body
LE: loop exit
PB: predicated region body
PF: predicated region fallthrough
CT: control target
= control target key end

     0   :  { %s3298_s0 = inlined_call_operand.hbm [shape: f32[2,8,32], index: 0, kind: input, shape index: {}]   ;;  %s3299_s1 = inlined_call_operand.hbm [shape: f32[2,8,32], index: 1, kind: input, shape index: {}]   ;;  %s3300_s2 = inlined_call_operand.hbm [shape: f32[2,8,8], index: 2, kind: input, shape index: {}]   ;;  %s3301_s3 = inlined_call_operand.vmem [shape: f32[32,32], index: 3, kind: input, shape index: {}]   ;;  %s3302_s4 = inlined_call_operand.vmem [shape: f32[32,32], index: 4, kind: input, shape index: {}]   ;;  %s3303_s5 = inlined_call_operand.vmem [shape: f32[32,32], index: 5, kind: input, shape index: {}]   ;;  %s3304_s6 = inlined_call_operand.hbm [shape: f32[32,32], index: 6, kind: input, shape index: {}]   ;;  %s3305_s7 = inlined_call_operand.hbm [shape: f32[32,64], index: 7, kind: input, shape index: {}]   ;;  %s3306_s8 = inlined_call_operand.vmem [shape: f32[1,64], index: 8, kind: input, shape index: {}]   ;;  %s3307_s9 = inlined_call_operand.vmem [shape: f32[64,32], index: 9, kind: input, shape index: {}]   ;;  %s3308_s10 = inlined_call_operand.vmem [shape: f32[1,32], index: 10, kind: input, shape index: {}]   ;;  %s3309_s11 = inlined_call_operand.vmem [shape: f32[1,32], index: 11, kind: input, shape index: {}]   ;;  %s3310_s12 = inlined_call_operand.vmem [shape: f32[1,32], index: 12, kind: input, shape index: {}]   ;;  %s3311_s13 = inlined_call_operand.vmem [shape: f32[1,32], index: 13, kind: input, shape index: {}]   ;;  %s3312_s14 = inlined_call_operand.vmem [shape: f32[1,32], index: 14, kind: input, shape index: {}]   ;;  %s3313_s15 = inlined_call_operand.hbm [shape: f32[2,8,32], index: 15, kind: output, shape index: {0}]   ;;  %s3314_s16 = inlined_call_operand.hbm [shape: f32[2,4,8,8], index: 16, kind: output, shape index: {1}]  }
   0x1   :  { %3335 = sst [smem:[#allocation27_spill]] %s3298_s0 }
   0x2   :  { %3336 = sst [smem:[#allocation28_spill]] %s3299_s1 }
   0x3   :  { %3337 = sst [smem:[#allocation29_spill]] %s3304_s6 }
   0x4   :  { %3338 = sst [smem:[#allocation30_spill]] %s3306_s8 }
   0x5   :  { %3339 = sst [smem:[#allocation31_spill]] %s3308_s10 }
   0x6   :  { %3340 = sst [smem:[#allocation32_spill]] %s3309_s11 }
   0x7   :  { %3341 = sst [smem:[#allocation33_spill]] %s3310_s12 }
   0x8   :  { %3342 = sst [smem:[#allocation34_spill]] %s3311_s13 }
   0x9   :  { %3343 = sst [smem:[#allocation35_spill]] %s3312_s14 }
   0xa   :  { %3344 = sst [smem:[#allocation36_spill]] %s3313_s15 }
   0xb   :  { %3345 = sst [smem:[#allocation37_spill]] %s3314_s16 }
   0xc   :  { %22 = vsyncpa [#allocation3], 0 }
   0xd   :  { %24 = vsyncpa [#allocation3 + $0x1], 0 }
   0xe   :  { %25 = vsyncpa [#allocation6], 0 }
   0xf   :  { %27 = vsyncpa [#allocation6 + $0x1], 0 }
  0x10   :  { %28 = vsyncpa [#allocation9], 0 }
  0x11   :  { %29 = vsyncpa [#allocation4], 0 }
  0x12   :  { %31 = vsyncpa [#allocation4 + $0x1], 0 }
  0x13   :  { %32 = vsyncpa [#allocation13], 0 }
  0x14   :  { %34 = vsyncpa [#allocation13 + $0x1], 0  ;;  %s2825_s21 = smov 0   ;;  %s2827_s22 = smov 0  }
  0x15   :  { %s2829_s23 = smov 0   ;;  %s2831_s24 = smov 0  }
  0x16   :  { %s2833_s25 = smov 0   ;;  %s2835_s26 = smov 0  }
  0x17 LB: > { %3346 = sst [smem:[#allocation19_spill]] %s2700_s21  ;;  %s2856_s27 = sadd.s32 4294967295, %s2720_s26   ;;  %s2720_s26 = sphi %s2835_s26, %s40_s26   ;;  %s2716_s25 = sphi %s2833_s25, %s3393_s25   ;;  %s2712_s24 = sphi %s2831_s24, %s3392_s24   ;;  %s2708_s23 = sphi %s2829_s23, %s3396_s23   ;;  %s2704_s22 = sphi %s2827_s22, %s3395_s22   ;;  %s2700_s21 = sphi %s2825_s21, %s3394_s21  }
  0x18   : > { %3347 = sst [smem:[#allocation20_spill]] %s2712_s24  ;;  %s2119_s28 = sadd.s32 4294967294, %s2720_s26  }
  0x19   : > { %3348 = sst [smem:[#allocation21_spill]] %s2716_s25  ;;  %p74_p0 = scmp.ne.s32.totalorder %s2704_s22, %s2700_s21 }
  0x1a   : > { %3349 = sst [smem:[#allocation22_spill]] %s2720_s26  ;;  %p3329_p1 = scmp.eq.s32.totalorder %s2856_s27, 0 }
  0x1b   : > { %p412_p3 = scmp.eq.s32.totalorder %s2119_s28, 1  ;;  %p2120_p5 = scmp.ge.s32.totalorder %s2720_s26, 1 }
  0x1c   : > { %p2865_p4 = por %p3329_p1, %p74_p0  ;;  %p447_p7 = scmp.lt.s32.totalorder %s2720_s26, 3 }
  0x1d   : > { %p2870_p6 = por %p412_p3, %p74_p0  ;;  %s2722_s17 = smov [#allocation8]  }
  0x1e   : > { %s3350_s29 = scalar_select %p2865_p4, 1, 0 }
  0x1f   : > { %s3351_s30 = scalar_select %p2870_p6, 1, 0 }
  0x20   : > { %p2875_p8 = pnand %p2120_p5, %p447_p7  ;;  %s468_s18 = sshll.u32 %s2722_s17, 4  ;;  %s469_s18 = int_to_ptr.vmem [resolvable:$true] %s468_s18 }
  0x21   : > { %3352 = sst [smem:[#allocation23_spill]] %s3351_s30  ;;  %s52_s20 = sadd.s32 1, %s2716_s25 }
  0x22   : > { %s3353_s0 = scalar_select %p2875_p8, 1, 0 }
  0x23   : > { %p2355_p9 = pneg %p2875_p8  ;;  %s2477_s28 = scalar_lea.vmem %s469_s18, 512 }
  0x24   : > { %p2478_p13 = scmp.ne.s32.totalorder %s469_s18, %s2477_s28  ;;  %p2485_p5 = scmp.lt.s32.totalorder %s469_s18, %s469_s18 }
  0x25   : > { %p2884_p11 = pnand %p2355_p9, %p3329_p1  ;;  %p2486_p7 = scmp.lt.s32.totalorder %s2477_s28, %s2477_s28 }
  0x27   : > { %p3330_p12 = pneg %p2884_p11  ;;  %p2487_p2 = por %p2486_p7, %p2485_p5 }
  0x29   : > { %p2480_p0 = pnand %p2478_p13, %p3330_p12 }
  0x2b   : > { %p2481_p3 = pneg %p2480_p0 }
  0x2d   : > { %p2488_p10 = pnand %p2487_p2, %p2481_p3 }
  0x2f   : > { %2491 = shalt.err (!%p2488_p10)
}
  0x30   : > { %s3319_s17 = smov 128   ;;  %s3320_s30 = smov 8  }
  0x31   : > { %s3355_s6 = sld [smem:[#allocation29_spill]]  ;;  %p54_p2 = scmp.ge.s32.totalorder %s52_s20, 2 }
  0x32   : > { %s61_s15 = sadd.s32 1, %s2708_s23  ;;  %p68_p9 = scmp.ne.s32.totalorder %s2708_s23, %s2704_s22 }
  0x33   : > { %p69_p10 = scmp.eq.s32.totalorder %s2720_s26, 0  ;;  %s3398_s20 = smov (%p54_p2, %s52_s20), 0 }
  0x34   : > { %3356 = sst [smem:[#allocation24_spill]] %s3398_s20  ;;  %p3357_p0 = scmp.eq.s32.totalorder %s2856_s27, 1 }
  0x35   : > { %p70_p13 = por %p69_p10, %p68_p9  ;;  %s56_s13 = ssub.s32 %s2716_s25, %s3398_s20 }
  0x36   : > { %p2910_p3 = por %p3357_p0, %p68_p9  ;;  %p2381_p5 = scmp.lt.s32.totalorder %s2720_s26, 2 }
  0x37   : > { %2358 = dma.hbm_to_vmem [thread:$0]  (!%p2884_p11), %s3355_s6, 512, %s469_s18, [#allocation9], %s3319_s17, %s3319_s17, %s3320_s30  }
  0x38   : > { %s3358_s14 = scalar_select %p2910_p3, 1, 0 }
  0x39   : > { %p59_p7 = scmp.eq.s32.totalorder %s56_s13, 0  ;;  %s3324_s16 = sand.u32 1, %s2708_s23  }
  0x3a   : > { %3359 = sst [smem:[#allocation25_spill]] %s3358_s14  ;;  %s2920_s21 = sshll.u32 %s3324_s16, 3 }
  0x3b   : > { %s2923_s18 = sshll.u32 %s2716_s25, 7  ;;  %p2928_p2 = pnand %p2381_p5, %p70_p13 }
  0x3c   : > { %s2926_s28 = scalar_select %p59_p7, %s2708_s23, %s61_s15  }
  0x3d   : > { %s535_s30 = sand.u32 1, %s2720_s26   ;;  %s3362_s1 = sld [smem:[#allocation28_spill]] }
  0x3e   : > { %3360 = sst [smem:[#allocation26_spill]] %s2926_s28  ;;  %s539_s14 = scalar_lea.vmem [#allocation5], %s2920_s21 }
  0x3f   : > { %s546_s16 = sshll.u32 %s539_s14, 4  ;;  %s2725_s10 = smov [#allocation10]   ;;  %s547_s16 = int_to_ptr.vmem [resolvable:$true] %s546_s16 }
  0x40   : > { %s481_s25 = sshll.u32 %s2725_s10, 4  ;;  %s2938_s24 = scalar_lea.sflag [#allocation6], %s535_s30  ;;  %s482_s25 = int_to_ptr.vmem [resolvable:$true] %s481_s25 }
  0x41   : > { %p3331_p9 = pneg %p2928_p2  ;;  %s2505_s15 = scalar_lea.vmem %s547_s16, 128 }
  0x42   : > { %p2506_p10 = scmp.ne.s32.totalorder %s547_s16, %s2505_s15  ;;  %s2726_s28 = smov [#allocation5]  }
  0x43   : > { %s544_s13 = scalar_lea.hbm %s3362_s1, %s2923_s18  ;;  %s2510_s26 = sshll.u32 %s2726_s28, 4  ;;  %s2511_s26 = int_to_ptr.vmem [resolvable:$false] %s2510_s26 }
  0x44   : > { %p2508_p13 = pnand %p2506_p10, %p3331_p9  ;;  %s2512_s6 = scalar_lea.vmem %s2511_s26, 256 }
  0x45   : > { %p2513_p5 = scmp.lt.s32.totalorder %s547_s16, %s2511_s26  ;;  %p2514_p7 = scmp.lt.s32.totalorder %s2512_s6, %s2505_s15 }
  0x46   : > { %p2509_p0 = pneg %p2508_p13 }
  0x47   : > { %p2515_p1 = por %p2514_p7, %p2513_p5 }
  0x49   : > { %p2516_p12 = pnand %p2515_p1, %p2509_p0 }
  0x4b   : > { %2519 = shalt.err (!%p2516_p12)
}
  0x4c   : > { %2368 = dma.hbm_to_vmem [thread:$0]  (!%p2928_p2), %s544_s13, 128, %s547_s16, %s2938_s24  }
  0x4d   : > { %s2531_s10 = scalar_lea.vmem %s482_s25, 512  ;;  %p3363_p10 = pneg %p2884_p11 }
  0x4e   : > { %p2532_p6 = scmp.ne.s32.totalorder %s482_s25, %s2531_s10  ;;  %p2539_p3 = scmp.lt.s32.totalorder %s482_s25, %s482_s25 }
  0x4f   : > { %p2540_p4 = scmp.lt.s32.totalorder %s2531_s10, %s2531_s10 }
  0x50   : > { %p2534_p13 = pnand %p2532_p6, %p3363_p10 }
  0x51   : > { %p2541_p8 = por %p2540_p4, %p2539_p3 }
  0x52   : > { %p2535_p9 = pneg %p2534_p13 }
  0x54   : > { %p2542_p5 = pnand %p2541_p8, %p2535_p9 }
  0x56   : > { %2545 = shalt.err (!%p2542_p5)
}
  0x57   : > { %s3364_s14 = smov 8   ;;  %s3365_s26 = smov 128  }
  0x58   : > { %2361 = dma.hbm_to_vmem [thread:$0]  (!%p2884_p11), %s3305_s7, 512, %s482_s25, [#allocation9], %s3365_s26, %s3365_s26, %s3364_s14  }
  0x59   : > { %s3366_s13 = sld [smem:[#allocation27_spill]]  ;;  %s520_s6 = scalar_lea.vmem [#allocation2], %s2920_s21 }
  0x5a   : > { %s528_s10 = sshll.u32 %s520_s6, 4  ;;  %s563_s8 = scalar_lea.hbm %s3300_s2, %s2923_s18  ;;  %s529_s10 = int_to_ptr.vmem [resolvable:$true] %s528_s10 }
  0x5b   : > { %s3367_s12 = sand.u32 1, %s2708_s23   ;;  %s2559_s30 = scalar_lea.vmem %s529_s10, 128 }
  0x5c   : > { %s517_s11 = scalar_lea.sflag [#allocation3], %s3367_s12  ;;  %p2560_p1 = scmp.ne.s32.totalorder %s529_s10, %s2559_s30 }
  0x5d   : > { %p3368_p4 = pneg %p2928_p2  ;;  %s2727_s25 = smov [#allocation2]  }
  0x5e   : > { %s2564_s14 = sshll.u32 %s2727_s25, 4  ;;  %s2565_s14 = int_to_ptr.vmem [resolvable:$false] %s2564_s14 }
  0x5f   : > { %s526_s15 = scalar_lea.hbm %s3366_s13, %s2923_s18  ;;  %p2562_p6 = pnand %p2560_p1, %p3368_p4 }
  0x60   : > { %s2566_s26 = scalar_lea.vmem %s2565_s14, 256  ;;  %p2567_p11 = scmp.lt.s32.totalorder %s529_s10, %s2565_s14 }
  0x61   : > { %p2563_p8 = pneg %p2562_p6  ;;  %p2568_p12 = scmp.lt.s32.totalorder %s2566_s26, %s2559_s30 }
  0x63   : > { %p2569_p3 = por %p2568_p12, %p2567_p11 }
  0x65   : > { %p2570_p9 = pnand %p2569_p3, %p2563_p8 }
  0x67   : > { %2573 = shalt.err (!%p2570_p9)
}
  0x68   : > { %2365 = dma.hbm_to_vmem [thread:$0]  (!%p2928_p2), %s526_s15, 128, %s529_s10, %s517_s11  }
  0x69   : > { %s557_s1 = scalar_lea.vmem [#allocation7], %s2920_s21  ;;  %p3369_p7 = pmov %p3368_p4 }
  0x6a   : > { %s565_s12 = sshll.u32 %s557_s1, 4  ;;  %s2728_s16 = smov [#allocation7]   ;;  %s566_s12 = int_to_ptr.vmem [resolvable:$true] %s565_s12 }
  0x6b   : > { %s2587_s20 = scalar_lea.vmem %s566_s12, 128  ;;  %s2592_s28 = sshll.u32 %s2728_s16, 4  ;;  %s2593_s28 = int_to_ptr.vmem [resolvable:$false] %s2592_s28 }
  0x6c   : > { %p2588_p0 = scmp.ne.s32.totalorder %s566_s12, %s2587_s20  ;;  %s2594_s13 = scalar_lea.vmem %s2593_s28, 256 }
  0x6d   : > { %p2595_p5 = scmp.lt.s32.totalorder %s566_s12, %s2593_s28  ;;  %p2596_p1 = scmp.lt.s32.totalorder %s2594_s13, %s2587_s20 }
  0x6e   : > { %p2590_p10 = pnand %p2588_p0, %p3369_p7 }
  0x6f   : > { %p2597_p4 = por %p2596_p1, %p2595_p5 }
  0x70   : > { %p2591_p13 = pneg %p2590_p10 }
  0x72   : > { %p2598_p6 = pnand %p2597_p4, %p2591_p13 }
  0x74   : > { %2601 = shalt.err (!%p2598_p6)
}
  0x75   : > { %2371 = dma.hbm_to_vmem [thread:$0]  (!%p2928_p2), %s563_s8, 128, %s566_s12, %s2938_s24  }
  0x76   : > { %p3370_p8 = scmp.ne.s32.totalorder %s3353_s0, 0 }
  0x77   : > { %s2990_s15 = sand.u32 (!%p3370_p8), 1, %s2704_s22   ;;  %p3371_p11 = scmp.ne.s32.totalorder (!%p3370_p8), %s3350_s29, 0 }
  0x78   : > { %574 = sbr.rel (%p3370_p8) target bundleno = 2506 (0x9ca), region = 80  ;;  %s2993_s6 = sshll.u32 (!%p3370_p8), %s2990_s15, 3 }
  0x79   : > { %s577_s17 = scalar_lea.sflag (!%p3370_p8), [#allocation3], %s2990_s15  ;;  %s580_s10 = scalar_lea.vmem (!%p3370_p8), [#allocation2], %s2993_s6 }
  0x7d   : > { %2679 = dma.done.wait (%p3371_p11), %s577_s17, 128  }
  0x7e   : > { %2681 = vsyncadd (%p3371_p11), %s577_s17, 4294967168  ;;  %s585_s8 = sand.u32 1, %s2856_s27   ;;  %s589_s0 = scalar_lea.vmem [#allocation5], %s2993_s6 }
  0x7f   : > { %s586_s24 = scalar_lea.sflag [#allocation6], %s585_s8 }
  0x80   : > { %2683 = dma.done.wait (%p3371_p11), %s586_s24, 256  }
  0x81   : > { %2685 = vsyncadd (%p3371_p11), %s586_s24, 4294967040  ;;  %s598_s18 = scalar_lea.vmem [#allocation7], %s2993_s6  ;;  %p3372_p2 = scmp.eq.s32.totalorder %s2856_s27, 0 }
  0x83   : > { %2687 = dma.done.wait (%p3372_p2), [#allocation9], 1024   ;;  %p3373_p12 = pmov %p3372_p2 }
  0x84   : > { %v2729_v0 = vmov 0.0   ;;  %vm2730_vm0 = vmmov 0   ;;  %v675_v1 = vld [vmem:[%s3301_s3 + $0x18] sm:$0xff]  ;;  %v674_v2 = vld [vmem:[%s3301_s3 + $0x10] sm:$0xff]  ;;  %v673_v3 = vld [vmem:[%s3301_s3 + $0x8] sm:$0xff]  ;;  %vm676_vm1 = vcmask 261120  }
  0x85   : > { %2689 = vsyncadd (%p3373_p12), [#allocation9], 4294966272  ;;  %2223 = vmatprep.subr.mxu1 %v2729_v0  ;;  %2231 = vmatprep.mubr.msk.f32.mxu1 %vm2730_vm0, %v2729_v0  ;;  %v672_v4 = vld [vmem:[%s3301_s3] sm:$0xff]  ;;  %v753_v6 = vld [vmem:[%s3302_s4 + $0x18] sm:$0xff]  ;;  %vm903_vm2 = vcmask 64512   ;;  %s2731_s27 = smov 112  }
  0x86   : > { %2245 = vmatprep.subr.mxu0 %v2729_v0  ;;  %2253 = vmatprep.mubr.msk.f32.mxu0 %vm2730_vm0, %v2729_v0  ;;  %v3032_v5 = vld [vmem:[%s580_s10] sm:$0xff]  ;;  %v752_v7 = vld [vmem:[%s3302_s4 + $0x10] sm:$0xff]  ;;  %v830_v11 = vld [vmem:[%s3303_s5 + $0x18] sm:$0xff]  ;;  %s2732_s14 = smov 120   ;;  %s2733_s26 = smov 104   ;;  %vm1588_vm4 = vcmask 130048  }
  0x87   : > { %2224 = vmatpush3.msra.mxu1 %v675_v1  ;;  %v751_v8 = vld [vmem:[%s3302_s4 + $0x8] sm:$0xff]  ;;  %v750_v9 = vld [vmem:[%s3302_s4] sm:$0xff]  ;;  %v671_v10 = vld [vmem:[%s589_s0] sm:$0xff]  ;;  %2246 = vmatpush3.msra.mxu0 %v830_v11  ;;  %s2734_s12 = smov 8   ;;  %s2735_s20 = smov 16   ;;  %vm1590_vm5 = vcmask 195584  }
  0x88   : > { %2225 = vmatprep.subr.mxu1 %v2729_v0  ;;  %v829_v12 = vld [vmem:[%s3303_s5 + $0x10] sm:$0xff]  ;;  %2247 = vmatprep.subr.mxu0 %v2729_v0  ;;  %v828_v13 = vld [vmem:[%s3303_s5 + $0x8] sm:$0xff]  ;;  %v827_v14 = vld [vmem:[%s3303_s5] sm:$0xff]  ;;  %s2736_s16 = smov 24   ;;  %s3374_s25 = sld [smem:[#allocation32_spill]]  ;;  %vm1799_vm6 = vcmask 523264  }
  0x89   : > { %2226 = vmatpush3.msra.mxu1 %v674_v2  ;;  %2248 = vmatpush3.msra.mxu0 %v829_v12  ;;  %v901_v27 = vld [vmem:[%s598_s18] sm:$0xff]  ;;  %s2137_s18 = sshll.u32 %s2990_s15, 5  ;;  %s3376_s10 = sld [smem:[#allocation30_spill]] }
  0x8a   : > { %2227 = vmatprep.subr.mxu1 %v2729_v0  ;;  %2249 = vmatprep.subr.mxu0 %v2729_v0  ;;  %vm902_vm3 = vcmp.gt.f32.partialorder %v901_v27, 0.0  ;;  %s3131_s1 = scalar_lea.vmem [#allocation12], %s2137_s18  ;;  %s3377_s8 = sld [smem:[#allocation20_spill]] }
  0x8b   : > { %2228 = vmatpush3.msra.mxu1 %v673_v3  ;;  %2250 = vmatpush3.msra.mxu0 %v828_v13  ;;  %s3378_s0 = sld [smem:[#allocation31_spill]]  ;;  %s2737_s13 = smov [#allocation12]  }
  0x8c   : > { %2229 = vmatprep.subr.mxu1 %v2729_v0  ;;  %2251 = vmatprep.subr.mxu0 %v2729_v0  ;;  %s3379_s19 = sld [smem:[#allocation25_spill]]  ;;  %s2606_s11 = sshll.u32 %s2737_s13, 4  ;;  %s2607_s11 = int_to_ptr.vmem [resolvable:$false] %s2606_s11 }
  0x8d   : > { %2230 = vmatpush3.msra.mxu1 %v672_v4  ;;  %2252 = vmatpush3.msra.mxu0 %v827_v14 }
  0x8e   : > { %2232 = vmatmul.mubr.msk.f32.vlgmr.msra.gmra.mxu1 %vm676_vm1, %v3032_v5  ;;  %2234 = vmatprep.subr.mxu1 %v2729_v0 }
  0x8f   : > { %2235 = vmatpush3.msra.mxu1 %v753_v6  ;;  %2242 = vmatprep.mubr.msk.f32.mxu1 %vm2730_vm0, %v2729_v0 }
  0x90   : > { %2236 = vmatprep.subr.mxu1 %v2729_v0  ;;  %2254 = vmatmul.mubr.msk.f32.vlgmr.msra.gmra.mxu0 %vm676_vm1, %v671_v10  ;;  %s2172_s30 = sshll.u32 %s3377_s8, 9 }
  0x91   : > { %2237 = vmatpush3.msra.mxu1 %v752_v7  ;;  %2266 = vmatprep.subr.mxu0 %v2729_v0 }
  0x92   : > { %2238 = vmatprep.subr.mxu1 %v2729_v0  ;;  %2268 = vmatprep.mubr.msk.f32.mxu0 %vm2730_vm0, %v2729_v0  ;;  %p3382_p9 = scmp.ne.s32.totalorder %s3379_s19, 0 }
  0x93   : > { %2239 = vmatpush3.msra.mxu1 %v751_v8 }
  0x94   : > { %2240 = vmatprep.subr.mxu1 %v2729_v0 }
  0x95   : > { %2241 = vmatpush3.msra.mxu1 %v750_v9 }
  0x96   : > { %2243 = vmatmul.mubr.msk.f32.vlgmr.msra.gmra.mxu1 %vm676_vm1, %v671_v10  ;;  %2256 = vmatprep.subr.mxu1 %v2729_v0 }
  0x97   : > { %2258 = vmatprep.mubr.msk.f32.mxu1 %vm2730_vm0, %v2729_v0 }
 0x14e   : > { %v746_v15 = vpop.f32.mrf.mxu1 }
 0x150   : > { %v2233_v16 = vpop.f32.mrf.mxu1  ;;  %v3091_v19 = vpop.f32.mrf.mxu0 }
 0x152   : > { %v2255_v20 = vpop.f32.mrf.mxu0 }
 0x156   : > { %v823_v17 = vpop.f32.mrf.mxu1 }
 0x157   : > { %1239 = vrot.lane.b32.xlu1 %v823_v17, %s2731_s27  ;;  %1069 = vrot.lane.b32.xlu0 %v823_v17, %s2732_s14 }
 0x158   : > { %2257 = vmatpush3.xpose.msk.msra.mxu1 %vm903_vm2, %v823_v17  ;;  %v2244_v18 = vpop.f32.mrf.mxu1 }
 0x159   : > { %2261 = vmatprep.subr.mxu1 %v2729_v0 }
 0x15b   : > { %2259 = vmatmul.mubr.msk.f32.vlgmr.msra.gmra.mxu1 %vm903_vm2, %v746_v15  ;;  %1237 = vrot.lane.b32.xlu1 %v746_v15, %s2731_s27 }
 0x15c   : > { %1067 = vrot.lane.b32.xlu0 %v746_v15, %s2732_s14  ;;  %2263 = vmatprep.mubr.msk.f32.mxu1 %vm2730_vm0, %v2729_v0 }
 0x15d   : > { %2262 = vmatpush3.msra.mxu1 %v3091_v19 }
 0x15e   : > { %2271 = vmatprep.subr.mxu1 %v2729_v0 }
 0x15f   : > { %1406 = vrot.lane.b32.xlu1 %v746_v15, %s2733_s26 }
 0x160   : > { %1408 = vrot.lane.b32.xlu0 %v823_v17, %s2733_s26 }
 0x1c9   : > { %v1070_v21 = vpop.permute.xlu0 %1069  ;;  %v1240_v22 = vpop.permute.xlu1 %1239 }
 0x1ca   : > { %2267 = vmatpush3.xpose.msk.msra.mxu0 %vm903_vm2, %v1070_v21 }
 0x1cb   : > { %2276 = vmatprep.subr.mxu0 %v2729_v0 }
 0x1cd   : > { %v1238_v24 = vpop.permute.xlu1 %1237 }
 0x1ce   : > { %v1068_v23 = vpop.permute.xlu0 %1067 }
 0x1cf   : > { %2269 = vmatmul.mubr.msk.f32.vlgmr.msra.gmra.mxu0 %vm903_vm2, %v1068_v23  ;;  %v1595_v23 = vld [vmem:[#allocation8 + $0x18] sm:$0xff] }
 0x1d0   : > { %2277 = vmatpush3.xpose.msk.msra.mxu0 %vm903_vm2, %v1240_v22  ;;  %2278 = vmatprep.mubr.msk.f32.mxu0 %vm2730_vm0, %v2729_v0 }
 0x1d1   : > { %2286 = vmatprep.subr.mxu0 %v2729_v0  ;;  %v1407_v26 = vpop.permute.xlu1 %1406 }
 0x1d2   : > { %v1409_v25 = vpop.permute.xlu0 %1408 }
 0x1d3   : > { %2279 = vmatmul.mubr.msk.f32.vlgmr.msra.gmra.mxu0 %vm903_vm2, %v1238_v24  ;;  %v1594_v24 = vld [vmem:[#allocation8 + $0x10] sm:$0xff] }
 0x1d4   : > { %2287 = vmatpush3.xpose.msk.msra.mxu0 %vm903_vm2, %v1409_v25  ;;  %2288 = vmatprep.mubr.msk.f32.mxu0 %vm2730_vm0, %v2729_v0  ;;  %v1593_v25 = vld [vmem:[#allocation8 + $0x8] sm:$0xff] }
 0x1d5   : > { %2296 = vmatprep.subr.mxu0 %v2729_v0 }
 0x1d7   : > { %2289 = vmatmul.mubr.msk.f32.vlgmr.msra.gmra.mxu0 %vm903_vm2, %v1407_v26  ;;  %v1592_v26 = vld [vmem:[#allocation8] sm:$0xff] }
 0x1d8   : > { %2304 = vmatprep.mubr.msk.f32.mxu0 %vm2730_vm0, %v2729_v0  ;;  %2297 = vmatpush3.msra.mxu0 %v1595_v23 }
 0x1d9   : > { %2298 = vmatprep.subr.mxu0 %v2729_v0 }
 0x1da   : > { %2299 = vmatpush3.msra.mxu0 %v1594_v24 }
 0x1db   : > { %2300 = vmatprep.subr.mxu0 %v2729_v0 }
 0x1dc   : > { %2301 = vmatpush3.msra.mxu0 %v1593_v25 }
 0x1dd   : > { %2302 = vmatprep.subr.mxu0 %v2729_v0 }
 0x1de   : > { %2303 = vmatpush3.msra.mxu0 %v1592_v26 }
 0x1df   : > { %2318 = vmatprep.subr.mxu0 %v2729_v0 }
 0x21b   : > { %v976_v28 = vpop.f32.mrf.mxu1 }
 0x21c   : > { %v980_v29 = vmul.f32 0.35355338, %v976_v28 }
 0x21d   : > { %v2260_v30 = vpop.f32.mrf.mxu1 }
 0x21e   : > { %v981_v31 = vsel %vm902_vm3, -1e+09, %v980_v29 }
 0x21f   : > { %v982_v32 = vsel %vm903_vm2, %v981_v31, -inf }
 0x220   : > { %983 = vmax.xlane.f32.xlu0 %v982_v32 }
 0x28f   : > { %v1141_v33 = vpop.f32.mrf.mxu0 }
 0x290   : > { %v1145_v34 = vmul.f32 0.35355338, %v1141_v33 }
 0x291   : > { %v2270_v35 = vpop.f32.mrf.mxu0 }
 0x292   : > { %v1146_v36 = vsel %vm902_vm3, -1e+09, %v1145_v34 }
 0x293   : > { %v1311_v37 = vpop.f32.mrf.mxu0  ;;  %v1147_v38 = vsel %vm903_vm2, %v1146_v36, -inf }
 0x294   : > { %v1315_v39 = vmul.f32 0.35355338, %v1311_v37  ;;  %1148 = vmax.xlane.f32.xlu1 %v1147_v38 }
 0x295   : > { %v2280_v40 = vpop.f32.mrf.mxu0 }
 0x296   : > { %v1316_v41 = vsel %vm902_vm3, -1e+09, %v1315_v39 }
 0x297   : > { %v1480_v42 = vpop.f32.mrf.mxu0  ;;  %v1317_v43 = vsel %vm903_vm2, %v1316_v41, -inf }
 0x298   : > { %v1484_v44 = vmul.f32 0.35355338, %v1480_v42  ;;  %1318 = vmax.xlane.f32.xlu0 %v1317_v43 }
 0x299   : > { %v2290_v45 = vpop.f32.mrf.mxu0 }
 0x29a   : > { %v1485_v46 = vsel %vm902_vm3, -1e+09, %v1484_v44 }
 0x29b   : > { %v1486_v47 = vsel %vm903_vm2, %v1485_v46, -inf }
 0x29c   : > { %1487 = vmax.xlane.f32.xlu0 %v1486_v47 }
 0x2a5   : > { %1161 = vrot.lane.b32.xlu1 %v3091_v19, %s2732_s14 }
 0x2a9   : > { %v984_v48 = vpop.xlane.xlu0 %983 }
 0x2aa   : > { %v985_v49 = vsub.f32 %v981_v31, %v984_v48  ;;  %v1702_v48 = vld [vmem:[#allocation10 + $0x18] sm:$0xff] }
 0x2ac   : > { %v986_v50 = vmul.f32 1.442695, %v985_v49  ;;  %v1701_v49 = vld [vmem:[#allocation10 + $0x10] sm:$0xff] }
 0x2ae   : > { %2446 = vpow2.f32 %v986_v50  ;;  %v1700_v50 = vld [vmem:[#allocation10 + $0x8] sm:$0xff] }
 0x2bb   : > { %v2447_v51 = vpop.eup %2446 }
 0x2bc   : > { %v988_v52 = vsel %vm903_vm2, %v2447_v51, 0.0 }
 0x2c9   : > { %989 = vadd.xlane.f32.xlu1 %v988_v52  ;;  %v1790_v52 = vld [vmem:[%s3307_s9 + $0x30] sm:$0xff] }
 0x31d   : > { %v1149_v53 = vpop.xlane.xlu1 %1148 }
 0x31e   : > { %v1150_v54 = vsub.f32 %v1146_v36, %v1149_v53  ;;  %v1789_v53 = vld [vmem:[%s3307_s9 + $0x28] sm:$0xff] }
 0x320   : > { %v1151_v55 = vmul.f32 1.442695, %v1150_v54  ;;  %v1788_v54 = vld [vmem:[%s3307_s9 + $0x20] sm:$0xff] }
 0x321   : > { %v1319_v56 = vpop.xlane.xlu0 %1318  ;;  %v1162_v6 = vpop.permute.xlu1 %1161 }
 0x322   : > { %2448 = vpow2.f32 %v1151_v55  ;;  %v1320_v57 = vsub.f32 %v1316_v41, %v1319_v56  ;;  %v1787_v55 = vld [vmem:[%s3307_s9 + $0x18] sm:$0xff] }
 0x324   : > { %v1321_v58 = vmul.f32 1.442695, %v1320_v57 }
 0x325   : > { %v1488_v59 = vpop.xlane.xlu0 %1487 }
 0x326   : > { %2450 = vpow2.f32 %v1321_v58  ;;  %v1489_v60 = vsub.f32 %v1485_v46, %v1488_v59 }
 0x328   : > { %v1490_v61 = vmul.f32 1.442695, %v1489_v60  ;;  %v2157_v60 = vld [vmem:[%s3374_s25] ss:$0 sm:$0xff]  ;;  %s1938_s25 = sshll.u32 %s3131_s1, 4  ;;  %s3224_s25 = int_to_ptr.vmem [resolvable:$true] %s1938_s25 }
 0x329   : > { %s2602_s28 = scalar_lea.vmem %s3224_s25, 512  ;;  %p2609_p10 = scmp.lt.s32.totalorder %s3224_s25, %s2607_s11 }
 0x32a   : > { %2452 = vpow2.f32 %v1490_v61  ;;  %p2603_p3 = scmp.ne.s32.totalorder %s3224_s25, %s2602_s28 }
 0x32c   : > { %p2604_p0 = pnand %p2603_p3, %p3382_p9 }
 0x32e   : > { %p2605_p7 = pneg %p2604_p0 }
 0x32f   : > { %v2449_v62 = vpop.eup %2448 }
 0x330   : > { %v1153_v63 = vsel %vm903_vm2, %v2449_v62, 0.0 }
 0x331   : > { %1154 = vadd.xlane.f32.xlu0 %v1153_v63 }
 0x333   : > { %v2451_v1 = vpop.eup %2450 }
 0x334   : > { %v1323_v2 = vsel %vm903_vm2, %v2451_v1, 0.0 }
 0x335   : > { %1324 = vadd.xlane.f32.xlu1 %v1323_v2  ;;  %v1786_v2 = vld [vmem:[%s3307_s9 + $0x10] sm:$0xff] }
 0x337   : > { %v2453_v3 = vpop.eup %2452 }
 0x338   : > { %v1492_v4 = vsel %vm903_vm2, %v2453_v3, 0.0 }
 0x339   : > { %1493 = vadd.xlane.f32.xlu0 %v1492_v4  ;;  %v1784_v4 = vld [vmem:[%s3307_s9] sm:$0xff] }
 0x346   : > { %1499 = vrot.lane.b32.xlu1 %v3091_v19, %s2733_s26  ;;  %s3375_s26 = sld [smem:[#allocation33_spill]] }
 0x34f   : > { %1330 = vrot.lane.b32.xlu0 %v3091_v19, %s2731_s27 }
 0x352   : > { %v990_v7 = vpop.xlane.xlu1 %989 }
 0x353   : > { %2454 = vrcp.f32 %v990_v7 }
 0x360   : > { %v2455_v8 = vpop.eup %2454 }
 0x361   : > { %v992_v9 = vmul.f32 %v2455_v8, %v2447_v51  ;;  %v1791_v51 = vld [vmem:[%s3307_s9 + $0x38] sm:$0xff] }
 0x363   : > { %993 = vst.msk [vmem:[%s3131_s1] sm:$0xff] %vm903_vm2, %v992_v9  ;;  %2264 = vmatmul.mubr.msk.f32.vlgmr.msra.gmra.mxu1 %vm903_vm2, %v992_v9 }
 0x364   : > { %2272 = vmatpush3.msra.mxu1 %v1162_v6  ;;  %2273 = vmatprep.mubr.msk.f32.mxu1 %vm2730_vm0, %v2729_v0  ;;  %v2159_v6 = vld [vmem:[%s3376_s10] ss:$0 sm:$0xff] }
 0x365   : > { %2281 = vmatprep.subr.mxu1 %v2729_v0 }
 0x3ba   : > { %v1155_v10 = vpop.xlane.xlu0 %1154 }
 0x3bb   : > { %2456 = vrcp.f32 %v1155_v10 }
 0x3be   : > { %v1325_v11 = vpop.xlane.xlu1 %1324 }
 0x3bf   : > { %2458 = vrcp.f32 %v1325_v11  ;;  %v2161_v11 = vld [vmem:[%s3378_s0] ss:$0 sm:$0xff] }
 0x3c2   : > { %v1494_v12 = vpop.xlane.xlu0 %1493  ;;  %v1500_v18 = vpop.permute.xlu1 %1499 }
 0x3c3   : > { %2460 = vrcp.f32 %v1494_v12 }
 0x3c6   : > { %v1331_v15 = vpop.permute.xlu0 %1330 }
 0x3c8   : > { %v2457_v13 = vpop.eup %2456 }
 0x3c9   : > { %v1157_v14 = vmul.f32 %v2457_v13, %v2449_v62  ;;  %v2158_v62 = vld [vmem:[%s3375_s26] ss:$0 sm:$0xff]  ;;  %s3380_s26 = sld [smem:[#allocation37_spill]] }
 0x3cb   : > { %2146 = vst.msk [vmem:[%s3131_s1 + $0x8] sm:$0xff] %vm903_vm2, %v1157_v14  ;;  %2274 = vmatmul.mubr.msk.f32.vlgmr.msra.gmra.mxu1 %vm903_vm2, %v1157_v14 }
 0x3cc   : > { %v2459_v16 = vpop.eup %2458  ;;  %2282 = vmatpush3.msra.mxu1 %v1331_v15  ;;  %2283 = vmatprep.mubr.msk.f32.mxu1 %vm2730_vm0, %v2729_v0 }
 0x3cd   : > { %2291 = vmatprep.subr.mxu1 %v2729_v0  ;;  %v1327_v17 = vmul.f32 %v2459_v16, %v2451_v1 }
 0x3cf   : > { %2150 = vst.msk [vmem:[%s3131_s1 + $0x10] sm:$0xff] %vm903_vm2, %v1327_v17  ;;  %2284 = vmatmul.mubr.msk.f32.vlgmr.msra.gmra.mxu1 %vm903_vm2, %v1327_v17  ;;  %s3381_s18 = smov %s3380_s26 }
 0x3d0   : > { %v2461_v19 = vpop.eup %2460  ;;  %2292 = vmatpush3.msra.mxu1 %v1500_v18  ;;  %2293 = vmatprep.mubr.msk.f32.mxu1 %vm2730_vm0, %v2729_v0 }
 0x3d1   : > { %v1496_v20 = vmul.f32 %v2461_v19, %v2453_v3  ;;  %2307 = vmatprep.subr.mxu1 %v2729_v0  ;;  %v1785_v3 = vld [vmem:[%s3307_s9 + $0x8] sm:$0xff] }
 0x3d3   : > { %2154 = vst.msk [vmem:[%s3131_s1 + $0x18] sm:$0xff] %vm903_vm2, %v1496_v20  ;;  %2294 = vmatmul.mubr.msk.f32.vlgmr.msra.gmra.mxu1 %vm903_vm2, %v1496_v20  ;;  %s2608_s1 = scalar_lea.vmem %s2607_s11, 1024 }
 0x3d4   : > { %2315 = vmatprep.mubr.msk.f32.mxu1 %vm2730_vm0, %v2729_v0  ;;  %2308 = vmatpush3.msra.mxu1 %v1702_v48  ;;  %p2610_p13 = scmp.lt.s32.totalorder %s2608_s1, %s2602_s28 }
 0x3d5   : > { %2309 = vmatprep.subr.mxu1 %v2729_v0 }
 0x3d6   : > { %2310 = vmatpush3.msra.mxu1 %v1701_v49  ;;  %p2611_p5 = por %p2610_p13, %p2609_p10 }
 0x3d7   : > { %2311 = vmatprep.subr.mxu1 %v2729_v0 }
 0x3d8   : > { %2312 = vmatpush3.msra.mxu1 %v1700_v50  ;;  %p2612_p1 = pnand %p2611_p5, %p2605_p7 }
 0x3d9   : > { %2313 = vmatprep.subr.mxu1 %v2729_v0 }
 0x423   : > { %v1063_v21 = vpop.f32.mrf.mxu1 }
 0x425   : > { %v2265_v22 = vpop.f32.mrf.mxu1 }
 0x48b   : > { %v1233_v27 = vpop.f32.mrf.mxu1 }
 0x48c   : > { %1576 = vrot.lane.b32.xlu1 %v1233_v27, %s2734_s12 }
 0x48d   : > { %v2275_v28 = vpop.f32.mrf.mxu1 }
 0x48f   : > { %v1402_v29 = vpop.f32.mrf.mxu1 }
 0x490   : > { %1580 = vrot.lane.b32.xlu0 %v1402_v29, %s2735_s20  ;;  %s3222_s20 = scalar_lea.hbm %s3380_s26, %s2172_s30 }
 0x491   : > { %v2285_v30 = vpop.f32.mrf.mxu1 }
 0x493   : > { %v1571_v31 = vpop.f32.mrf.mxu1 }
 0x494   : > { %1584 = vrot.lane.b32.xlu1 %v1571_v31, %s2736_s16  ;;  %s1910_s16 = scalar_lea.sflag [#allocation13], %s2990_s15 }
 0x495   : > { %v2295_v32 = vpop.f32.mrf.mxu1 }
 0x4fe   : > { %v1577_v33 = vpop.permute.xlu1 %1576 }
 0x4ff   : > { %v1587_v35 = vsel %vm903_vm2, %v1063_v21, %v1577_v33 }
 0x502   : > { %v1581_v34 = vpop.permute.xlu0 %1580 }
 0x503   : > { %v1589_v36 = vsel %vm1588_vm4, %v1587_v35, %v1581_v34 }
 0x506   : > { %v1585_v37 = vpop.permute.xlu1 %1584 }
 0x507   : > { %v1591_v38 = vsel %vm1590_vm5, %v1589_v36, %v1585_v37 }
 0x508   : > { %2305 = vmatmul.mubr.msk.f32.vlgmr.msra.gmra.mxu0 %vm676_vm1, %v1591_v38 }
 0x509   : > { %2334 = vmatprep.mubr.msk.f32.mxu0 %vm2730_vm0, %v2729_v0  ;;  %2319 = vmatpush3.msra.mxu0 %v1791_v51 }
 0x50a   : > { %2320 = vmatprep.subr.mxu0 %v2729_v0 }
 0x50b   : > { %2321 = vmatpush3.msra.mxu0 %v1790_v52 }
 0x50c   : > { %2322 = vmatprep.subr.mxu0 %v2729_v0 }
 0x50d   : > { %2323 = vmatpush3.msra.mxu0 %v1789_v53 }
 0x50e   : > { %2324 = vmatprep.subr.mxu0 %v2729_v0 }
 0x50f   : > { %2325 = vmatpush3.msra.mxu0 %v1788_v54 }
 0x510   : > { %2326 = vmatprep.subr.mxu0 %v2729_v0 }
 0x511   : > { %2327 = vmatpush3.msra.mxu0 %v1787_v55 }
 0x512   : > { %2328 = vmatprep.subr.mxu0 %v2729_v0 }
 0x513   : > { %2329 = vmatpush3.msra.mxu0 %v1786_v2 }
 0x514   : > { %2330 = vmatprep.subr.mxu0 %v2729_v0 }
 0x515   : > { %2331 = vmatpush3.msra.mxu0 %v1785_v3 }
 0x516   : > { %2332 = vmatprep.subr.mxu0 %v2729_v0 }
 0x517   : > { %2333 = vmatpush3.msra.mxu0 %v1784_v4 }
 0x5c8   : > { %v1665_v39 = vpop.f32.mrf.mxu0 }
 0x5c9   : > { %v1666_v40 = vadd.f32 %v1665_v39, %v3032_v5  ;;  %v1699_v5 = vld [vmem:[#allocation10] sm:$0xff] }
 0x5ca   : > { %v2306_v41 = vpop.f32.mrf.mxu0  ;;  %2314 = vmatpush3.msra.mxu1 %v1699_v5 }
 0x5cb   : > { %v1671_v42 = vsel %vm676_vm1, %v1666_v40, 0.0 }
 0x5cc   : > { %1672 = vadd.xlane.f32.xlu0 %v1671_v42 }
 0x655   : > { %v1673_v43 = vpop.xlane.xlu0 %1672 }
 0x656   : > { %v1675_v44 = vmul.f32 0.03125, %v1673_v43 }
 0x658   : > { %v1676_v45 = vsub.f32 %v1666_v40, %v1675_v44 }
 0x65a   : > { %v1677_v46 = vmul.f32 %v1676_v45, %v1676_v45 }
 0x65c   : > { %v1678_v47 = vsel %vm676_vm1, %v1677_v46, 0.0 }
 0x65d   : > { %1679 = vadd.xlane.f32.xlu1 %v1678_v47 }
 0x6e6   : > { %v1680_v56 = vpop.xlane.xlu1 %1679 }
 0x6e7   : > { %v1681_v57 = vmul.f32 0.03125, %v1680_v56 }
 0x6e9   : > { %v1682_v58 = vadd.f32 1e-05, %v1681_v57 }
 0x6eb   : > { %2462 = vrsqrt.f32 %v1682_v58 }
 0x6f8   : > { %v2463_v59 = vpop.eup %2462 }
 0x6f9   : > { %v1684_v61 = vmul.f32 %v2463_v59, %v1676_v45 }
 0x6fb   : > { %v1691_v63 = vmul.f32 %v2157_v60, %v1684_v61 }
 0x6fd   : > { %v1698_v1 = vadd.f32 %v2158_v62, %v1691_v63 }
 0x6ff   : > { %2316 = vmatmul.mubr.msk.f32.vlgmr.msra.gmra.mxu1 %vm676_vm1, %v1698_v1 }
 0x7bf   : > { %v1779_v7 = vpop.f32.mrf.mxu1 }
 0x7c0   : > { %v1780_v8 = vadd.f32 %v2159_v6, %v1779_v7 }
 0x7c1   : > { %v2317_v9 = vpop.f32.mrf.mxu1 }
 0x7c2   : > { %v1783_v10 = vmax.f32 %v1780_v8, 0.0 }
 0x7c4   : > { %2335 = vmatmul.mubr.msk.f32.vlgmr.msra.gmra.mxu0 %vm1799_vm6, %v1783_v10 }
 0x884   : > { %v1869_v12 = vpop.f32.mrf.mxu0 }
 0x885   : > { %v1870_v0 = vadd.f32 %v2161_v11, %v1869_v12 }
 0x886   : > { %v2336_v13 = vpop.f32.mrf.mxu0 }
 0x887   : > { %v1873_v14 = vadd.f32 %v1870_v0, %v1698_v1 }
 0x889   : > { %v1876_v15 = vsel %vm676_vm1, %v1873_v14, 0.0 }
 0x88a   : > { %1877 = vadd.xlane.f32.xlu0 %v1876_v15 }
 0x913   : > { %v1878_v16 = vpop.xlane.xlu0 %1877 }
 0x914   : > { %v1879_v17 = vmul.f32 0.03125, %v1878_v16 }
 0x916   : > { %v1880_v18 = vsub.f32 %v1873_v14, %v1879_v17 }
 0x918   : > { %v1881_v19 = vmul.f32 %v1880_v18, %v1880_v18 }
 0x91a   : > { %v1882_v20 = vsel %vm676_vm1, %v1881_v19, 0.0 }
 0x91b   : > { %1883 = vadd.xlane.f32.xlu0 %v1882_v20 }
 0x91c   : > { %2615 = shalt.err (!%p2612_p1)
}
 0x91d   : > { %s2616_s21 = scalar_lea.hbm %s3222_s20, 512  ;;  %s2620_s24 = scalar_lea.hbm %s3381_s18, 1024 }
 0x91e   : > { %p2617_p4 = scmp.ne.s32.totalorder %s3222_s20, %s2616_s21  ;;  %p2621_p11 = scmp.lt.s32.totalorder %s3222_s20, %s3381_s18 }
 0x91f   : > { %p2622_p2 = scmp.lt.s32.totalorder %s2620_s24, %s2616_s21 }
 0x920   : > { %p2618_p6 = pnand %p2617_p4, %p3382_p9 }
 0x921   : > { %p2623_p12 = por %p2622_p2, %p2621_p11 }
 0x922   : > { %p2619_p8 = pneg %p2618_p6 }
 0x924   : > { %p2624_p3 = pnand %p2623_p12, %p2619_p8 }
 0x926   : > { %2627 = shalt.err (!%p2624_p3)
}
 0x927   : > { %s2738_s30 = smov 128   ;;  %s3383_s26 = sld [smem:[#allocation34_spill]] }
 0x928   : > { %2352 = dma.vmem_to_hbm [thread:$0]  (%p3382_p9), %s3224_s25, 512, %s3222_s20, %s1910_s16, %s2738_s30, %s2738_s30, %s2734_s12  }
 0x929   : > { %s3384_s11 = sld [smem:[#allocation35_spill]]  ;;  %s2167_s1 = sshll.u32 %s3377_s8, 7 }
 0x92a   : > { %s662_s21 = scalar_lea.vmem [#allocation11], %s2993_s6  ;;  %s3385_s20 = sld [smem:[#allocation36_spill]] }
 0x92b   : > { %s1924_s17 = sshll.u32 %s662_s21, 4  ;;  %s1905_s10 = scalar_lea.sflag [#allocation4], %s2990_s15  ;;  %s1925_s17 = int_to_ptr.vmem [resolvable:$true] %s1924_s17 }
 0x92c   : > { %s2628_s24 = scalar_lea.vmem %s1925_s17, 128  ;;  %s2739_s29 = smov [#allocation11]  }
 0x92d   : > { %v2163_v25 = vld [vmem:[%s3383_s26] ss:$0 sm:$0xff]  ;;  %p2629_p0 = scmp.ne.s32.totalorder %s1925_s17, %s2628_s24  ;;  %s2632_s0 = sshll.u32 %s2739_s29, 4  ;;  %s2633_s0 = int_to_ptr.vmem [resolvable:$false] %s2632_s0 }
 0x92e   : > { %s2634_s6 = scalar_lea.vmem %s2633_s0, 256  ;;  %p2635_p13 = scmp.lt.s32.totalorder %s1925_s17, %s2633_s0 }
 0x92f   : > { %v2164_v27 = vld [vmem:[%s3384_s11] ss:$0 sm:$0xff]  ;;  %p2630_p7 = pnand %p2629_p0, %p3382_p9  ;;  %p2636_p5 = scmp.lt.s32.totalorder %s2634_s6, %s2628_s24 }
 0x930   : > { %s1922_s16 = scalar_lea.hbm %s3385_s20, %s2167_s1 }
 0x931   : > { %p2631_p10 = pneg %p2630_p7  ;;  %p2637_p1 = por %p2636_p5, %p2635_p13 }
 0x933   : > { %p2638_p4 = pnand %p2637_p1, %p2631_p10 }
 0x9a4   : > { %v1884_v21 = vpop.xlane.xlu0 %1883 }
 0x9a5   : > { %v1885_v22 = vmul.f32 0.03125, %v1884_v21 }
 0x9a7   : > { %v1886_v23 = vadd.f32 1e-05, %v1885_v22 }
 0x9a9   : > { %2464 = vrsqrt.f32 %v1886_v23 }
 0x9b6   : > { %v2465_v24 = vpop.eup %2464 }
 0x9b7   : > { %v1888_v26 = vmul.f32 %v2465_v24, %v1880_v18 }
 0x9b9   : > { %v1895_v28 = vmul.f32 %v2163_v25, %v1888_v26 }
 0x9bb   : > { %v1902_v29 = vadd.f32 %v2164_v27, %v1895_v28 }
 0x9bd   : > { %1903 = vst.msk [vmem:[%s662_s21] sm:$0xff] %vm676_vm1, %v1902_v29 }
 0x9be   : > { %2641 = shalt.err (!%p2638_p4)
}
 0x9bf   : > { %s2642_s8 = scalar_lea.hbm %s1922_s16, 128  ;;  %s2646_s27 = scalar_lea.hbm %s3385_s20, 256 }
 0x9c0   : > { %p2643_p6 = scmp.ne.s32.totalorder %s1922_s16, %s2642_s8  ;;  %p2647_p2 = scmp.lt.s32.totalorder %s1922_s16, %s3385_s20 }
 0x9c1   : > { %p2648_p12 = scmp.lt.s32.totalorder %s2646_s27, %s2642_s8 }
 0x9c2   : > { %p2644_p8 = pnand %p2643_p6, %p3382_p9 }
 0x9c3   : > { %p2649_p3 = por %p2648_p12, %p2647_p2 }
 0x9c4   : > { %p2645_p11 = pneg %p2644_p8 }
 0x9c6   : > { %p2650_p0 = pnand %p2649_p3, %p2645_p11 }
 0x9c8   : > { %2653 = shalt.err (!%p2650_p0)
}
 0x9c9   : > { %2351 = dma.vmem_to_hbm [thread:$0]  (%p3382_p9), %s1925_s17, 128, %s1922_s16, %s1905_s10  }
 0x9ca PF: > { %s3386_s28 = sld [smem:[#allocation19_spill]] }
 0x9cb   : > { %s3387_s13 = sld [smem:[#allocation23_spill]] }
 0x9cc   : > { %s3388_s11 = sld [smem:[#allocation22_spill]] }
 0x9d0   : > { %s1953_s1 = sand.u32 1, %s3386_s28  }
 0x9d1   : > { %p3389_p7 = scmp.ne.s32.totalorder %s3387_s13, 0  ;;  %s1954_s21 = scalar_lea.sflag [#allocation4], %s1953_s1 }
 0x9d2   : > { %p3390_p10 = scmp.ge.s32.totalorder %s3388_s11, 2 }
 0x9d4   : > { %p2373_p13 = pnand %p3390_p10, %p3389_p7 }
 0x9d6   : > { %p2374_p5 = pneg %p2373_p13 }
 0x9d8   : > { %2691 = dma.done.wait (%p2374_p5), %s1954_s21, 128  }
 0x9d9   : > { %2693 = vsyncadd (%p2374_p5), %s1954_s21, 4294967168  ;;  %s1963_s12 = scalar_lea.sflag [#allocation13], %s1953_s1 }
 0x9da   : > { %2695 = dma.done.wait (%p2374_p5), %s1963_s12, 512  }
 0x9db   : > { %2697 = vsyncadd (%p2374_p5), %s1963_s12, 4294966784  ;;  %s40_s26 = sadd.s32 1, %s3388_s11   ;;  %s3391_s19 = sld [smem:[#allocation26_spill]] }
 0x9dc   : > { %p37_p1 = scmp.ge.s32.totalorder %s40_s26, 4   ;;  %s3392_s24 = sld [smem:[#allocation21_spill]] }
 0x9dd   : > { %s3393_s25 = sld [smem:[#allocation24_spill]]  ;;  %s3394_s21 = smov %s2704_s22 }
 0x9de   : > { %s3395_s22 = smov %s2708_s23  ;;  %39 = sbr.rel (!%p37_p1) target bundleno = 23 (0x17), region = 177 }
 0x9e1   : > { %s3396_s23 = smov %s3391_s19 }
 0x9e3   :  { %1968 = vsyncpa [#allocation3], 1 }
 0x9e4   :  { %1970 = vsyncpa [#allocation3 + $0x1], 1 }
 0x9e5   :  { %1971 = vsyncpa [#allocation6], 1 }
 0x9e6   :  { %1973 = vsyncpa [#allocation6 + $0x1], 1 }
 0x9e7   :  { %1974 = vsyncpa [#allocation9], 1 }
 0x9e8   :  { %1975 = vsyncpa [#allocation4], 1 }
 0x9e9   :  { %1977 = vsyncpa [#allocation4 + $0x1], 1 }
 0x9ea   :  { %1978 = vsyncpa [#allocation13], 1 }
 0x9eb   :  { %1980 = vsyncpa [#allocation13 + $0x1], 1 }

// kernel: tpu_custom_call.1
= control target key start
LH: loop header
LB: loop body
LE: loop exit
PB: predicated region body
PF: predicated region fallthrough
CT: control target
= control target key end

     0   :  { %s3298_s0 = inlined_call_operand.hbm [shape: f32[2,8,32], index: 0, kind: input, shape index: {}]   ;;  %s3299_s1 = inlined_call_operand.hbm [shape: f32[2,8,32], index: 1, kind: input, shape index: {}]   ;;  %s3300_s2 = inlined_call_operand.hbm [shape: f32[2,8,8], index: 2, kind: input, shape index: {}]   ;;  %s3301_s3 = inlined_call_operand.vmem [shape: f32[32,32], index: 3, kind: input, shape index: {}]   ;;  %s3302_s4 = inlined_call_operand.vmem [shape: f32[32,32], index: 4, kind: input, shape index: {}]   ;;  %s3303_s5 = inlined_call_operand.vmem [shape: f32[32,32], index: 5, kind: input, shape index: {}]   ;;  %s3304_s6 = inlined_call_operand.hbm [shape: f32[32,32], index: 6, kind: input, shape index: {}]   ;;  %s3305_s7 = inlined_call_operand.hbm [shape: f32[32,64], index: 7, kind: input, shape index: {}]   ;;  %s3306_s8 = inlined_call_operand.vmem [shape: f32[1,64], index: 8, kind: input, shape index: {}]   ;;  %s3307_s9 = inlined_call_operand.vmem [shape: f32[64,32], index: 9, kind: input, shape index: {}]   ;;  %s3308_s10 = inlined_call_operand.vmem [shape: f32[1,32], index: 10, kind: input, shape index: {}]   ;;  %s3309_s11 = inlined_call_operand.vmem [shape: f32[1,32], index: 11, kind: input, shape index: {}]   ;;  %s3310_s12 = inlined_call_operand.vmem [shape: f32[1,32], index: 12, kind: input, shape index: {}]   ;;  %s3311_s13 = inlined_call_operand.vmem [shape: f32[1,32], index: 13, kind: input, shape index: {}]   ;;  %s3312_s14 = inlined_call_operand.vmem [shape: f32[1,32], index: 14, kind: input, shape index: {}]   ;;  %s3313_s15 = inlined_call_operand.hbm [shape: f32[2,8,32], index: 15, kind: output, shape index: {0}]   ;;  %s3314_s16 = inlined_call_operand.hbm [shape: f32[2,4,8,8], index: 16, kind: output, shape index: {1}]  }
   0x1   :  { %3335 = sst [smem:[#allocation27_spill]] %s3298_s0 }
   0x2   :  { %3336 = sst [smem:[#allocation28_spill]] %s3299_s1 }
   0x3   :  { %3337 = sst [smem:[#allocation29_spill]] %s3304_s6 }
   0x4   :  { %3338 = sst [smem:[#allocation30_spill]] %s3306_s8 }
   0x5   :  { %3339 = sst [smem:[#allocation31_spill]] %s3308_s10 }
   0x6   :  { %3340 = sst [smem:[#allocation32_spill]] %s3309_s11 }
   0x7   :  { %3341 = sst [smem:[#allocation33_spill]] %s3310_s12 }
   0x8   :  { %3342 = sst [smem:[#allocation34_spill]] %s3311_s13 }
   0x9   :  { %3343 = sst [smem:[#allocation35_spill]] %s3312_s14 }
   0xa   :  { %3344 = sst [smem:[#allocation36_spill]] %s3313_s15 }
   0xb   :  { %3345 = sst [smem:[#allocation37_spill]] %s3314_s16 }
   0xc   :  { %22 = vsyncpa [#allocation3], 0 }
   0xd   :  { %24 = vsyncpa [#allocation3 + $0x1], 0 }
   0xe   :  { %25 = vsyncpa [#allocation6], 0 }
   0xf   :  { %27 = vsyncpa [#allocation6 + $0x1], 0 }
  0x10   :  { %28 = vsyncpa [#allocation9], 0 }
  0x11   :  { %29 = vsyncpa [#allocation4], 0 }
  0x12   :  { %31 = vsyncpa [#allocation4 + $0x1], 0 }
  0x13   :  { %32 = vsyncpa [#allocation13], 0 }
  0x14   :  { %34 = vsyncpa [#allocation13 + $0x1], 0  ;;  %s2825_s21 = smov 0   ;;  %s2827_s22 = smov 0  }
  0x15   :  { %s2829_s23 = smov 0   ;;  %s2831_s24 = smov 0  }
  0x16   :  { %s2833_s25 = smov 0   ;;  %s2835_s26 = smov 0  }
  0x17 LB: > { %3346 = sst [smem:[#allocation19_spill]] %s2700_s21  ;;  %s2856_s27 = sadd.s32 4294967295, %s2720_s26   ;;  %s2720_s26 = sphi %s2835_s26, %s40_s26   ;;  %s2716_s25 = sphi %s2833_s25, %s3393_s25   ;;  %s2712_s24 = sphi %s2831_s24, %s3392_s24   ;;  %s2708_s23 = sphi %s2829_s23, %s3396_s23   ;;  %s2704_s22 = sphi %s2827_s22, %s3395_s22   ;;  %s2700_s21 = sphi %s2825_s21, %s3394_s21  }
  0x18   : > { %3347 = sst [smem:[#allocation20_spill]] %s2712_s24  ;;  %s2119_s28 = sadd.s32 4294967294, %s2720_s26  }
  0x19   : > { %3348 = sst [smem:[#allocation21_spill]] %s2716_s25  ;;  %p74_p0 = scmp.ne.s32.totalorder %s2704_s22, %s2700_s21 }
  0x1a   : > { %3349 = sst [smem:[#allocation22_spill]] %s2720_s26  ;;  %p3329_p1 = scmp.eq.s32.totalorder %s2856_s27, 0 }
  0x1b   : > { %p412_p3 = scmp.eq.s32.totalorder %s2119_s28, 1  ;;  %p2120_p5 = scmp.ge.s32.totalorder %s2720_s26, 1 }
  0x1c   : > { %p2865_p4 = por %p3329_p1, %p74_p0  ;;  %p447_p7 = scmp.lt.s32.totalorder %s2720_s26, 3 }
  0x1d   : > { %p2870_p6 = por %p412_p3, %p74_p0  ;;  %s2722_s17 = smov [#allocation8]  }
  0x1e   : > { %s3350_s29 = scalar_select %p2865_p4, 1, 0 }
  0x1f   : > { %s3351_s30 = scalar_select %p2870_p6, 1, 0 }
  0x20   : > { %p2875_p8 = pnand %p2120_p5, %p447_p7  ;;  %s468_s18 = sshll.u32 %s2722_s17, 4  ;;  %s469_s18 = int_to_ptr.vmem [resolvable:$true] %s468_s18 }
  0x21   : > { %3352 = sst [smem:[#allocation23_spill]] %s3351_s30  ;;  %s52_s20 = sadd.s32 1, %s2716_s25 }
  0x22   : > { %s3353_s0 = scalar_select %p2875_p8, 1, 0 }
  0x23   : > { %p2355_p9 = pneg %p2875_p8  ;;  %s2477_s28 = scalar_lea.vmem %s469_s18, 512 }
  0x24   : > { %p2478_p13 = scmp.ne.s32.totalorder %s469_s18, %s2477_s28  ;;  %p2485_p5 = scmp.lt.s32.totalorder %s469_s18, %s469_s18 }
  0x25   : > { %p2884_p11 = pnand %p2355_p9, %p3329_p1  ;;  %p2486_p7 = scmp.lt.s32.totalorder %s2477_s28, %s2477_s28 }
  0x27   : > { %p3330_p12 = pneg %p2884_p11  ;;  %p2487_p2 = por %p2486_p7, %p2485_p5 }
  0x29   : > { %p2480_p0 = pnand %p2478_p13, %p3330_p12 }
  0x2b   : > { %p2481_p3 = pneg %p2480_p0 }
  0x2d   : > { %p2488_p10 = pnand %p2487_p2, %p2481_p3 }
  0x2f   : > { %2491 = shalt.err (!%p2488_p10)
}
  0x30   : > { %s3319_s17 = smov 128   ;;  %s3320_s30 = smov 8  }
  0x31   : > { %s3355_s6 = sld [smem:[#allocation29_spill]]  ;;  %p54_p2 = scmp.ge.s32.totalorder %s52_s20, 2 }
  0x32   : > { %s61_s15 = sadd.s32 1, %s2708_s23  ;;  %p68_p9 = scmp.ne.s32.totalorder %s2708_s23, %s2704_s22 }
  0x33   : > { %p69_p10 = scmp.eq.s32.totalorder %s2720_s26, 0  ;;  %s3398_s20 = smov (%p54_p2, %s52_s20), 0 }
  0x34   : > { %3356 = sst [smem:[#allocation24_spill]] %s3398_s20  ;;  %p3357_p0 = scmp.eq.s32.totalorder %s2856_s27, 1 }
  0x35   : > { %p70_p13 = por %p69_p10, %p68_p9  ;;  %s56_s13 = ssub.s32 %s2716_s25, %s3398_s20 }
  0x36   : > { %p2910_p3 = por %p3357_p0, %p68_p9  ;;  %p2381_p5 = scmp.lt.s32.totalorder %s2720_s26, 2 }
  0x37   : > { %2358 = dma.hbm_to_vmem [thread:$0]  (!%p2884_p11), %s3355_s6, 512, %s469_s18, [#allocation9], %s3319_s17, %s3319_s17, %s3320_s30  }
  0x38   : > { %s3358_s14 = scalar_select %p2910_p3, 1, 0 }
  0x39   : > { %p59_p7 = scmp.eq.s32.totalorder %s56_s13, 0  ;;  %s3324_s16 = sand.u32 1, %s2708_s23  }
  0x3a   : > { %3359 = sst [smem:[#allocation25_spill]] %s3358_s14  ;;  %s2920_s21 = sshll.u32 %s3324_s16, 3 }
  0x3b   : > { %s2923_s18 = sshll.u32 %s2716_s25, 7  ;;  %p2928_p2 = pnand %p2381_p5, %p70_p13 }
  0x3c   : > { %s2926_s28 = scalar_select %p59_p7, %s2708_s23, %s61_s15  }
  0x3d   : > { %s535_s30 = sand.u32 1, %s2720_s26   ;;  %s3362_s1 = sld [smem:[#allocation28_spill]] }
  0x3e   : > { %3360 = sst [smem:[#allocation26_spill]] %s2926_s28  ;;  %s539_s14 = scalar_lea.vmem [#allocation5], %s2920_s21 }
  0x3f   : > { %s546_s16 = sshll.u32 %s539_s14, 4  ;;  %s2725_s10 = smov [#allocation10]   ;;  %s547_s16 = int_to_ptr.vmem [resolvable:$true] %s546_s16 }
  0x40   : > { %s481_s25 = sshll.u32 %s2725_s10, 4  ;;  %s2938_s24 = scalar_lea.sflag [#allocation6], %s535_s30  ;;  %s482_s25 = int_to_ptr.vmem [resolvable:$true] %s481_s25 }
  0x41   : > { %p3331_p9 = pneg %p2928_p2  ;;  %s2505_s15 = scalar_lea.vmem %s547_s16, 128 }
  0x42   : > { %p2506_p10 = scmp.ne.s32.totalorder %s547_s16, %s2505_s15  ;;  %s2726_s28 = smov [#allocation5]  }
  0x43   : > { %s544_s13 = scalar_lea.hbm %s3362_s1, %s2923_s18  ;;  %s2510_s26 = sshll.u32 %s2726_s28, 4  ;;  %s2511_s26 = int_to_ptr.vmem [resolvable:$false] %s2510_s26 }
  0x44   : > { %p2508_p13 = pnand %p2506_p10, %p3331_p9  ;;  %s2512_s6 = scalar_lea.vmem %s2511_s26, 256 }
  0x45   : > { %p2513_p5 = scmp.lt.s32.totalorder %s547_s16, %s2511_s26  ;;  %p2514_p7 = scmp.lt.s32.totalorder %s2512_s6, %s2505_s15 }
  0x46   : > { %p2509_p0 = pneg %p2508_p13 }
  0x47   : > { %p2515_p1 = por %p2514_p7, %p2513_p5 }
  0x49   : > { %p2516_p12 = pnand %p2515_p1, %p2509_p0 }
  0x4b   : > { %2519 = shalt.err (!%p2516_p12)
}
  0x4c   : > { %2368 = dma.hbm_to_vmem [thread:$0]  (!%p2928_p2), %s544_s13, 128, %s547_s16, %s2938_s24  }
  0x4d   : > { %s2531_s10 = scalar_lea.vmem %s482_s25, 512  ;;  %p3363_p10 = pneg %p2884_p11 }
  0x4e   : > { %p2532_p6 = scmp.ne.s32.totalorder %s482_s25, %s2531_s10  ;;  %p2539_p3 = scmp.lt.s32.totalorder %s482_s25, %s482_s25 }
  0x4f   : > { %p2540_p4 = scmp.lt.s32.totalorder %s2531_s10, %s2531_s10 }
  0x50   : > { %p2534_p13 = pnand %p2532_p6, %p3363_p10 }
  0x51   : > { %p2541_p8 = por %p2540_p4, %p2539_p3 }
  0x52   : > { %p2535_p9 = pneg %p2534_p13 }
  0x54   : > { %p2542_p5 = pnand %p2541_p8, %p2535_p9 }
  0x56   : > { %2545 = shalt.err (!%p2542_p5)
}
  0x57   : > { %s3364_s14 = smov 8   ;;  %s3365_s26 = smov 128  }
  0x58   : > { %2361 = dma.hbm_to_vmem [thread:$0]  (!%p2884_p11), %s3305_s7, 512, %s482_s25, [#allocation9], %s3365_s26, %s3365_s26, %s3364_s14  }
  0x59   : > { %s3366_s13 = sld [smem:[#allocation27_spill]]  ;;  %s520_s6 = scalar_lea.vmem [#allocation2], %s2920_s21 }
  0x5a   : > { %s528_s10 = sshll.u32 %s520_s6, 4  ;;  %s563_s8 = scalar_lea.hbm %s3300_s2, %s2923_s18  ;;  %s529_s10 = int_to_ptr.vmem [resolvable:$true] %s528_s10 }
  0x5b   : > { %s3367_s12 = sand.u32 1, %s2708_s23   ;;  %s2559_s30 = scalar_lea.vmem %s529_s10, 128 }
  0x5c   : > { %s517_s11 = scalar_lea.sflag [#allocation3], %s3367_s12  ;;  %p2560_p1 = scmp.ne.s32.totalorder %s529_s10, %s2559_s30 }
  0x5d   : > { %p3368_p4 = pneg %p2928_p2  ;;  %s2727_s25 = smov [#allocation2]  }
  0x5e   : > { %s2564_s14 = sshll.u32 %s2727_s25, 4  ;;  %s2565_s14 = int_to_ptr.vmem [resolvable:$false] %s2564_s14 }
  0x5f   : > { %s526_s15 = scalar_lea.hbm %s3366_s13, %s2923_s18  ;;  %p2562_p6 = pnand %p2560_p1, %p3368_p4 }
  0x60   : > { %s2566_s26 = scalar_lea.vmem %s2565_s14, 256  ;;  %p2567_p11 = scmp.lt.s32.totalorder %s529_s10, %s2565_s14 }
  0x61   : > { %p2563_p8 = pneg %p2562_p6  ;;  %p2568_p12 = scmp.lt.s32.totalorder %s2566_s26, %s2559_s30 }
  0x63   : > { %p2569_p3 = por %p2568_p12, %p2567_p11 }
  0x65   : > { %p2570_p9 = pnand %p2569_p3, %p2563_p8 }
  0x67   : > { %2573 = shalt.err (!%p2570_p9)
}
  0x68   : > { %2365 = dma.hbm_to_vmem [thread:$0]  (!%p2928_p2), %s526_s15, 128, %s529_s10, %s517_s11  }
  0x69   : > { %s557_s1 = scalar_lea.vmem [#allocation7], %s2920_s21  ;;  %p3369_p7 = pmov %p3368_p4 }
  0x6a   : > { %s565_s12 = sshll.u32 %s557_s1, 4  ;;  %s2728_s16 = smov [#allocation7]   ;;  %s566_s12 = int_to_ptr.vmem [resolvable:$true] %s565_s12 }
  0x6b   : > { %s2587_s20 = scalar_lea.vmem %s566_s12, 128  ;;  %s2592_s28 = sshll.u32 %s2728_s16, 4  ;;  %s2593_s28 = int_to_ptr.vmem [resolvable:$false] %s2592_s28 }
  0x6c   : > { %p2588_p0 = scmp.ne.s32.totalorder %s566_s12, %s2587_s20  ;;  %s2594_s13 = scalar_lea.vmem %s2593_s28, 256 }
  0x6d   : > { %p2595_p5 = scmp.lt.s32.totalorder %s566_s12, %s2593_s28  ;;  %p2596_p1 = scmp.lt.s32.totalorder %s2594_s13, %s2587_s20 }
  0x6e   : > { %p2590_p10 = pnand %p2588_p0, %p3369_p7 }
  0x6f   : > { %p2597_p4 = por %p2596_p1, %p2595_p5 }
  0x70   : > { %p2591_p13 = pneg %p2590_p10 }
  0x72   : > { %p2598_p6 = pnand %p2597_p4, %p2591_p13 }
  0x74   : > { %2601 = shalt.err (!%p2598_p6)
}
  0x75   : > { %2371 = dma.hbm_to_vmem [thread:$0]  (!%p2928_p2), %s563_s8, 128, %s566_s12, %s2938_s24  }
  0x76   : > { %p3370_p8 = scmp.ne.s32.totalorder %s3353_s0, 0 }
  0x77   : > { %s2990_s15 = sand.u32 (!%p3370_p8), 1, %s2704_s22   ;;  %p3371_p11 = scmp.ne.s32.totalorder (!%p3370_p8), %s3350_s29, 0 }
  0x78   : > { %574 = sbr.rel (%p3370_p8) target bundleno = 2506 (0x9ca), region = 80  ;;  %s2993_s6 = sshll.u32 (!%p3370_p8), %s2990_s15, 3 }
  0x79   : > { %s577_s17 = scalar_lea.sflag (!%p3370_p8), [#allocation3], %s2990_s15  ;;  %s580_s10 = scalar_lea.vmem (!%p3370_p8), [#allocation2], %s2993_s6 }
  0x7d   : > { %2679 = dma.done.wait (%p3371_p11), %s577_s17, 128  }
  0x7e   : > { %2681 = vsyncadd (%p3371_p11), %s577_s17, 4294967168  ;;  %s585_s8 = sand.u32 1, %s2856_s27   ;;  %s589_s0 = scalar_lea.vmem [#allocation5], %s2993_s6 }
  0x7f   : > { %s586_s24 = scalar_lea.sflag [#allocation6], %s585_s8 }
  0x80   : > { %2683 = dma.done.wait (%p3371_p11), %s586_s24, 256  }
  0x81   : > { %2685 = vsyncadd (%p3371_p11), %s586_s24, 4294967040  ;;  %s598_s18 = scalar_lea.vmem [#allocation7], %s2993_s6  ;;  %p3372_p2 = scmp.eq.s32.totalorder %s2856_s27, 0 }
  0x83   : > { %2687 = dma.done.wait (%p3372_p2), [#allocation9], 1024   ;;  %p3373_p12 = pmov %p3372_p2 }
  0x84   : > { %v2729_v0 = vmov 0.0   ;;  %vm2730_vm0 = vmmov 0   ;;  %v675_v1 = vld [vmem:[%s3301_s3 + $0x18] sm:$0xff]  ;;  %v674_v2 = vld [vmem:[%s3301_s3 + $0x10] sm:$0xff]  ;;  %v673_v3 = vld [vmem:[%s3301_s3 + $0x8] sm:$0xff]  ;;  %vm676_vm1 = vcmask 261120  }
  0x85   : > { %2689 = vsyncadd (%p3373_p12), [#allocation9], 4294966272  ;;  %2223 = vmatprep.subr.mxu1 %v2729_v0  ;;  %2231 = vmatprep.mubr.msk.f32.mxu1 %vm2730_vm0, %v2729_v0  ;;  %v672_v4 = vld [vmem:[%s3301_s3] sm:$0xff]  ;;  %v753_v6 = vld [vmem:[%s3302_s4 + $0x18] sm:$0xff]  ;;  %vm903_vm2 = vcmask 64512   ;;  %s2731_s27 = smov 112  }
  0x86   : > { %2245 = vmatprep.subr.mxu0 %v2729_v0  ;;  %2253 = vmatprep.mubr.msk.f32.mxu0 %vm2730_vm0, %v2729_v0  ;;  %v3032_v5 = vld [vmem:[%s580_s10] sm:$0xff]  ;;  %v752_v7 = vld [vmem:[%s3302_s4 + $0x10] sm:$0xff]  ;;  %v830_v11 = vld [vmem:[%s3303_s5 + $0x18] sm:$0xff]  ;;  %s2732_s14 = smov 120   ;;  %s2733_s26 = smov 104   ;;  %vm1588_vm4 = vcmask 130048  }
  0x87   : > { %2224 = vmatpush3.msra.mxu1 %v675_v1  ;;  %v751_v8 = vld [vmem:[%s3302_s4 + $0x8] sm:$0xff]  ;;  %v750_v9 = vld [vmem:[%s3302_s4] sm:$0xff]  ;;  %v671_v10 = vld [vmem:[%s589_s0] sm:$0xff]  ;;  %2246 = vmatpush3.msra.mxu0 %v830_v11  ;;  %s2734_s12 = smov 8   ;;  %s2735_s20 = smov 16   ;;  %vm1590_vm5 = vcmask 195584  }
  0x88   : > { %2225 = vmatprep.subr.mxu1 %v2729_v0  ;;  %v829_v12 = vld [vmem:[%s3303_s5 + $0x10] sm:$0xff]  ;;  %2247 = vmatprep.subr.mxu0 %v2729_v0  ;;  %v828_v13 = vld [vmem:[%s3303_s5 + $0x8] sm:$0xff]  ;;  %v827_v14 = vld [vmem:[%s3303_s5] sm:$0xff]  ;;  %s2736_s16 = smov 24   ;;  %s3374_s25 = sld [smem:[#allocation32_spill]]  ;;  %vm1799_vm6 = vcmask 523264  }
  0x89   : > { %2226 = vmatpush3.msra.mxu1 %v674_v2  ;;  %2248 = vmatpush3.msra.mxu0 %v829_v12  ;;  %v901_v27 = vld [vmem:[%s598_s18] sm:$0xff]  ;;  %s2137_s18 = sshll.u32 %s2990_s15, 5  ;;  %s3376_s10 = sld [smem:[#allocation30_spill]] }
  0x8a   : > { %2227 = vmatprep.subr.mxu1 %v2729_v0  ;;  %2249 = vmatprep.subr.mxu0 %v2729_v0  ;;  %vm902_vm3 = vcmp.gt.f32.partialorder %v901_v27, 0.0  ;;  %s3131_s1 = scalar_lea.vmem [#allocation12], %s2137_s18  ;;  %s3377_s8 = sld [smem:[#allocation20_spill]] }
  0x8b   : > { %2228 = vmatpush3.msra.mxu1 %v673_v3  ;;  %2250 = vmatpush3.msra.mxu0 %v828_v13  ;;  %s3378_s0 = sld [smem:[#allocation31_spill]]  ;;  %s2737_s13 = smov [#allocation12]  }
  0x8c   : > { %2229 = vmatprep.subr.mxu1 %v2729_v0  ;;  %2251 = vmatprep.subr.mxu0 %v2729_v0  ;;  %s3379_s19 = sld [smem:[#allocation25_spill]]  ;;  %s2606_s11 = sshll.u32 %s2737_s13, 4  ;;  %s2607_s11 = int_to_ptr.vmem [resolvable:$false] %s2606_s11 }
  0x8d   : > { %2230 = vmatpush3.msra.mxu1 %v672_v4  ;;  %2252 = vmatpush3.msra.mxu0 %v827_v14 }
  0x8e   : > { %2232 = vmatmul.mubr.msk.f32.vlgmr.msra.gmra.mxu1 %vm676_vm1, %v3032_v5  ;;  %2234 = vmatprep.subr.mxu1 %v2729_v0 }
  0x8f   : > { %2235 = vmatpush3.msra.mxu1 %v753_v6  ;;  %2242 = vmatprep.mubr.msk.f32.mxu1 %vm2730_vm0, %v2729_v0 }
  0x90   : > { %2236 = vmatprep.subr.mxu1 %v2729_v0  ;;  %2254 = vmatmul.mubr.msk.f32.vlgmr.msra.gmra.mxu0 %vm676_vm1, %v671_v10  ;;  %s2172_s30 = sshll.u32 %s3377_s8, 9 }
  0x91   : > { %2237 = vmatpush3.msra.mxu1 %v752_v7  ;;  %2266 = vmatprep.subr.mxu0 %v2729_v0 }
  0x92   : > { %2238 = vmatprep.subr.mxu1 %v2729_v0  ;;  %2268 = vmatprep.mubr.msk.f32.mxu0 %vm2730_vm0, %v2729_v0  ;;  %p3382_p9 = scmp.ne.s32.totalorder %s3379_s19, 0 }
  0x93   : > { %2239 = vmatpush3.msra.mxu1 %v751_v8 }
  0x94   : > { %2240 = vmatprep.subr.mxu1 %v2729_v0 }
  0x95   : > { %2241 = vmatpush3.msra.mxu1 %v750_v9 }
  0x96   : > { %2243 = vmatmul.mubr.msk.f32.vlgmr.msra.gmra.mxu1 %vm676_vm1, %v671_v10  ;;  %2256 = vmatprep.subr.mxu1 %v2729_v0 }
  0x97   : > { %2258 = vmatprep.mubr.msk.f32.mxu1 %vm2730_vm0, %v2729_v0 }
 0x14e   : > { %v746_v15 = vpop.f32.mrf.mxu1 }
 0x150   : > { %v2233_v16 = vpop.f32.mrf.mxu1  ;;  %v3091_v19 = vpop.f32.mrf.mxu0 }
 0x152   : > { %v2255_v20 = vpop.f32.mrf.mxu0 }
 0x156   : > { %v823_v17 = vpop.f32.mrf.mxu1 }
 0x157   : > { %1239 = vrot.lane.b32.xlu1 %v823_v17, %s2731_s27  ;;  %1069 = vrot.lane.b32.xlu0 %v823_v17, %s2732_s14 }
 0x158   : > { %2257 = vmatpush3.xpose.msk.msra.mxu1 %vm903_vm2, %v823_v17  ;;  %v2244_v18 = vpop.f32.mrf.mxu1 }
 0x159   : > { %2261 = vmatprep.subr.mxu1 %v2729_v0 }
 0x15b   : > { %2259 = vmatmul.mubr.msk.f32.vlgmr.msra.gmra.mxu1 %vm903_vm2, %v746_v15  ;;  %1237 = vrot.lane.b32.xlu1 %v746_v15, %s2731_s27 }
 0x15c   : > { %1067 = vrot.lane.b32.xlu0 %v746_v15, %s2732_s14  ;;  %2263 = vmatprep.mubr.msk.f32.mxu1 %vm2730_vm0, %v2729_v0 }
 0x15d   : > { %2262 = vmatpush3.msra.mxu1 %v3091_v19 }
 0x15e   : > { %2271 = vmatprep.subr.mxu1 %v2729_v0 }
 0x15f   : > { %1406 = vrot.lane.b32.xlu1 %v746_v15, %s2733_s26 }
 0x160   : > { %1408 = vrot.lane.b32.xlu0 %v823_v17, %s2733_s26 }
 0x1c9   : > { %v1070_v21 = vpop.permute.xlu0 %1069  ;;  %v1240_v22 = vpop.permute.xlu1 %1239 }
 0x1ca   : > { %2267 = vmatpush3.xpose.msk.msra.mxu0 %vm903_vm2, %v1070_v21 }
 0x1cb   : > { %2276 = vmatprep.subr.mxu0 %v2729_v0 }
 0x1cd   : > { %v1238_v24 = vpop.permute.xlu1 %1237 }
 0x1ce   : > { %v1068_v23 = vpop.permute.xlu0 %1067 }
 0x1cf   : > { %2269 = vmatmul.mubr.msk.f32.vlgmr.msra.gmra.mxu0 %vm903_vm2, %v1068_v23  ;;  %v1595_v23 = vld [vmem:[#allocation8 + $0x18] sm:$0xff] }
 0x1d0   : > { %2277 = vmatpush3.xpose.msk.msra.mxu0 %vm903_vm2, %v1240_v22  ;;  %2278 = vmatprep.mubr.msk.f32.mxu0 %vm2730_vm0, %v2729_v0 }
 0x1d1   : > { %2286 = vmatprep.subr.mxu0 %v2729_v0  ;;  %v1407_v26 = vpop.permute.xlu1 %1406 }
 0x1d2   : > { %v1409_v25 = vpop.permute.xlu0 %1408 }
 0x1d3   : > { %2279 = vmatmul.mubr.msk.f32.vlgmr.msra.gmra.mxu0 %vm903_vm2, %v1238_v24  ;;  %v1594_v24 = vld [vmem:[#allocation8 + $0x10] sm:$0xff] }
 0x1d4   : > { %2287 = vmatpush3.xpose.msk.msra.mxu0 %vm903_vm2, %v1409_v25  ;;  %2288 = vmatprep.mubr.msk.f32.mxu0 %vm2730_vm0, %v2729_v0  ;;  %v1593_v25 = vld [vmem:[#allocation8 + $0x8] sm:$0xff] }
 0x1d5   : > { %2296 = vmatprep.subr.mxu0 %v2729_v0 }
 0x1d7   : > { %2289 = vmatmul.mubr.msk.f32.vlgmr.msra.gmra.mxu0 %vm903_vm2, %v1407_v26  ;;  %v1592_v26 = vld [vmem:[#allocation8] sm:$0xff] }
 0x1d8   : > { %2304 = vmatprep.mubr.msk.f32.mxu0 %vm2730_vm0, %v2729_v0  ;;  %2297 = vmatpush3.msra.mxu0 %v1595_v23 }
 0x1d9   : > { %2298 = vmatprep.subr.mxu0 %v2729_v0 }
 0x1da   : > { %2299 = vmatpush3.msra.mxu0 %v1594_v24 }
 0x1db   : > { %2300 = vmatprep.subr.mxu0 %v2729_v0 }
 0x1dc   : > { %2301 = vmatpush3.msra.mxu0 %v1593_v25 }
 0x1dd   : > { %2302 = vmatprep.subr.mxu0 %v2729_v0 }
 0x1de   : > { %2303 = vmatpush3.msra.mxu0 %v1592_v26 }
 0x1df   : > { %2318 = vmatprep.subr.mxu0 %v2729_v0 }
 0x21b   : > { %v976_v28 = vpop.f32.mrf.mxu1 }
 0x21c   : > { %v980_v29 = vmul.f32 0.35355338, %v976_v28 }
 0x21d   : > { %v2260_v30 = vpop.f32.mrf.mxu1 }
 0x21e   : > { %v981_v31 = vsel %vm902_vm3, -1e+09, %v980_v29 }
 0x21f   : > { %v982_v32 = vsel %vm903_vm2, %v981_v31, -inf }
 0x220   : > { %983 = vmax.xlane.f32.xlu0 %v982_v32 }
 0x28f   : > { %v1141_v33 = vpop.f32.mrf.mxu0 }
 0x290   : > { %v1145_v34 = vmul.f32 0.35355338, %v1141_v33 }
 0x291   : > { %v2270_v35 = vpop.f32.mrf.mxu0 }
 0x292   : > { %v1146_v36 = vsel %vm902_vm3, -1e+09, %v1145_v34 }
 0x293   : > { %v1311_v37 = vpop.f32.mrf.mxu0  ;;  %v1147_v38 = vsel %vm903_vm2, %v1146_v36, -inf }
 0x294   : > { %v1315_v39 = vmul.f32 0.35355338, %v1311_v37  ;;  %1148 = vmax.xlane.f32.xlu1 %v1147_v38 }
 0x295   : > { %v2280_v40 = vpop.f32.mrf.mxu0 }
 0x296   : > { %v1316_v41 = vsel %vm902_vm3, -1e+09, %v1315_v39 }
 0x297   : > { %v1480_v42 = vpop.f32.mrf.mxu0  ;;  %v1317_v43 = vsel %vm903_vm2, %v1316_v41, -inf }
 0x298   : > { %v1484_v44 = vmul.f32 0.35355338, %v1480_v42  ;;  %1318 = vmax.xlane.f32.xlu0 %v1317_v43 }
 0x299   : > { %v2290_v45 = vpop.f32.mrf.mxu0 }
 0x29a   : > { %v1485_v46 = vsel %vm902_vm3, -1e+09, %v1484_v44 }
 0x29b   : > { %v1486_v47 = vsel %vm903_vm2, %v1485_v46, -inf }
 0x29c   : > { %1487 = vmax.xlane.f32.xlu0 %v1486_v47 }
 0x2a5   : > { %1161 = vrot.lane.b32.xlu1 %v3091_v19, %s2732_s14 }
 0x2a9   : > { %v984_v48 = vpop.xlane.xlu0 %983 }
 0x2aa   : > { %v985_v49 = vsub.f32 %v981_v31, %v984_v48  ;;  %v1702_v48 = vld [vmem:[#allocation10 + $0x18] sm:$0xff] }
 0x2ac   : > { %v986_v50 = vmul.f32 1.442695, %v985_v49  ;;  %v1701_v49 = vld [vmem:[#allocation10 + $0x10] sm:$0xff] }
 0x2ae   : > { %2446 = vpow2.f32 %v986_v50  ;;  %v1700_v50 = vld [vmem:[#allocation10 + $0x8] sm:$0xff] }
 0x2bb   : > { %v2447_v51 = vpop.eup %2446 }
 0x2bc   : > { %v988_v52 = vsel %vm903_vm2, %v2447_v51, 0.0 }
 0x2c9   : > { %989 = vadd.xlane.f32.xlu1 %v988_v52  ;;  %v1790_v52 = vld [vmem:[%s3307_s9 + $0x30] sm:$0xff] }
 0x31d   : > { %v1149_v53 = vpop.xlane.xlu1 %1148 }
 0x31e   : > { %v1150_v54 = vsub.f32 %v1146_v36, %v1149_v53  ;;  %v1789_v53 = vld [vmem:[%s3307_s9 + $0x28] sm:$0xff] }
 0x320   : > { %v1151_v55 = vmul.f32 1.442695, %v1150_v54  ;;  %v1788_v54 = vld [vmem:[%s3307_s9 + $0x20] sm:$0xff] }
 0x321   : > { %v1319_v56 = vpop.xlane.xlu0 %1318  ;;  %v1162_v6 = vpop.permute.xlu1 %1161 }
 0x322   : > { %2448 = vpow2.f32 %v1151_v55  ;;  %v1320_v57 = vsub.f32 %v1316_v41, %v1319_v56  ;;  %v1787_v55 = vld [vmem:[%s3307_s9 + $0x18] sm:$0xff] }
 0x324   : > { %v1321_v58 = vmul.f32 1.442695, %v1320_v57 }
 0x325   : > { %v1488_v59 = vpop.xlane.xlu0 %1487 }
 0x326   : > { %2450 = vpow2.f32 %v1321_v58  ;;  %v1489_v60 = vsub.f32 %v1485_v46, %v1488_v59 }
 0x328   : > { %v1490_v61 = vmul.f32 1.442695, %v1489_v60  ;;  %v2157_v60 = vld [vmem:[%s3374_s25] ss:$0 sm:$0xff]  ;;  %s1938_s25 = sshll.u32 %s3131_s1, 4  ;;  %s3224_s25 = int_to_ptr.vmem [resolvable:$true] %s1938_s25 }
 0x329   : > { %s2602_s28 = scalar_lea.vmem %s3224_s25, 512  ;;  %p2609_p10 = scmp.lt.s32.totalorder %s3224_s25, %s2607_s11 }
 0x32a   : > { %2452 = vpow2.f32 %v1490_v61  ;;  %p2603_p3 = scmp.ne.s32.totalorder %s3224_s25, %s2602_s28 }
 0x32c   : > { %p2604_p0 = pnand %p2603_p3, %p3382_p9 }
 0x32e   : > { %p2605_p7 = pneg %p2604_p0 }
 0x32f   : > { %v2449_v62 = vpop.eup %2448 }
 0x330   : > { %v1153_v63 = vsel %vm903_vm2, %v2449_v62, 0.0 }
 0x331   : > { %1154 = vadd.xlane.f32.xlu0 %v1153_v63 }
 0x333   : > { %v2451_v1 = vpop.eup %2450 }
 0x334   : > { %v1323_v2 = vsel %vm903_vm2, %v2451_v1, 0.0 }
 0x335   : > { %1324 = vadd.xlane.f32.xlu1 %v1323_v2  ;;  %v1786_v2 = vld [vmem:[%s3307_s9 + $0x10] sm:$0xff] }
 0x337   : > { %v2453_v3 = vpop.eup %2452 }
 0x338   : > { %v1492_v4 = vsel %vm903_vm2, %v2453_v3, 0.0 }
 0x339   : > { %1493 = vadd.xlane.f32.xlu0 %v1492_v4  ;;  %v1784_v4 = vld [vmem:[%s3307_s9] sm:$0xff] }
 0x346   : > { %1499 = vrot.lane.b32.xlu1 %v3091_v19, %s2733_s26  ;;  %s3375_s26 = sld [smem:[#allocation33_spill]] }
 0x34f   : > { %1330 = vrot.lane.b32.xlu0 %v3091_v19, %s2731_s27 }
 0x352   : > { %v990_v7 = vpop.xlane.xlu1 %989 }
 0x353   : > { %2454 = vrcp.f32 %v990_v7 }
 0x360   : > { %v2455_v8 = vpop.eup %2454 }
 0x361   : > { %v992_v9 = vmul.f32 %v2455_v8, %v2447_v51  ;;  %v1791_v51 = vld [vmem:[%s3307_s9 + $0x38] sm:$0xff] }
 0x363   : > { %993 = vst.msk [vmem:[%s3131_s1] sm:$0xff] %vm903_vm2, %v992_v9  ;;  %2264 = vmatmul.mubr.msk.f32.vlgmr.msra.gmra.mxu1 %vm903_vm2, %v992_v9 }
 0x364   : > { %2272 = vmatpush3.msra.mxu1 %v1162_v6  ;;  %2273 = vmatprep.mubr.msk.f32.mxu1 %vm2730_vm0, %v2729_v0  ;;  %v2159_v6 = vld [vmem:[%s3376_s10] ss:$0 sm:$0xff] }
 0x365   : > { %2281 = vmatprep.subr.mxu1 %v2729_v0 }
 0x3ba   : > { %v1155_v10 = vpop.xlane.xlu0 %1154 }
 0x3bb   : > { %2456 = vrcp.f32 %v1155_v10 }
 0x3be   : > { %v1325_v11 = vpop.xlane.xlu1 %1324 }
 0x3bf   : > { %2458 = vrcp.f32 %v1325_v11  ;;  %v2161_v11 = vld [vmem:[%s3378_s0] ss:$0 sm:$0xff] }
 0x3c2   : > { %v1494_v12 = vpop.xlane.xlu0 %1493  ;;  %v1500_v18 = vpop.permute.xlu1 %1499 }
 0x3c3   : > { %2460 = vrcp.f32 %v1494_v12 }
 0x3c6   : > { %v1331_v15 = vpop.permute.xlu0 %1330 }
 0x3c8   : > { %v2457_v13 = vpop.eup %2456 }
 0x3c9   : > { %v1157_v14 = vmul.f32 %v2457_v13, %v2449_v62  ;;  %v2158_v62 = vld [vmem:[%s3375_s26] ss:$0 sm:$0xff]  ;;  %s3380_s26 = sld [smem:[#allocation37_spill]] }
 0x3cb   : > { %2146 = vst.msk [vmem:[%s3131_s1 + $0x8] sm:$0xff] %vm903_vm2, %v1157_v14  ;;  %2274 = vmatmul.mubr.msk.f32.vlgmr.msra.gmra.mxu1 %vm903_vm2, %v1157_v14 }
 0x3cc   : > { %v2459_v16 = vpop.eup %2458  ;;  %2282 = vmatpush3.msra.mxu1 %v1331_v15  ;;  %2283 = vmatprep.mubr.msk.f32.mxu1 %vm2730_vm0, %v2729_v0 }
 0x3cd   : > { %2291 = vmatprep.subr.mxu1 %v2729_v0  ;;  %v1327_v17 = vmul.f32 %v2459_v16, %v2451_v1 }
 0x3cf   : > { %2150 = vst.msk [vmem:[%s3131_s1 + $0x10] sm:$0xff] %vm903_vm2, %v1327_v17  ;;  %2284 = vmatmul.mubr.msk.f32.vlgmr.msra.gmra.mxu1 %vm903_vm2, %v1327_v17  ;;  %s3381_s18 = smov %s3380_s26 }
 0x3d0   : > { %v2461_v19 = vpop.eup %2460  ;;  %2292 = vmatpush3.msra.mxu1 %v1500_v18  ;;  %2293 = vmatprep.mubr.msk.f32.mxu1 %vm2730_vm0, %v2729_v0 }
 0x3d1   : > { %v1496_v20 = vmul.f32 %v2461_v19, %v2453_v3  ;;  %2307 = vmatprep.subr.mxu1 %v2729_v0  ;;  %v1785_v3 = vld [vmem:[%s3307_s9 + $0x8] sm:$0xff] }
 0x3d3   : > { %2154 = vst.msk [vmem:[%s3131_s1 + $0x18] sm:$0xff] %vm903_vm2, %v1496_v20  ;;  %2294 = vmatmul.mubr.msk.f32.vlgmr.msra.gmra.mxu1 %vm903_vm2, %v1496_v20  ;;  %s2608_s1 = scalar_lea.vmem %s2607_s11, 1024 }
 0x3d4   : > { %2315 = vmatprep.mubr.msk.f32.mxu1 %vm2730_vm0, %v2729_v0  ;;  %2308 = vmatpush3.msra.mxu1 %v1702_v48  ;;  %p2610_p13 = scmp.lt.s32.totalorder %s2608_s1, %s2602_s28 }
 0x3d5   : > { %2309 = vmatprep.subr.mxu1 %v2729_v0 }
 0x3d6   : > { %2310 = vmatpush3.msra.mxu1 %v1701_v49  ;;  %p2611_p5 = por %p2610_p13, %p2609_p10 }
 0x3d7   : > { %2311 = vmatprep.subr.mxu1 %v2729_v0 }
 0x3d8   : > { %2312 = vmatpush3.msra.mxu1 %v1700_v50  ;;  %p2612_p1 = pnand %p2611_p5, %p2605_p7 }
 0x3d9   : > { %2313 = vmatprep.subr.mxu1 %v2729_v0 }
 0x423   : > { %v1063_v21 = vpop.f32.mrf.mxu1 }
 0x425   : > { %v2265_v22 = vpop.f32.mrf.mxu1 }
 0x48b   : > { %v1233_v27 = vpop.f32.mrf.mxu1 }
 0x48c   : > { %1576 = vrot.lane.b32.xlu1 %v1233_v27, %s2734_s12 }
 0x48d   : > { %v2275_v28 = vpop.f32.mrf.mxu1 }
 0x48f   : > { %v1402_v29 = vpop.f32.mrf.mxu1 }
 0x490   : > { %1580 = vrot.lane.b32.xlu0 %v1402_v29, %s2735_s20  ;;  %s3222_s20 = scalar_lea.hbm %s3380_s26, %s2172_s30 }
 0x491   : > { %v2285_v30 = vpop.f32.mrf.mxu1 }
 0x493   : > { %v1571_v31 = vpop.f32.mrf.mxu1 }
 0x494   : > { %1584 = vrot.lane.b32.xlu1 %v1571_v31, %s2736_s16  ;;  %s1910_s16 = scalar_lea.sflag [#allocation13], %s2990_s15 }
 0x495   : > { %v2295_v32 = vpop.f32.mrf.mxu1 }
 0x4fe   : > { %v1577_v33 = vpop.permute.xlu1 %1576 }
 0x4ff   : > { %v1587_v35 = vsel %vm903_vm2, %v1063_v21, %v1577_v33 }
 0x502   : > { %v1581_v34 = vpop.permute.xlu0 %1580 }
 0x503   : > { %v1589_v36 = vsel %vm1588_vm4, %v1587_v35, %v1581_v34 }
 0x506   : > { %v1585_v37 = vpop.permute.xlu1 %1584 }
 0x507   : > { %v1591_v38 = vsel %vm1590_vm5, %v1589_v36, %v1585_v37 }
 0x508   : > { %2305 = vmatmul.mubr.msk.f32.vlgmr.msra.gmra.mxu0 %vm676_vm1, %v1591_v38 }
 0x509   : > { %2334 = vmatprep.mubr.msk.f32.mxu0 %vm2730_vm0, %v2729_v0  ;;  %2319 = vmatpush3.msra.mxu0 %v1791_v51 }
 0x50a   : > { %2320 = vmatprep.subr.mxu0 %v2729_v0 }
 0x50b   : > { %2321 = vmatpush3.msra.mxu0 %v1790_v52 }
 0x50c   : > { %2322 = vmatprep.subr.mxu0 %v2729_v0 }
 0x50d   : > { %2323 = vmatpush3.msra.mxu0 %v1789_v53 }
 0x50e   : > { %2324 = vmatprep.subr.mxu0 %v2729_v0 }
 0x50f   : > { %2325 = vmatpush3.msra.mxu0 %v1788_v54 }
 0x510   : > { %2326 = vmatprep.subr.mxu0 %v2729_v0 }
 0x511   : > { %2327 = vmatpush3.msra.mxu0 %v1787_v55 }
 0x512   : > { %2328 = vmatprep.subr.mxu0 %v2729_v0 }
 0x513   : > { %2329 = vmatpush3.msra.mxu0 %v1786_v2 }
 0x514   : > { %2330 = vmatprep.subr.mxu0 %v2729_v0 }
 0x515   : > { %2331 = vmatpush3.msra.mxu0 %v1785_v3 }
 0x516   : > { %2332 = vmatprep.subr.mxu0 %v2729_v0 }
 0x517   : > { %2333 = vmatpush3.msra.mxu0 %v1784_v4 }
 0x5c8   : > { %v1665_v39 = vpop.f32.mrf.mxu0 }
 0x5c9   : > { %v1666_v40 = vadd.f32 %v1665_v39, %v3032_v5  ;;  %v1699_v5 = vld [vmem:[#allocation10] sm:$0xff] }
 0x5ca   : > { %v2306_v41 = vpop.f32.mrf.mxu0  ;;  %2314 = vmatpush3.msra.mxu1 %v1699_v5 }
 0x5cb   : > { %v1671_v42 = vsel %vm676_vm1, %v1666_v40, 0.0 }
 0x5cc   : > { %1672 = vadd.xlane.f32.xlu0 %v1671_v42 }
 0x655   : > { %v1673_v43 = vpop.xlane.xlu0 %1672 }
 0x656   : > { %v1675_v44 = vmul.f32 0.03125, %v1673_v43 }
 0x658   : > { %v1676_v45 = vsub.f32 %v1666_v40, %v1675_v44 }
 0x65a   : > { %v1677_v46 = vmul.f32 %v1676_v45, %v1676_v45 }
 0x65c   : > { %v1678_v47 = vsel %vm676_vm1, %v1677_v46, 0.0 }
 0x65d   : > { %1679 = vadd.xlane.f32.xlu1 %v1678_v47 }
 0x6e6   : > { %v1680_v56 = vpop.xlane.xlu1 %1679 }
 0x6e7   : > { %v1681_v57 = vmul.f32 0.03125, %v1680_v56 }
 0x6e9   : > { %v1682_v58 = vadd.f32 1e-05, %v1681_v57 }
 0x6eb   : > { %2462 = vrsqrt.f32 %v1682_v58 }
 0x6f8   : > { %v2463_v59 = vpop.eup %2462 }
 0x6f9   : > { %v1684_v61 = vmul.f32 %v2463_v59, %v1676_v45 }
 0x6fb   : > { %v1691_v63 = vmul.f32 %v2157_v60, %v1684_v61 }
 0x6fd   : > { %v1698_v1 = vadd.f32 %v2158_v62, %v1691_v63 }
 0x6ff   : > { %2316 = vmatmul.mubr.msk.f32.vlgmr.msra.gmra.mxu1 %vm676_vm1, %v1698_v1 }
 0x7bf   : > { %v1779_v7 = vpop.f32.mrf.mxu1 }
 0x7c0   : > { %v1780_v8 = vadd.f32 %v2159_v6, %v1779_v7 }
 0x7c1   : > { %v2317_v9 = vpop.f32.mrf.mxu1 }
 0x7c2   : > { %v1783_v10 = vmax.f32 %v1780_v8, 0.0 }
 0x7c4   : > { %2335 = vmatmul.mubr.msk.f32.vlgmr.msra.gmra.mxu0 %vm1799_vm6, %v1783_v10 }
 0x884   : > { %v1869_v12 = vpop.f32.mrf.mxu0 }
 0x885   : > { %v1870_v0 = vadd.f32 %v2161_v11, %v1869_v12 }
 0x886   : > { %v2336_v13 = vpop.f32.mrf.mxu0 }
 0x887   : > { %v1873_v14 = vadd.f32 %v1870_v0, %v1698_v1 }
 0x889   : > { %v1876_v15 = vsel %vm676_vm1, %v1873_v14, 0.0 }
 0x88a   : > { %1877 = vadd.xlane.f32.xlu0 %v1876_v15 }
 0x913   : > { %v1878_v16 = vpop.xlane.xlu0 %1877 }
 0x914   : > { %v1879_v17 = vmul.f32 0.03125, %v1878_v16 }
 0x916   : > { %v1880_v18 = vsub.f32 %v1873_v14, %v1879_v17 }
 0x918   : > { %v1881_v19 = vmul.f32 %v1880_v18, %v1880_v18 }
 0x91a   : > { %v1882_v20 = vsel %vm676_vm1, %v1881_v19, 0.0 }
 0x91b   : > { %1883 = vadd.xlane.f32.xlu0 %v1882_v20 }
 0x91c   : > { %2615 = shalt.err (!%p2612_p1)
}
 0x91d   : > { %s2616_s21 = scalar_lea.hbm %s3222_s20, 512  ;;  %s2620_s24 = scalar_lea.hbm %s3381_s18, 1024 }
 0x91e   : > { %p2617_p4 = scmp.ne.s32.totalorder %s3222_s20, %s2616_s21  ;;  %p2621_p11 = scmp.lt.s32.totalorder %s3222_s20, %s3381_s18 }
 0x91f   : > { %p2622_p2 = scmp.lt.s32.totalorder %s2620_s24, %s2616_s21 }
 0x920   : > { %p2618_p6 = pnand %p2617_p4, %p3382_p9 }
 0x921   : > { %p2623_p12 = por %p2622_p2, %p2621_p11 }
 0x922   : > { %p2619_p8 = pneg %p2618_p6 }
 0x924   : > { %p2624_p3 = pnand %p2623_p12, %p2619_p8 }
 0x926   : > { %2627 = shalt.err (!%p2624_p3)
}
 0x927   : > { %s2738_s30 = smov 128   ;;  %s3383_s26 = sld [smem:[#allocation34_spill]] }
 0x928   : > { %2352 = dma.vmem_to_hbm [thread:$0]  (%p3382_p9), %s3224_s25, 512, %s3222_s20, %s1910_s16, %s2738_s30, %s2738_s30, %s2734_s12  }
 0x929   : > { %s3384_s11 = sld [smem:[#allocation35_spill]]  ;;  %s2167_s1 = sshll.u32 %s3377_s8, 7 }
 0x92a   : > { %s662_s21 = scalar_lea.vmem [#allocation11], %s2993_s6  ;;  %s3385_s20 = sld [smem:[#allocation36_spill]] }
 0x92b   : > { %s1924_s17 = sshll.u32 %s662_s21, 4  ;;  %s1905_s10 = scalar_lea.sflag [#allocation4], %s2990_s15  ;;  %s1925_s17 = int_to_ptr.vmem [resolvable:$true] %s1924_s17 }
 0x92c   : > { %s2628_s24 = scalar_lea.vmem %s1925_s17, 128  ;;  %s2739_s29 = smov [#allocation11]  }
 0x92d   : > { %v2163_v25 = vld [vmem:[%s3383_s26] ss:$0 sm:$0xff]  ;;  %p2629_p0 = scmp.ne.s32.totalorder %s1925_s17, %s2628_s24  ;;  %s2632_s0 = sshll.u32 %s2739_s29, 4  ;;  %s2633_s0 = int_to_ptr.vmem [resolvable:$false] %s2632_s0 }
 0x92e   : > { %s2634_s6 = scalar_lea.vmem %s2633_s0, 256  ;;  %p2635_p13 = scmp.lt.s32.totalorder %s1925_s17, %s2633_s0 }
 0x92f   : > { %v2164_v27 = vld [vmem:[%s3384_s11] ss:$0 sm:$0xff]  ;;  %p2630_p7 = pnand %p2629_p0, %p3382_p9  ;;  %p2636_p5 = scmp.lt.s32.totalorder %s2634_s6, %s2628_s24 }
 0x930   : > { %s1922_s16 = scalar_lea.hbm %s3385_s20, %s2167_s1 }
 0x931   : > { %p2631_p10 = pneg %p2630_p7  ;;  %p2637_p1 = por %p2636_p5, %p2635_p13 }
 0x933   : > { %p2638_p4 = pnand %p2637_p1, %p2631_p10 }
 0x9a4   : > { %v1884_v21 = vpop.xlane.xlu0 %1883 }
 0x9a5   : > { %v1885_v22 = vmul.f32 0.03125, %v1884_v21 }
 0x9a7   : > { %v1886_v23 = vadd.f32 1e-05, %v1885_v22 }
 0x9a9   : > { %2464 = vrsqrt.f32 %v1886_v23 }
 0x9b6   : > { %v2465_v24 = vpop.eup %2464 }
 0x9b7   : > { %v1888_v26 = vmul.f32 %v2465_v24, %v1880_v18 }
 0x9b9   : > { %v1895_v28 = vmul.f32 %v2163_v25, %v1888_v26 }
 0x9bb   : > { %v1902_v29 = vadd.f32 %v2164_v27, %v1895_v28 }
 0x9bd   : > { %1903 = vst.msk [vmem:[%s662_s21] sm:$0xff] %vm676_vm1, %v1902_v29 }
 0x9be   : > { %2641 = shalt.err (!%p2638_p4)
}
 0x9bf   : > { %s2642_s8 = scalar_lea.hbm %s1922_s16, 128  ;;  %s2646_s27 = scalar_lea.hbm %s3385_s20, 256 }
 0x9c0   : > { %p2643_p6 = scmp.ne.s32.totalorder %s1922_s16, %s2642_s8  ;;  %p2647_p2 = scmp.lt.s32.totalorder %s1922_s16, %s3385_s20 }
 0x9c1   : > { %p2648_p12 = scmp.lt.s32.totalorder %s2646_s27, %s2642_s8 }
 0x9c2   : > { %p2644_p8 = pnand %p2643_p6, %p3382_p9 }
 0x9c3   : > { %p2649_p3 = por %p2648_p12, %p2647_p2 }
 0x9c4   : > { %p2645_p11 = pneg %p2644_p8 }
 0x9c6   : > { %p2650_p0 = pnand %p2649_p3, %p2645_p11 }
 0x9c8   : > { %2653 = shalt.err (!%p2650_p0)
}
 0x9c9   : > { %2351 = dma.vmem_to_hbm [thread:$0]  (%p3382_p9), %s1925_s17, 128, %s1922_s16, %s1905_s10  }
 0x9ca PF: > { %s3386_s28 = sld [smem:[#allocation19_spill]] }
 0x9cb   : > { %s3387_s13 = sld [smem:[#allocation23_spill]] }
 0x9cc   : > { %s3388_s11 = sld [smem:[#allocation22_spill]] }
 0x9d0   : > { %s1953_s1 = sand.u32 1, %s3386_s28  }
 0x9d1   : > { %p3389_p7 = scmp.ne.s32.totalorder %s3387_s13, 0  ;;  %s1954_s21 = scalar_lea.sflag [#allocation4], %s1953_s1 }
 0x9d2   : > { %p3390_p10 = scmp.ge.s32.totalorder %s3388_s11, 2 }
 0x9d4   : > { %p2373_p13 = pnand %p3390_p10, %p3389_p7 }
 0x9d6   : > { %p2374_p5 = pneg %p2373_p13 }
 0x9d8   : > { %2691 = dma.done.wait (%p2374_p5), %s1954_s21, 128  }
 0x9d9   : > { %2693 = vsyncadd (%p2374_p5), %s1954_s21, 4294967168  ;;  %s1963_s12 = scalar_lea.sflag [#allocation13], %s1953_s1 }
 0x9da   : > { %2695 = dma.done.wait (%p2374_p5), %s1963_s12, 512  }
 0x9db   : > { %2697 = vsyncadd (%p2374_p5), %s1963_s12, 4294966784  ;;  %s40_s26 = sadd.s32 1, %s3388_s11   ;;  %s3391_s19 = sld [smem:[#allocation26_spill]] }
 0x9dc   : > { %p37_p1 = scmp.ge.s32.totalorder %s40_s26, 4   ;;  %s3392_s24 = sld [smem:[#allocation21_spill]] }
 0x9dd   : > { %s3393_s25 = sld [smem:[#allocation24_spill]]  ;;  %s3394_s21 = smov %s2704_s22 }
 0x9de   : > { %s3395_s22 = smov %s2708_s23  ;;  %39 = sbr.rel (!%p37_p1) target bundleno = 23 (0x17), region = 177 }
 0x9e1   : > { %s3396_s23 = smov %s3391_s19 }
 0x9e3   :  { %1968 = vsyncpa [#allocation3], 1 }
 0x9e4   :  { %1970 = vsyncpa [#allocation3 + $0x1], 1 }
 0x9e5   :  { %1971 = vsyncpa [#allocation6], 1 }
 0x9e6   :  { %1973 = vsyncpa [#allocation6 + $0x1], 1 }
 0x9e7   :  { %1974 = vsyncpa [#allocation9], 1 }
 0x9e8   :  { %1975 = vsyncpa [#allocation4], 1 }
 0x9e9   :  { %1977 = vsyncpa [#allocation4 + $0x1], 1 }
 0x9ea   :  { %1978 = vsyncpa [#allocation13], 1 }
 0x9eb   :  { %1980 = vsyncpa [#allocation13 + $0x1], 1 }

</bundles_post_ra>
